<compile_context>
chip_gen: v5e
topology: v5e:2x2
jax: 0.10.0
libtpu: 0.0.40
codegen_flags: <defaults>
</compile_context>

<pallas_src>
import functools
import math

import jax
import jax.numpy as jnp
from jax.experimental import pallas as pl
from jax.experimental.pallas import tpu as pltpu


# ---------------------------------------------------------------------------
# Pallas kernel: fused  y = act(x @ w + b)   (bf16 inputs, f32 accumulate)
# ---------------------------------------------------------------------------
def _matmul_bias_act_kernel(x_ref, w_ref, b_ref, o_ref, *, relu):
    acc = jnp.dot(x_ref[...], w_ref[...], preferred_element_type=jnp.float32)
    acc = acc + b_ref[...].astype(jnp.float32)
    if relu:
        acc = jnp.maximum(acc, 0.0)
    o_ref[...] = acc.astype(o_ref.dtype)


def _choose_tile_m(M, max_tile=1024):
    """Pick a row tile that divides M when possible (no pad / no out-slice).

    Prefers >= 2 grid tiles so both TensorCores on v7x get work.
    Returns (tile_m, m_padded)."""
    t = math.gcd(M, max_tile)               # largest pow-2 divisor of M, capped
    if t >= 16:
        while t >= 32 and M // t < 2:       # keep >= 2 tiles when affordable
            t //= 2
        return t, M
    if M <= max_tile:                       # ragged/small M: one full block
        return M, M
    return max_tile, pl.cdiv(M, max_tile) * max_tile


def matmul_bias_act(x, w, b, *, relu, out_dtype, max_tile_m=1024):
    """x: (M, K) bf16, w: (K, N) bf16, b: (N,) f32 -> (M, N) out_dtype."""
    M, K = x.shape
    K2, N = w.shape
    assert K == K2 and b.shape == (N,)

    tile_m, m_pad = _choose_tile_m(M, max_tile_m)
    if m_pad != M:
        x = jnp.pad(x, ((0, m_pad - M), (0, 0)))
    b2 = b.reshape(1, N).astype(jnp.float32)

    out_bytes = m_pad * N * jnp.dtype(out_dtype).itemsize
    in_bytes = (x.size * x.dtype.itemsize + w.size * w.dtype.itemsize
                + b2.size * 4)

    out = pl.pallas_call(
        functools.partial(_matmul_bias_act_kernel, relu=relu),
        out_shape=jax.ShapeDtypeStruct((m_pad, N), out_dtype),
        grid_spec=pltpu.PrefetchScalarGridSpec(
            num_scalar_prefetch=0,
            grid=(m_pad // tile_m,),
            in_specs=[
                pl.BlockSpec((tile_m, K), lambda i: (i, 0)),   # row tile of x
                pl.BlockSpec((K, N), lambda i: (0, 0)),        # resident weight
                pl.BlockSpec((1, N), lambda i: (0, 0)),        # bias row
            ],
            out_specs=pl.BlockSpec((tile_m, N), lambda i: (i, 0)),
        ),
        compiler_params=pltpu.CompilerParams(
            dimension_semantics=("parallel",)),
        cost_estimate=pl.CostEstimate(
            flops=2 * m_pad * K * N,
            transcendentals=0,
            bytes_accessed=in_bytes + out_bytes),
    )(x, w, b2)
    return out[:M] if m_pad != M else out


# ---------------------------------------------------------------------------
# Conv wrappers — NHWC activations, patches built with cheap strided slices
# ---------------------------------------------------------------------------
def _round_up(v, m):
    return ((v + m - 1) // m) * m


def _pad_last(a, target):
    pad = target - a.shape[-1]
    if pad == 0:
        return a
    cfg = [(0, 0)] * (a.ndim - 1) + [(0, pad)]
    return jnp.pad(a, cfg)


def _pad_rows(a, target):
    pad = target - a.shape[0]
    if pad == 0:
        return a
    return jnp.pad(a, ((0, pad), (0, 0)))


def conv3x3_s2_relu(x_nhwc, w, b, *, out_dtype=jnp.bfloat16):
    """3x3 conv, stride 2, explicit padding=1 (matches nn.Conv2d), fused ReLU.

    x_nhwc: (B, H, W, Cin) bf16.  w: (Cout, Cin, 3, 3) f32.  b: (Cout,) f32."""
    B, H, W, Cin = x_nhwc.shape
    Cout = w.shape[0]
    Ho, Wo = H // 2, W // 2

    xp = jnp.pad(x_nhwc, ((0, 0), (1, 1), (1, 1), (0, 0)))
    # 9 strided taps, channel order (dy, dx, cin) — matches the weight reshape.
    taps = [xp[:, dy:dy + 2 * Ho:2, dx:dx + 2 * Wo:2, :]
            for dy in range(3) for dx in range(3)]
    patches = jnp.concatenate(taps, axis=-1)            # (B, Ho, Wo, 9*Cin)
    patches = patches.reshape(B * Ho * Wo, 9 * Cin)     # free in NHWC

    wm = jnp.transpose(w, (2, 3, 1, 0)).reshape(9 * Cin, Cout)  # (dy,dx,cin)->rows

    kp = _round_up(9 * Cin, 8)                          # e.g. 27 -> 32
    patches = _pad_last(patches.astype(jnp.bfloat16), kp)
    wm = _pad_rows(wm.astype(jnp.bfloat16), kp)

    y = matmul_bias_act(patches, wm, b, relu=True, out_dtype=out_dtype)
    return y.reshape(B, Ho, Wo, Cout)


def conv1x1(x_nhwc, w, b, *, relu=False, out_dtype=jnp.float32):
    """1x1 conv (embedding-head score layer).  w: (Cout, Cin, 1, 1)."""
    B, H, W, Cin = x_nhwc.shape
    Cout = w.shape[0]
    xm = x_nhwc.reshape(B * H * W, Cin).astype(jnp.bfloat16)
    wm = w.reshape(Cout, Cin).T.astype(jnp.bfloat16)
    kp = _round_up(Cin, 8)
    xm = _pad_last(xm, kp)
    wm = _pad_rows(wm, kp)
    y = matmul_bias_act(xm, wm, b, relu=relu, out_dtype=out_dtype)
    return y.reshape(B, H, W, Cout)


def upsample_bilinear_nhwc(x_nhwc, size_hw):
    """F.interpolate(..., mode='bilinear', align_corners=False) equivalent."""
    B, _, _, C = x_nhwc.shape
    return jax.image.resize(x_nhwc, (B, size_hw[0], size_hw[1], C),
                            method="bilinear")


# ---------------------------------------------------------------------------
# Parameters (deterministic synthetic init; shapes follow the module:
# feature extractor -> x_8s/x_16s/x_32s, embedding head score convs -> 64 ch)
# ---------------------------------------------------------------------------
EMB_DIM = 64                      # n_classes=64 in WiseNet.__init__
FEAT_CH = (16, 24, 32, 48, 64)    # channels at strides 2, 4, 8, 16, 32


def init_params(key):
    def conv_init(k, cout, cin, kh, kw):
        kw_, kb_ = jax.random.split(k)
        scale = 1.0 / jnp.sqrt(cin * kh * kw)
        return (jax.random.normal(kw_, (cout, cin, kh, kw), jnp.float32) * scale,
                jax.random.normal(kb_, (cout,), jnp.float32) * 0.01)

    keys = jax.random.split(key, 8)
    p = {}
    cins = (3,) + FEAT_CH[:-1]
    for i, (cin, cout) in enumerate(zip(cins, FEAT_CH)):
        p[f"c{i+1}_w"], p[f"c{i+1}_b"] = conv_init(keys[i], cout, cin, 3, 3)
    p["s8_w"],  p["s8_b"]  = conv_init(keys[5], EMB_DIM, FEAT_CH[2], 1, 1)
    p["s16_w"], p["s16_b"] = conv_init(keys[6], EMB_DIM, FEAT_CH[3], 1, 1)
    p["s32_w"], p["s32_b"] = conv_init(keys[7], EMB_DIM, FEAT_CH[4], 1, 1)
    return p


# ---------------------------------------------------------------------------
# TwoHeads_CityScapes.forward
# ---------------------------------------------------------------------------
def two_heads_cityscapes_forward(params, x_input):
    """x_input: (N, 3, H, W) f32 NCHW.  Returns dict like the PyTorch module."""
    B, C, H, W = x_input.shape
    # One transpose in: NCHW -> NHWC, bf16 activations for the whole backbone.
    x = jnp.transpose(x_input, (0, 2, 3, 1)).astype(jnp.bfloat16)

    # --- feature_extracter.extract_features(x_input) -> x_8s, x_16s, x_32s ---
    h = conv3x3_s2_relu(x, params["c1_w"], params["c1_b"])     # stride 2
    h = conv3x3_s2_relu(h, params["c2_w"], params["c2_b"])     # stride 4
    x_8s  = conv3x3_s2_relu(h,     params["c3_w"], params["c3_b"])  # stride 8
    x_16s = conv3x3_s2_relu(x_8s,  params["c4_w"], params["c4_b"])  # stride 16
    x_32s = conv3x3_s2_relu(x_16s, params["c5_w"], params["c5_b"])  # stride 32

    # --- embedding_head.upsample(x_input, x_8s, x_16s, x_32s) (FCN-8s style) ---
    s32 = conv1x1(x_32s, params["s32_w"], params["s32_b"], out_dtype=jnp.float32)
    s16 = conv1x1(x_16s, params["s16_w"], params["s16_b"], out_dtype=jnp.float32)
    s8  = conv1x1(x_8s,  params["s8_w"],  params["s8_b"],  out_dtype=jnp.float32)
    s16 = s16 + upsample_bilinear_nhwc(s32, x_16s.shape[1:3])
    s8  = s8 + upsample_bilinear_nhwc(s16, x_8s.shape[1:3])
    emb_nhwc = upsample_bilinear_nhwc(s8, (H, W))              # (N, H, W, 64)

    # One transpose out: NHWC -> NCHW to match the PyTorch module's layout.
    embedding_mask = jnp.transpose(emb_nhwc, (0, 3, 1, 2))     # (N, 64, H, W)

    # TODO(synk): self.LCFCN.predict(..., 'pointList') needs a pretrained
    # LCFCN_BO checkpoint plus CPU blob/peak extraction (connected components);
    # no clean Pallas equivalent, so we return an empty list.
    pointList = []

    return {"embedding_mask": embedding_mask, "pointList": pointList}


# ---------------------------------------------------------------------------
if __name__ == "__main__":
    key = jax.random.PRNGKey(0)
    pkey, xkey = jax.random.split(key)
    params = init_params(pkey)

    # Small-but-consistent shapes: H, W must be divisible by 32 (x_32s head).
    x = jax.random.normal(xkey, (2, 3, 64, 64), jnp.float32)

    fwd = jax.jit(two_heads_cityscapes_forward)
    out = fwd(params, x)
    emb = jax.block_until_ready(out["embedding_mask"])

    assert emb.shape == (2, EMB_DIM, 64, 64), emb.shape
    assert emb.dtype == jnp.float32
    assert bool(jnp.all(jnp.isfinite(emb)))
    print("KERNEL_OK")
</pallas_src>

<mosaic_0001>
module attributes {stable_mosaic.version = 11 : i64} {
  func.func @_matmul_bias_act_kernel(%arg0: i32, %arg1: memref<1024x32xbf16, #tpu.memory_space<vmem>>, %arg2: memref<32x16xbf16, #tpu.memory_space<vmem>>, %arg3: memref<1x16xf32, #tpu.memory_space<vmem>>, %arg4: memref<1024x16xbf16, #tpu.memory_space<vmem>>) attributes {dimension_semantics = [#tpu.dimension_semantics<parallel>], iteration_bounds = array<i64: 2>, scalar_prefetch = 0 : i64, scratch_operands = 0 : i64, tpu.core_type = #tpu.core_type<tc>, window_params = [{transform_indices = @transform_0, window_bounds = array<i64: 1024, 32>}, {pipeline_mode = #tpu.pipeline_mode<synchronous>, transform_indices = @transform_1, window_bounds = array<i64: 32, 16>}, {pipeline_mode = #tpu.pipeline_mode<synchronous>, transform_indices = @transform_2, window_bounds = array<i64: 1, 16>}, {transform_indices = @transform_3, window_bounds = array<i64: 1024, 16>}]} {
    %c0 = arith.constant 0 : index
    %c0_0 = arith.constant 0 : index
    %0 = vector.load %arg1[%c0, %c0_0] : memref<1024x32xbf16, #tpu.memory_space<vmem>>, vector<1024x32xbf16>
    %c0_1 = arith.constant 0 : index
    %c0_2 = arith.constant 0 : index
    %1 = vector.load %arg2[%c0_1, %c0_2] : memref<32x16xbf16, #tpu.memory_space<vmem>>, vector<32x16xbf16>
    %cst = arith.constant dense<0.000000e+00> : vector<1024x16xf32>
    %2 = tpu.matmul %0, %1, %cst {dimension_numbers = #tpu.dot_dimension_numbers<[1], [0], [0], [1], [0, 0, 1, 1], [], []>} : vector<1024x32xbf16>, vector<32x16xbf16>, vector<1024x16xf32> -> vector<1024x16xf32>
    %c0_3 = arith.constant 0 : index
    %c0_4 = arith.constant 0 : index
    %3 = vector.load %arg3[%c0_3, %c0_4] : memref<1x16xf32, #tpu.memory_space<vmem>>, vector<1x16xf32>
    %4 = vector.broadcast %3 : vector<1x16xf32> to vector<1024x16xf32>
    %5 = arith.addf %2, %4 : vector<1024x16xf32>
    %cst_5 = arith.constant 0.000000e+00 : f32
    %6 = vector.broadcast %cst_5 : f32 to vector<1024x16xf32>
    %7 = arith.maximumf %5, %6 : vector<1024x16xf32>
    %8 = arith.truncf %7 : vector<1024x16xf32> to vector<1024x16xbf16>
    %c0_6 = arith.constant 0 : index
    %c0_7 = arith.constant 0 : index
    %9 = vector.load %arg4[%c0_6, %c0_7] : memref<1024x16xbf16, #tpu.memory_space<vmem>>, vector<1024x16xbf16>
    tpu.vector_store %arg4[%c0_6, %c0_7], %8 {strides = array<i32>} : memref<1024x16xbf16, #tpu.memory_space<vmem>>, vector<1024x16xbf16>,
    return
  }
  func.func @transform_0(%arg0: i32) -> (i32, i32) {
    %c0_i32 = arith.constant 0 : i32
    %c0_i32_0 = arith.constant 0 : i32
    return %arg0, %c0_i32 : i32, i32
  }
  func.func @transform_1(%arg0: i32) -> (i32, i32) {
    %c0_i32 = arith.constant 0 : i32
    %c0_i32_0 = arith.constant 0 : i32
    %c0_i32_1 = arith.constant 0 : i32
    return %c0_i32, %c0_i32_0 : i32, i32
  }
  func.func @transform_2(%arg0: i32) -> (i32, i32) {
    %c0_i32 = arith.constant 0 : i32
    %c0_i32_0 = arith.constant 0 : i32
    %c0_i32_1 = arith.constant 0 : i32
    return %c0_i32, %c0_i32_0 : i32, i32
  }
  func.func @transform_3(%arg0: i32) -> (i32, i32) {
    %c0_i32 = arith.constant 0 : i32
    %c0_i32_0 = arith.constant 0 : i32
    return %arg0, %c0_i32 : i32, i32
  }
}

module attributes {stable_mosaic.version = 11 : i64} {
  func.func @_matmul_bias_act_kernel(%arg0: i32, %arg1: memref<256x144xbf16, #tpu.memory_space<vmem>>, %arg2: memref<144x24xbf16, #tpu.memory_space<vmem>>, %arg3: memref<1x24xf32, #tpu.memory_space<vmem>>, %arg4: memref<256x24xbf16, #tpu.memory_space<vmem>>) attributes {dimension_semantics = [#tpu.dimension_semantics<parallel>], iteration_bounds = array<i64: 2>, scalar_prefetch = 0 : i64, scratch_operands = 0 : i64, tpu.core_type = #tpu.core_type<tc>, window_params = [{transform_indices = @transform_0, window_bounds = array<i64: 256, 144>}, {pipeline_mode = #tpu.pipeline_mode<synchronous>, transform_indices = @transform_1, window_bounds = array<i64: 144, 24>}, {pipeline_mode = #tpu.pipeline_mode<synchronous>, transform_indices = @transform_2, window_bounds = array<i64: 1, 24>}, {transform_indices = @transform_3, window_bounds = array<i64: 256, 24>}]} {
    %c0 = arith.constant 0 : index
    %c0_0 = arith.constant 0 : index
    %0 = vector.load %arg1[%c0, %c0_0] : memref<256x144xbf16, #tpu.memory_space<vmem>>, vector<256x144xbf16>
    %c0_1 = arith.constant 0 : index
    %c0_2 = arith.constant 0 : index
    %1 = vector.load %arg2[%c0_1, %c0_2] : memref<144x24xbf16, #tpu.memory_space<vmem>>, vector<144x24xbf16>
    %cst = arith.constant dense<0.000000e+00> : vector<256x24xf32>
    %2 = tpu.matmul %0, %1, %cst {dimension_numbers = #tpu.dot_dimension_numbers<[1], [0], [0], [1], [0, 0, 1, 1], [], []>} : vector<256x144xbf16>, vector<144x24xbf16>, vector<256x24xf32> -> vector<256x24xf32>
    %c0_3 = arith.constant 0 : index
    %c0_4 = arith.constant 0 : index
    %3 = vector.load %arg3[%c0_3, %c0_4] : memref<1x24xf32, #tpu.memory_space<vmem>>, vector<1x24xf32>
    %4 = vector.broadcast %3 : vector<1x24xf32> to vector<256x24xf32>
    %5 = arith.addf %2, %4 : vector<256x24xf32>
    %cst_5 = arith.constant 0.000000e+00 : f32
    %6 = vector.broadcast %cst_5 : f32 to vector<256x24xf32>
    %7 = arith.maximumf %5, %6 : vector<256x24xf32>
    %8 = arith.truncf %7 : vector<256x24xf32> to vector<256x24xbf16>
    %c0_6 = arith.constant 0 : index
    %c0_7 = arith.constant 0 : index
    %9 = vector.load %arg4[%c0_6, %c0_7] : memref<256x24xbf16, #tpu.memory_space<vmem>>, vector<256x24xbf16>
    tpu.vector_store %arg4[%c0_6, %c0_7], %8 {strides = array<i32>} : memref<256x24xbf16, #tpu.memory_space<vmem>>, vector<256x24xbf16>,
    return
  }
  func.func @transform_0(%arg0: i32) -> (i32, i32) {
    %c0_i32 = arith.constant 0 : i32
    %c0_i32_0 = arith.constant 0 : i32
    return %arg0, %c0_i32 : i32, i32
  }
  func.func @transform_1(%arg0: i32) -> (i32, i32) {
    %c0_i32 = arith.constant 0 : i32
    %c0_i32_0 = arith.constant 0 : i32
    %c0_i32_1 = arith.constant 0 : i32
    return %c0_i32, %c0_i32_0 : i32, i32
  }
  func.func @transform_2(%arg0: i32) -> (i32, i32) {
    %c0_i32 = arith.constant 0 : i32
    %c0_i32_0 = arith.constant 0 : i32
    %c0_i32_1 = arith.constant 0 : i32
    return %c0_i32, %c0_i32_0 : i32, i32
  }
  func.func @transform_3(%arg0: i32) -> (i32, i32) {
    %c0_i32 = arith.constant 0 : i32
    %c0_i32_0 = arith.constant 0 : i32
    return %arg0, %c0_i32 : i32, i32
  }
}

module attributes {stable_mosaic.version = 11 : i64} {
  func.func @_matmul_bias_act_kernel(%arg0: i32, %arg1: memref<64x216xbf16, #tpu.memory_space<vmem>>, %arg2: memref<216x32xbf16, #tpu.memory_space<vmem>>, %arg3: memref<1x32xf32, #tpu.memory_space<vmem>>, %arg4: memref<64x32xbf16, #tpu.memory_space<vmem>>) attributes {dimension_semantics = [#tpu.dimension_semantics<parallel>], iteration_bounds = array<i64: 2>, scalar_prefetch = 0 : i64, scratch_operands = 0 : i64, tpu.core_type = #tpu.core_type<tc>, window_params = [{transform_indices = @transform_0, window_bounds = array<i64: 64, 216>}, {pipeline_mode = #tpu.pipeline_mode<synchronous>, transform_indices = @transform_1, window_bounds = array<i64: 216, 32>}, {pipeline_mode = #tpu.pipeline_mode<synchronous>, transform_indices = @transform_2, window_bounds = array<i64: 1, 32>}, {transform_indices = @transform_3, window_bounds = array<i64: 64, 32>}]} {
    %c0 = arith.constant 0 : index
    %c0_0 = arith.constant 0 : index
    %0 = vector.load %arg1[%c0, %c0_0] : memref<64x216xbf16, #tpu.memory_space<vmem>>, vector<64x216xbf16>
    %c0_1 = arith.constant 0 : index
    %c0_2 = arith.constant 0 : index
    %1 = vector.load %arg2[%c0_1, %c0_2] : memref<216x32xbf16, #tpu.memory_space<vmem>>, vector<216x32xbf16>
    %cst = arith.constant dense<0.000000e+00> : vector<64x32xf32>
    %2 = tpu.matmul %0, %1, %cst {dimension_numbers = #tpu.dot_dimension_numbers<[1], [0], [0], [1], [0, 0, 1, 1], [], []>} : vector<64x216xbf16>, vector<216x32xbf16>, vector<64x32xf32> -> vector<64x32xf32>
    %c0_3 = arith.constant 0 : index
    %c0_4 = arith.constant 0 : index
    %3 = vector.load %arg3[%c0_3, %c0_4] : memref<1x32xf32, #tpu.memory_space<vmem>>, vector<1x32xf32>
    %4 = vector.broadcast %3 : vector<1x32xf32> to vector<64x32xf32>
    %5 = arith.addf %2, %4 : vector<64x32xf32>
    %cst_5 = arith.constant 0.000000e+00 : f32
    %6 = vector.broadcast %cst_5 : f32 to vector<64x32xf32>
    %7 = arith.maximumf %5, %6 : vector<64x32xf32>
    %8 = arith.truncf %7 : vector<64x32xf32> to vector<64x32xbf16>
    %c0_6 = arith.constant 0 : index
    %c0_7 = arith.constant 0 : index
    %9 = vector.load %arg4[%c0_6, %c0_7] : memref<64x32xbf16, #tpu.memory_space<vmem>>, vector<64x32xbf16>
    tpu.vector_store %arg4[%c0_6, %c0_7], %8 {strides = array<i32>} : memref<64x32xbf16, #tpu.memory_space<vmem>>, vector<64x32xbf16>,
    return
  }
  func.func @transform_0(%arg0: i32) -> (i32, i32) {
    %c0_i32 = arith.constant 0 : i32
    %c0_i32_0 = arith.constant 0 : i32
    return %arg0, %c0_i32 : i32, i32
  }
  func.func @transform_1(%arg0: i32) -> (i32, i32) {
    %c0_i32 = arith.constant 0 : i32
    %c0_i32_0 = arith.constant 0 : i32
    %c0_i32_1 = arith.constant 0 : i32
    return %c0_i32, %c0_i32_0 : i32, i32
  }
  func.func @transform_2(%arg0: i32) -> (i32, i32) {
    %c0_i32 = arith.constant 0 : i32
    %c0_i32_0 = arith.constant 0 : i32
    %c0_i32_1 = arith.constant 0 : i32
    return %c0_i32, %c0_i32_0 : i32, i32
  }
  func.func @transform_3(%arg0: i32) -> (i32, i32) {
    %c0_i32 = arith.constant 0 : i32
    %c0_i32_0 = arith.constant 0 : i32
    return %arg0, %c0_i32 : i32, i32
  }
}

module attributes {stable_mosaic.version = 11 : i64} {
  func.func @_matmul_bias_act_kernel(%arg0: i32, %arg1: memref<64x32xbf16, #tpu.memory_space<vmem>>, %arg2: memref<32x64xbf16, #tpu.memory_space<vmem>>, %arg3: memref<1x64xf32, #tpu.memory_space<vmem>>, %arg4: memref<64x64xf32, #tpu.memory_space<vmem>>) attributes {dimension_semantics = [#tpu.dimension_semantics<parallel>], iteration_bounds = array<i64: 2>, scalar_prefetch = 0 : i64, scratch_operands = 0 : i64, tpu.core_type = #tpu.core_type<tc>, window_params = [{transform_indices = @transform_0, window_bounds = array<i64: 64, 32>}, {pipeline_mode = #tpu.pipeline_mode<synchronous>, transform_indices = @transform_1, window_bounds = array<i64: 32, 64>}, {pipeline_mode = #tpu.pipeline_mode<synchronous>, transform_indices = @transform_2, window_bounds = array<i64: 1, 64>}, {transform_indices = @transform_3, window_bounds = array<i64: 64, 64>}]} {
    %c0 = arith.constant 0 : index
    %c0_0 = arith.constant 0 : index
    %0 = vector.load %arg1[%c0, %c0_0] : memref<64x32xbf16, #tpu.memory_space<vmem>>, vector<64x32xbf16>
    %c0_1 = arith.constant 0 : index
    %c0_2 = arith.constant 0 : index
    %1 = vector.load %arg2[%c0_1, %c0_2] : memref<32x64xbf16, #tpu.memory_space<vmem>>, vector<32x64xbf16>
    %cst = arith.constant dense<0.000000e+00> : vector<64x64xf32>
    %2 = tpu.matmul %0, %1, %cst {dimension_numbers = #tpu.dot_dimension_numbers<[1], [0], [0], [1], [0, 0, 1, 1], [], []>} : vector<64x32xbf16>, vector<32x64xbf16>, vector<64x64xf32> -> vector<64x64xf32>
    %c0_3 = arith.constant 0 : index
    %c0_4 = arith.constant 0 : index
    %3 = vector.load %arg3[%c0_3, %c0_4] : memref<1x64xf32, #tpu.memory_space<vmem>>, vector<1x64xf32>
    %4 = vector.broadcast %3 : vector<1x64xf32> to vector<64x64xf32>
    %5 = arith.addf %2, %4 : vector<64x64xf32>
    %c0_5 = arith.constant 0 : index
    %c0_6 = arith.constant 0 : index
    %6 = vector.load %arg4[%c0_5, %c0_6] : memref<64x64xf32, #tpu.memory_space<vmem>>, vector<64x64xf32>
    tpu.vector_store %arg4[%c0_5, %c0_6], %5 {strides = array<i32>} : memref<64x64xf32, #tpu.memory_space<vmem>>, vector<64x64xf32>,
    return
  }
  func.func @transform_0(%arg0: i32) -> (i32, i32) {
    %c0_i32 = arith.constant 0 : i32
    %c0_i32_0 = arith.constant 0 : i32
    return %arg0, %c0_i32 : i32, i32
  }
  func.func @transform_1(%arg0: i32) -> (i32, i32) {
    %c0_i32 = arith.constant 0 : i32
    %c0_i32_0 = arith.constant 0 : i32
    %c0_i32_1 = arith.constant 0 : i32
    return %c0_i32, %c0_i32_0 : i32, i32
  }
  func.func @transform_2(%arg0: i32) -> (i32, i32) {
    %c0_i32 = arith.constant 0 : i32
    %c0_i32_0 = arith.constant 0 : i32
    %c0_i32_1 = arith.constant 0 : i32
    return %c0_i32, %c0_i32_0 : i32, i32
  }
  func.func @transform_3(%arg0: i32) -> (i32, i32) {
    %c0_i32 = arith.constant 0 : i32
    %c0_i32_0 = arith.constant 0 : i32
    return %arg0, %c0_i32 : i32, i32
  }
}

module attributes {stable_mosaic.version = 11 : i64} {
  func.func @_matmul_bias_act_kernel(%arg0: i32, %arg1: memref<16x48xbf16, #tpu.memory_space<vmem>>, %arg2: memref<48x64xbf16, #tpu.memory_space<vmem>>, %arg3: memref<1x64xf32, #tpu.memory_space<vmem>>, %arg4: memref<16x64xf32, #tpu.memory_space<vmem>>) attributes {dimension_semantics = [#tpu.dimension_semantics<parallel>], iteration_bounds = array<i64: 2>, scalar_prefetch = 0 : i64, scratch_operands = 0 : i64, tpu.core_type = #tpu.core_type<tc>, window_params = [{transform_indices = @transform_0, window_bounds = array<i64: 16, 48>}, {pipeline_mode = #tpu.pipeline_mode<synchronous>, transform_indices = @transform_1, window_bounds = array<i64: 48, 64>}, {pipeline_mode = #tpu.pipeline_mode<synchronous>, transform_indices = @transform_2, window_bounds = array<i64: 1, 64>}, {transform_indices = @transform_3, window_bounds = array<i64: 16, 64>}]} {
    %c0 = arith.constant 0 : index
    %c0_0 = arith.constant 0 : index
    %0 = vector.load %arg1[%c0, %c0_0] : memref<16x48xbf16, #tpu.memory_space<vmem>>, vector<16x48xbf16>
    %c0_1 = arith.constant 0 : index
    %c0_2 = arith.constant 0 : index
    %1 = vector.load %arg2[%c0_1, %c0_2] : memref<48x64xbf16, #tpu.memory_space<vmem>>, vector<48x64xbf16>
    %cst = arith.constant dense<0.000000e+00> : vector<16x64xf32>
    %2 = tpu.matmul %0, %1, %cst {dimension_numbers = #tpu.dot_dimension_numbers<[1], [0], [0], [1], [0, 0, 1, 1], [], []>} : vector<16x48xbf16>, vector<48x64xbf16>, vector<16x64xf32> -> vector<16x64xf32>
    %c0_3 = arith.constant 0 : index
    %c0_4 = arith.constant 0 : index
    %3 = vector.load %arg3[%c0_3, %c0_4] : memref<1x64xf32, #tpu.memory_space<vmem>>, vector<1x64xf32>
    %4 = vector.broadcast %3 : vector<1x64xf32> to vector<16x64xf32>
    %5 = arith.addf %2, %4 : vector<16x64xf32>
    %c0_5 = arith.constant 0 : index
    %c0_6 = arith.constant 0 : index
    %6 = vector.load %arg4[%c0_5, %c0_6] : memref<16x64xf32, #tpu.memory_space<vmem>>, vector<16x64xf32>
    tpu.vector_store %arg4[%c0_5, %c0_6], %5 {strides = array<i32>} : memref<16x64xf32, #tpu.memory_space<vmem>>, vector<16x64xf32>,
    return
  }
  func.func @transform_0(%arg0: i32) -> (i32, i32) {
    %c0_i32 = arith.constant 0 : i32
    %c0_i32_0 = arith.constant 0 : i32
    return %arg0, %c0_i32 : i32, i32
  }
  func.func @transform_1(%arg0: i32) -> (i32, i32) {
    %c0_i32 = arith.constant 0 : i32
    %c0_i32_0 = arith.constant 0 : i32
    %c0_i32_1 = arith.constant 0 : i32
    return %c0_i32, %c0_i32_0 : i32, i32
  }
  func.func @transform_2(%arg0: i32) -> (i32, i32) {
    %c0_i32 = arith.constant 0 : i32
    %c0_i32_0 = arith.constant 0 : i32
    %c0_i32_1 = arith.constant 0 : i32
    return %c0_i32, %c0_i32_0 : i32, i32
  }
  func.func @transform_3(%arg0: i32) -> (i32, i32) {
    %c0_i32 = arith.constant 0 : i32
    %c0_i32_0 = arith.constant 0 : i32
    return %arg0, %c0_i32 : i32, i32
  }
}

module attributes {stable_mosaic.version = 11 : i64} {
  func.func @_matmul_bias_act_kernel(%arg0: i32, %arg1: memref<16x288xbf16, #tpu.memory_space<vmem>>, %arg2: memref<288x48xbf16, #tpu.memory_space<vmem>>, %arg3: memref<1x48xf32, #tpu.memory_space<vmem>>, %arg4: memref<16x48xbf16, #tpu.memory_space<vmem>>) attributes {dimension_semantics = [#tpu.dimension_semantics<parallel>], iteration_bounds = array<i64: 2>, scalar_prefetch = 0 : i64, scratch_operands = 0 : i64, tpu.core_type = #tpu.core_type<tc>, window_params = [{transform_indices = @transform_0, window_bounds = array<i64: 16, 288>}, {pipeline_mode = #tpu.pipeline_mode<synchronous>, transform_indices = @transform_1, window_bounds = array<i64: 288, 48>}, {pipeline_mode = #tpu.pipeline_mode<synchronous>, transform_indices = @transform_2, window_bounds = array<i64: 1, 48>}, {transform_indices = @transform_3, window_bounds = array<i64: 16, 48>}]} {
    %c0 = arith.constant 0 : index
    %c0_0 = arith.constant 0 : index
    %0 = vector.load %arg1[%c0, %c0_0] : memref<16x288xbf16, #tpu.memory_space<vmem>>, vector<16x288xbf16>
    %c0_1 = arith.constant 0 : index
    %c0_2 = arith.constant 0 : index
    %1 = vector.load %arg2[%c0_1, %c0_2] : memref<288x48xbf16, #tpu.memory_space<vmem>>, vector<288x48xbf16>
    %cst = arith.constant dense<0.000000e+00> : vector<16x48xf32>
    %2 = tpu.matmul %0, %1, %cst {dimension_numbers = #tpu.dot_dimension_numbers<[1], [0], [0], [1], [0, 0, 1, 1], [], []>} : vector<16x288xbf16>, vector<288x48xbf16>, vector<16x48xf32> -> vector<16x48xf32>
    %c0_3 = arith.constant 0 : index
    %c0_4 = arith.constant 0 : index
    %3 = vector.load %arg3[%c0_3, %c0_4] : memref<1x48xf32, #tpu.memory_space<vmem>>, vector<1x48xf32>
    %4 = vector.broadcast %3 : vector<1x48xf32> to vector<16x48xf32>
    %5 = arith.addf %2, %4 : vector<16x48xf32>
    %cst_5 = arith.constant 0.000000e+00 : f32
    %6 = vector.broadcast %cst_5 : f32 to vector<16x48xf32>
    %7 = arith.maximumf %5, %6 : vector<16x48xf32>
    %8 = arith.truncf %7 : vector<16x48xf32> to vector<16x48xbf16>
    %c0_6 = arith.constant 0 : index
    %c0_7 = arith.constant 0 : index
    %9 = vector.load %arg4[%c0_6, %c0_7] : memref<16x48xbf16, #tpu.memory_space<vmem>>, vector<16x48xbf16>
    tpu.vector_store %arg4[%c0_6, %c0_7], %8 {strides = array<i32>} : memref<16x48xbf16, #tpu.memory_space<vmem>>, vector<16x48xbf16>,
    return
  }
  func.func @transform_0(%arg0: i32) -> (i32, i32) {
    %c0_i32 = arith.constant 0 : i32
    %c0_i32_0 = arith.constant 0 : i32
    return %arg0, %c0_i32 : i32, i32
  }
  func.func @transform_1(%arg0: i32) -> (i32, i32) {
    %c0_i32 = arith.constant 0 : i32
    %c0_i32_0 = arith.constant 0 : i32
    %c0_i32_1 = arith.constant 0 : i32
    return %c0_i32, %c0_i32_0 : i32, i32
  }
  func.func @transform_2(%arg0: i32) -> (i32, i32) {
    %c0_i32 = arith.constant 0 : i32
    %c0_i32_0 = arith.constant 0 : i32
    %c0_i32_1 = arith.constant 0 : i32
    return %c0_i32, %c0_i32_0 : i32, i32
  }
  func.func @transform_3(%arg0: i32) -> (i32, i32) {
    %c0_i32 = arith.constant 0 : i32
    %c0_i32_0 = arith.constant 0 : i32
    return %arg0, %c0_i32 : i32, i32
  }
}

module attributes {stable_mosaic.version = 11 : i64} {
  func.func @_matmul_bias_act_kernel(%arg0: i32, %arg1: memref<8x432xbf16, #tpu.memory_space<vmem>>, %arg2: memref<432x64xbf16, #tpu.memory_space<vmem>>, %arg3: memref<1x64xf32, #tpu.memory_space<vmem>>, %arg4: memref<8x64xbf16, #tpu.memory_space<vmem>>) attributes {dimension_semantics = [#tpu.dimension_semantics<parallel>], iteration_bounds = array<i64: 1>, scalar_prefetch = 0 : i64, scratch_operands = 0 : i64, tpu.core_type = #tpu.core_type<tc>, window_params = [{transform_indices = @transform_0, window_bounds = array<i64: 8, 432>}, {pipeline_mode = #tpu.pipeline_mode<synchronous>, transform_indices = @transform_1, window_bounds = array<i64: 432, 64>}, {pipeline_mode = #tpu.pipeline_mode<synchronous>, transform_indices = @transform_2, window_bounds = array<i64: 1, 64>}, {transform_indices = @transform_3, window_bounds = array<i64: 8, 64>}]} {
    %c0 = arith.constant 0 : index
    %c0_0 = arith.constant 0 : index
    %0 = vector.load %arg1[%c0, %c0_0] : memref<8x432xbf16, #tpu.memory_space<vmem>>, vector<8x432xbf16>
    %c0_1 = arith.constant 0 : index
    %c0_2 = arith.constant 0 : index
    %1 = vector.load %arg2[%c0_1, %c0_2] : memref<432x64xbf16, #tpu.memory_space<vmem>>, vector<432x64xbf16>
    %cst = arith.constant dense<0.000000e+00> : vector<8x64xf32>
    %2 = tpu.matmul %0, %1, %cst {dimension_numbers = #tpu.dot_dimension_numbers<[1], [0], [0], [1], [0, 0, 1, 1], [], []>} : vector<8x432xbf16>, vector<432x64xbf16>, vector<8x64xf32> -> vector<8x64xf32>
    %c0_3 = arith.constant 0 : index
    %c0_4 = arith.constant 0 : index
    %3 = vector.load %arg3[%c0_3, %c0_4] : memref<1x64xf32, #tpu.memory_space<vmem>>, vector<1x64xf32>
    %4 = vector.broadcast %3 : vector<1x64xf32> to vector<8x64xf32>
    %5 = arith.addf %2, %4 : vector<8x64xf32>
    %cst_5 = arith.constant 0.000000e+00 : f32
    %6 = vector.broadcast %cst_5 : f32 to vector<8x64xf32>
    %7 = arith.maximumf %5, %6 : vector<8x64xf32>
    %8 = arith.truncf %7 : vector<8x64xf32> to vector<8x64xbf16>
    %c0_6 = arith.constant 0 : index
    %c0_7 = arith.constant 0 : index
    %9 = vector.load %arg4[%c0_6, %c0_7] : memref<8x64xbf16, #tpu.memory_space<vmem>>, vector<8x64xbf16>
    tpu.vector_store %arg4[%c0_6, %c0_7], %8 {strides = array<i32>} : memref<8x64xbf16, #tpu.memory_space<vmem>>, vector<8x64xbf16>,
    return
  }
  func.func @transform_0(%arg0: i32) -> (i32, i32) {
    %c0_i32 = arith.constant 0 : i32
    %c0_i32_0 = arith.constant 0 : i32
    return %arg0, %c0_i32 : i32, i32
  }
  func.func @transform_1(%arg0: i32) -> (i32, i32) {
    %c0_i32 = arith.constant 0 : i32
    %c0_i32_0 = arith.constant 0 : i32
    %c0_i32_1 = arith.constant 0 : i32
    return %c0_i32, %c0_i32_0 : i32, i32
  }
  func.func @transform_2(%arg0: i32) -> (i32, i32) {
    %c0_i32 = arith.constant 0 : i32
    %c0_i32_0 = arith.constant 0 : i32
    %c0_i32_1 = arith.constant 0 : i32
    return %c0_i32, %c0_i32_0 : i32, i32
  }
  func.func @transform_3(%arg0: i32) -> (i32, i32) {
    %c0_i32 = arith.constant 0 : i32
    %c0_i32_0 = arith.constant 0 : i32
    return %arg0, %c0_i32 : i32, i32
  }
}

module attributes {stable_mosaic.version = 11 : i64} {
  func.func @_matmul_bias_act_kernel(%arg0: i32, %arg1: memref<8x64xbf16, #tpu.memory_space<vmem>>, %arg2: memref<64x64xbf16, #tpu.memory_space<vmem>>, %arg3: memref<1x64xf32, #tpu.memory_space<vmem>>, %arg4: memref<8x64xf32, #tpu.memory_space<vmem>>) attributes {dimension_semantics = [#tpu.dimension_semantics<parallel>], iteration_bounds = array<i64: 1>, scalar_prefetch = 0 : i64, scratch_operands = 0 : i64, tpu.core_type = #tpu.core_type<tc>, window_params = [{transform_indices = @transform_0, window_bounds = array<i64: 8, 64>}, {pipeline_mode = #tpu.pipeline_mode<synchronous>, transform_indices = @transform_1, window_bounds = array<i64: 64, 64>}, {pipeline_mode = #tpu.pipeline_mode<synchronous>, transform_indices = @transform_2, window_bounds = array<i64: 1, 64>}, {transform_indices = @transform_3, window_bounds = array<i64: 8, 64>}]} {
    %c0 = arith.constant 0 : index
    %c0_0 = arith.constant 0 : index
    %0 = vector.load %arg1[%c0, %c0_0] : memref<8x64xbf16, #tpu.memory_space<vmem>>, vector<8x64xbf16>
    %c0_1 = arith.constant 0 : index
    %c0_2 = arith.constant 0 : index
    %1 = vector.load %arg2[%c0_1, %c0_2] : memref<64x64xbf16, #tpu.memory_space<vmem>>, vector<64x64xbf16>
    %cst = arith.constant dense<0.000000e+00> : vector<8x64xf32>
    %2 = tpu.matmul %0, %1, %cst {dimension_numbers = #tpu.dot_dimension_numbers<[1], [0], [0], [1], [0, 0, 1, 1], [], []>} : vector<8x64xbf16>, vector<64x64xbf16>, vector<8x64xf32> -> vector<8x64xf32>
    %c0_3 = arith.constant 0 : index
    %c0_4 = arith.constant 0 : index
    %3 = vector.load %arg3[%c0_3, %c0_4] : memref<1x64xf32, #tpu.memory_space<vmem>>, vector<1x64xf32>
    %4 = vector.broadcast %3 : vector<1x64xf32> to vector<8x64xf32>
    %5 = arith.addf %2, %4 : vector<8x64xf32>
    %c0_5 = arith.constant 0 : index
    %c0_6 = arith.constant 0 : index
    %6 = vector.load %arg4[%c0_5, %c0_6] : memref<8x64xf32, #tpu.memory_space<vmem>>, vector<8x64xf32>
    tpu.vector_store %arg4[%c0_5, %c0_6], %5 {strides = array<i32>} : memref<8x64xf32, #tpu.memory_space<vmem>>, vector<8x64xf32>,
    return
  }
  func.func @transform_0(%arg0: i32) -> (i32, i32) {
    %c0_i32 = arith.constant 0 : i32
    %c0_i32_0 = arith.constant 0 : i32
    return %arg0, %c0_i32 : i32, i32
  }
  func.func @transform_1(%arg0: i32) -> (i32, i32) {
    %c0_i32 = arith.constant 0 : i32
    %c0_i32_0 = arith.constant 0 : i32
    %c0_i32_1 = arith.constant 0 : i32
    return %c0_i32, %c0_i32_0 : i32, i32
  }
  func.func @transform_2(%arg0: i32) -> (i32, i32) {
    %c0_i32 = arith.constant 0 : i32
    %c0_i32_0 = arith.constant 0 : i32
    %c0_i32_1 = arith.constant 0 : i32
    return %c0_i32, %c0_i32_0 : i32, i32
  }
  func.func @transform_3(%arg0: i32) -> (i32, i32) {
    %c0_i32 = arith.constant 0 : i32
    %c0_i32_0 = arith.constant 0 : i32
    return %arg0, %c0_i32 : i32, i32
  }
}

</mosaic_0001>

<bundles_post_ra>
// kernel: two_heads_cityscapes_forward.8
= control target key start
LH: loop header
LB: loop body
LE: loop exit
PB: predicated region body
PF: predicated region fallthrough
CT: control target
= control target key end

     0   :  { %s2055_s12 = smov 0   ;;  %s2611_s0 = inlined_call_operand.vmem [shape: bf16[2048,32], index: 0, kind: input, shape index: {}]   ;;  %s2612_s1 = inlined_call_operand.vmem [shape: bf16[32,16], index: 1, kind: input, shape index: {}]   ;;  %s2613_s2 = inlined_call_operand.vmem [shape: f32[1,16], index: 2, kind: input, shape index: {}]   ;;  %s2614_s3 = inlined_call_operand.vmem [shape: bf16[2048,16], index: 3, kind: output, shape index: {}]  }
   0x1 LB: > { %s1606_s13 = sadd.s32 4294967295, %s2033_s12   ;;  %p1610_p0 = scmp.ge.s32.totalorder %s2033_s12, 1  ;;  %s2033_s12 = sphi %s2055_s12, %s13_s12  }
   0x2   : > { %p138_p1 = scmp.lt.s32.totalorder %s2033_s12, 3 }
   0x4   : > { %p139_p2 = pnand %p1610_p0, %p138_p1 }
   0x5   : > { %s1611_s16 = sshll.u32 (!%p139_p2), %s1606_s13, 7 }
   0x6   : > { %142 = sbr.rel (%p139_p2) target bundleno = 408 (0x198), region = 32  ;;  %p163_p3 = scmp.lt.s32.totalorder (!%p139_p2), %s1611_s16, 255 }
   0xb   : > { %v2010_v0 = vld [vmem:[%s2612_s1 + $0x8] sm:$0xff]  ;;  %v2009_v1 = vld [vmem:[%s2612_s1] sm:$0xff]  ;;  %s2616_s16 = smov (!%p163_p3, %s1611_s16), 255  ;;  %vm643_vm0 = vcmask 261120   ;;  %vm1421_vm1 = vcmask 125952  }
   0xc   : > { %842 = vmatpush.bf16.msra.mxu0 %v2010_v0  ;;  %2011 = vmatpush.bf16.msra.mxu1 %v2010_v0  ;;  %s1612_s19 = sshll.u32 %s2616_s16, 2  ;;  %v2146_v34 = vld [vmem:[%s2613_s2] ss:$0 sm:$0xff] }
   0xd   : > { %2012 = vmatpush.bf16.msra.mxu2 %v2010_v0  ;;  %2013 = vmatpush.bf16.msra.mxu3 %v2010_v0  ;;  %s2077_s22 = scalar_lea.vmem %s2611_s0, %s1612_s19  ;;  %s2161_s27 = scalar_lea.vmem %s2614_s3, %s1612_s19 }
   0xe   : > { %v1945_v2 = vld [vmem:[%s2077_s22] sm:$0xff]  ;;  %v1946_v6 = vld [vmem:[%s2077_s22 + $0x8] sm:$0xff]  ;;  %v1947_v10 = vld [vmem:[%s2077_s22 + $0x10] sm:$0xff] }
   0xf   : > { %v1961_v3 = vld [vmem:[%s2077_s22 + $0x80] sm:$0xff]  ;;  %v1962_v7 = vld [vmem:[%s2077_s22 + $0x88] sm:$0xff]  ;;  %v1963_v11 = vld [vmem:[%s2077_s22 + $0x90] sm:$0xff] }
  0x10   : > { %843 = vmatpush.bf16.msra.mxu0 %v2009_v1  ;;  %2014 = vmatpush.bf16.msra.mxu1 %v2009_v1  ;;  %v1977_v4 = vld [vmem:[%s2077_s22 + $0x100] sm:$0xff]  ;;  %v1978_v8 = vld [vmem:[%s2077_s22 + $0x108] sm:$0xff]  ;;  %v1979_v12 = vld [vmem:[%s2077_s22 + $0x110] sm:$0xff] }
  0x11   : > { %2015 = vmatpush.bf16.msra.mxu2 %v2009_v1  ;;  %2016 = vmatpush.bf16.msra.mxu3 %v2009_v1  ;;  %v1993_v5 = vld [vmem:[%s2077_s22 + $0x180] sm:$0xff]  ;;  %v1994_v9 = vld [vmem:[%s2077_s22 + $0x188] sm:$0xff]  ;;  %v1995_v13 = vld [vmem:[%s2077_s22 + $0x190] sm:$0xff] }
  0x12   : > { %v1948_v14 = vld [vmem:[%s2077_s22 + $0x18] sm:$0xff]  ;;  %v1949_v18 = vld [vmem:[%s2077_s22 + $0x20] sm:$0xff]  ;;  %v1950_v22 = vld [vmem:[%s2077_s22 + $0x28] sm:$0xff] }
  0x13   : > { %1879 = vmatmul.msk.bf16.vlgmr.msra.gmra.mxu0 %vm643_vm0, %v1945_v2  ;;  %1895 = vmatmul.msk.bf16.vlgmr.msra.gmra.mxu1 %vm643_vm0, %v1961_v3  ;;  %v1964_v15 = vld [vmem:[%s2077_s22 + $0x98] sm:$0xff]  ;;  %v1965_v19 = vld [vmem:[%s2077_s22 + $0xa0] sm:$0xff]  ;;  %v1966_v23 = vld [vmem:[%s2077_s22 + $0xa8] sm:$0xff] }
  0x14   : > { %1911 = vmatmul.msk.bf16.vlgmr.msra.gmra.mxu2 %vm643_vm0, %v1977_v4  ;;  %1927 = vmatmul.msk.bf16.vlgmr.msra.gmra.mxu3 %vm643_vm0, %v1993_v5  ;;  %v1980_v16 = vld [vmem:[%s2077_s22 + $0x118] sm:$0xff]  ;;  %v1981_v20 = vld [vmem:[%s2077_s22 + $0x120] sm:$0xff]  ;;  %v1982_v24 = vld [vmem:[%s2077_s22 + $0x128] sm:$0xff] }
  0x15   : > { %v1996_v17 = vld [vmem:[%s2077_s22 + $0x198] sm:$0xff]  ;;  %v1997_v21 = vld [vmem:[%s2077_s22 + $0x1a0] sm:$0xff]  ;;  %v1998_v25 = vld [vmem:[%s2077_s22 + $0x1a8] sm:$0xff] }
  0x16   : > { %v1951_v26 = vld [vmem:[%s2077_s22 + $0x30] sm:$0xff]  ;;  %v1952_v30 = vld [vmem:[%s2077_s22 + $0x38] sm:$0xff]  ;;  %v1953_v35 = vld [vmem:[%s2077_s22 + $0x40] sm:$0xff] }
  0x17   : > { %v1967_v27 = vld [vmem:[%s2077_s22 + $0xb0] sm:$0xff]  ;;  %v1968_v31 = vld [vmem:[%s2077_s22 + $0xb8] sm:$0xff]  ;;  %v1969_v36 = vld [vmem:[%s2077_s22 + $0xc0] sm:$0xff] }
  0x18   : > { %v1983_v28 = vld [vmem:[%s2077_s22 + $0x130] sm:$0xff]  ;;  %v1984_v32 = vld [vmem:[%s2077_s22 + $0x138] sm:$0xff]  ;;  %v1985_v39 = vld [vmem:[%s2077_s22 + $0x140] sm:$0xff] }
  0x19   : > { %v1999_v29 = vld [vmem:[%s2077_s22 + $0x1b0] sm:$0xff]  ;;  %v2000_v33 = vld [vmem:[%s2077_s22 + $0x1b8] sm:$0xff]  ;;  %v2001_v40 = vld [vmem:[%s2077_s22 + $0x1c0] sm:$0xff] }
  0x1a   : > { %v1954_v1 = vld [vmem:[%s2077_s22 + $0x48] sm:$0xff] }
  0x1b   : > { %v1970_v2 = vld [vmem:[%s2077_s22 + $0xc8] sm:$0xff] }
  0x23   : > { %1880 = vmatmul.msk.bf16.gmra.mxu0 %vm643_vm0, %v1946_v6  ;;  %1896 = vmatmul.msk.bf16.gmra.mxu1 %vm643_vm0, %v1962_v7  ;;  %v1986_v7 = vld [vmem:[%s2077_s22 + $0x148] sm:$0xff] }
  0x24   : > { %1912 = vmatmul.msk.bf16.gmra.mxu2 %vm643_vm0, %v1978_v8  ;;  %1928 = vmatmul.msk.bf16.gmra.mxu3 %vm643_vm0, %v1994_v9  ;;  %v2002_v8 = vld [vmem:[%s2077_s22 + $0x1c8] sm:$0xff] }
  0x33   : > { %1881 = vmatmul.msk.bf16.gmra.mxu0 %vm643_vm0, %v1947_v10  ;;  %1897 = vmatmul.msk.bf16.gmra.mxu1 %vm643_vm0, %v1963_v11 }
  0x34   : > { %1913 = vmatmul.msk.bf16.gmra.mxu2 %vm643_vm0, %v1979_v12  ;;  %1929 = vmatmul.msk.bf16.gmra.mxu3 %vm643_vm0, %v1995_v13 }
  0x43   : > { %1882 = vmatmul.msk.bf16.gmra.mxu0 %vm643_vm0, %v1948_v14  ;;  %1898 = vmatmul.msk.bf16.gmra.mxu1 %vm643_vm0, %v1964_v15 }
  0x44   : > { %1914 = vmatmul.msk.bf16.gmra.mxu2 %vm643_vm0, %v1980_v16  ;;  %1930 = vmatmul.msk.bf16.gmra.mxu3 %vm643_vm0, %v1996_v17 }
  0x53   : > { %1883 = vmatmul.msk.bf16.gmra.mxu0 %vm643_vm0, %v1949_v18  ;;  %1899 = vmatmul.msk.bf16.gmra.mxu1 %vm643_vm0, %v1965_v19 }
  0x54   : > { %1915 = vmatmul.msk.bf16.gmra.mxu2 %vm643_vm0, %v1981_v20  ;;  %1931 = vmatmul.msk.bf16.gmra.mxu3 %vm643_vm0, %v1997_v21 }
  0x63   : > { %1884 = vmatmul.msk.bf16.gmra.mxu0 %vm643_vm0, %v1950_v22  ;;  %1900 = vmatmul.msk.bf16.gmra.mxu1 %vm643_vm0, %v1966_v23 }
  0x64   : > { %1916 = vmatmul.msk.bf16.gmra.mxu2 %vm643_vm0, %v1982_v24  ;;  %1932 = vmatmul.msk.bf16.gmra.mxu3 %vm643_vm0, %v1998_v25 }
  0x73   : > { %1885 = vmatmul.msk.bf16.gmra.mxu0 %vm643_vm0, %v1951_v26  ;;  %1901 = vmatmul.msk.bf16.gmra.mxu1 %vm643_vm0, %v1967_v27 }
  0x74   : > { %1917 = vmatmul.msk.bf16.gmra.mxu2 %vm643_vm0, %v1983_v28  ;;  %1933 = vmatmul.msk.bf16.gmra.mxu3 %vm643_vm0, %v1999_v29 }
  0x83   : > { %1886 = vmatmul.msk.bf16.gmra.mxu0 %vm643_vm0, %v1952_v30  ;;  %1902 = vmatmul.msk.bf16.gmra.mxu1 %vm643_vm0, %v1968_v31 }
  0x84   : > { %1918 = vmatmul.msk.bf16.gmra.mxu2 %vm643_vm0, %v1984_v32  ;;  %1934 = vmatmul.msk.bf16.gmra.mxu3 %vm643_vm0, %v2000_v33 }
  0x90   : > { %v845_v37 = vpop.f32.mrf.mxu0  ;;  %v925_v38 = vpop.f32.mrf.mxu1 }
  0x91   : > { %v846_v41 = vadd.f32 %v2146_v34, %v845_v37  ;;  %v926_v42 = vadd.f32 %v2146_v34, %v925_v38  ;;  %v1955_v38 = vld [vmem:[%s2077_s22 + $0x50] sm:$0xff] }
  0x93   : > { %v1165_v43 = vmax.f32 %v846_v41, 0.0  ;;  %v1197_v44 = vmax.f32 %v926_v42, 0.0  ;;  %1887 = vmatmul.msk.bf16.gmra.mxu0 %vm643_vm0, %v1953_v35  ;;  %1903 = vmatmul.msk.bf16.gmra.mxu1 %vm643_vm0, %v1969_v36 }
  0x94   : > { %1919 = vmatmul.msk.bf16.gmra.mxu2 %vm643_vm0, %v1985_v39  ;;  %1935 = vmatmul.msk.bf16.gmra.mxu3 %vm643_vm0, %v2001_v40  ;;  %v1971_v39 = vld [vmem:[%s2077_s22 + $0xd0] sm:$0xff] }
  0x95   : > { %v1293_v45 = vpack.c.bf16 %v1165_v43, %v1165_v43  ;;  %v1325_v46 = vpack.c.bf16 %v1197_v44, %v1197_v44  ;;  %v1987_v44 = vld [vmem:[%s2077_s22 + $0x150] sm:$0xff] }
  0x97   : > { %1422 = vst.msk [vmem:[%s2161_s27] sm:$0xf] %vm1421_vm1, %v1293_v45  ;;  %v1005_v47 = vpop.f32.mrf.mxu2  ;;  %v1085_v48 = vpop.f32.mrf.mxu3  ;;  %v2003_v45 = vld [vmem:[%s2077_s22 + $0x1d0] sm:$0xff] }
  0x98   : > { %1454 = vst.msk [vmem:[%s2161_s27 + $0x80] sm:$0xf] %vm1421_vm1, %v1325_v46  ;;  %v1006_v49 = vadd.f32 %v2146_v34, %v1005_v47  ;;  %v1086_v50 = vadd.f32 %v2146_v34, %v1085_v48  ;;  %v847_v51 = vpop.f32.mrf.mxu0  ;;  %v927_v52 = vpop.f32.mrf.mxu1 }
  0x99   : > { %v848_v53 = vadd.f32 %v2146_v34, %v847_v51  ;;  %v928_v54 = vadd.f32 %v2146_v34, %v927_v52 }
  0x9a   : > { %v1229_v55 = vmax.f32 %v1006_v49, 0.0  ;;  %v1261_v56 = vmax.f32 %v1086_v50, 0.0 }
  0x9b   : > { %v1166_v57 = vmax.f32 %v848_v53, 0.0  ;;  %v1198_v58 = vmax.f32 %v928_v54, 0.0 }
  0x9c   : > { %v1357_v59 = vpack.c.bf16 %v1229_v55, %v1229_v55  ;;  %v1389_v60 = vpack.c.bf16 %v1261_v56, %v1261_v56 }
  0x9d   : > { %v1294_v61 = vpack.c.bf16 %v1166_v57, %v1166_v57  ;;  %v1326_v62 = vpack.c.bf16 %v1198_v58, %v1198_v58 }
  0x9e   : > { %1486 = vst.msk [vmem:[%s2161_s27 + $0x100] sm:$0xf] %vm1421_vm1, %v1357_v59 }
  0x9f   : > { %1518 = vst.msk [vmem:[%s2161_s27 + $0x180] sm:$0xf] %vm1421_vm1, %v1389_v60  ;;  %v1007_v63 = vpop.f32.mrf.mxu2  ;;  %v1087_v0 = vpop.f32.mrf.mxu3 }
  0xa0   : > { %1423 = vst.msk [vmem:[%s2161_s27 + $0x4] sm:$0xf] %vm1421_vm1, %v1294_v61  ;;  %v1008_v3 = vadd.f32 %v2146_v34, %v1007_v63  ;;  %v1088_v4 = vadd.f32 %v2146_v34, %v1087_v0  ;;  %v850_v5 = vpop.f32.mrf.mxu0  ;;  %v930_v6 = vpop.f32.mrf.mxu1 }
  0xa1   : > { %1455 = vst.msk [vmem:[%s2161_s27 + $0x84] sm:$0xf] %vm1421_vm1, %v1326_v62  ;;  %v851_v9 = vadd.f32 %v2146_v34, %v850_v5  ;;  %v931_v10 = vadd.f32 %v2146_v34, %v930_v6 }
  0xa2   : > { %v1230_v11 = vmax.f32 %v1008_v3, 0.0  ;;  %v1262_v12 = vmax.f32 %v1088_v4, 0.0 }
  0xa3   : > { %v1167_v13 = vmax.f32 %v851_v9, 0.0  ;;  %v1199_v14 = vmax.f32 %v931_v10, 0.0  ;;  %1888 = vmatmul.msk.bf16.gmra.mxu0 %vm643_vm0, %v1954_v1  ;;  %1904 = vmatmul.msk.bf16.gmra.mxu1 %vm643_vm0, %v1970_v2  ;;  %v1956_v10 = vld [vmem:[%s2077_s22 + $0x58] sm:$0xff] }
  0xa4   : > { %v1358_v15 = vpack.c.bf16 %v1230_v11, %v1230_v11  ;;  %v1390_v16 = vpack.c.bf16 %v1262_v12, %v1262_v12  ;;  %1920 = vmatmul.msk.bf16.gmra.mxu2 %vm643_vm0, %v1986_v7  ;;  %1936 = vmatmul.msk.bf16.gmra.mxu3 %vm643_vm0, %v2002_v8  ;;  %v1972_v11 = vld [vmem:[%s2077_s22 + $0xd8] sm:$0xff] }
  0xa5   : > { %v1295_v17 = vpack.c.bf16 %v1167_v13, %v1167_v13  ;;  %v1327_v18 = vpack.c.bf16 %v1199_v14, %v1199_v14 }
  0xa6   : > { %1487 = vst.msk [vmem:[%s2161_s27 + $0x104] sm:$0xf] %vm1421_vm1, %v1358_v15 }
  0xa7   : > { %1519 = vst.msk [vmem:[%s2161_s27 + $0x184] sm:$0xf] %vm1421_vm1, %v1390_v16  ;;  %v1010_v19 = vpop.f32.mrf.mxu2  ;;  %v1090_v20 = vpop.f32.mrf.mxu3  ;;  %v1988_v16 = vld [vmem:[%s2077_s22 + $0x158] sm:$0xff] }
  0xa8   : > { %1424 = vst.msk [vmem:[%s2161_s27 + $0x8] sm:$0xf] %vm1421_vm1, %v1295_v17  ;;  %v1011_v21 = vadd.f32 %v2146_v34, %v1010_v19  ;;  %v1091_v22 = vadd.f32 %v2146_v34, %v1090_v20  ;;  %v852_v23 = vpop.f32.mrf.mxu0  ;;  %v932_v24 = vpop.f32.mrf.mxu1  ;;  %v2004_v17 = vld [vmem:[%s2077_s22 + $0x1d8] sm:$0xff] }
  0xa9   : > { %1456 = vst.msk [vmem:[%s2161_s27 + $0x88] sm:$0xf] %vm1421_vm1, %v1327_v18  ;;  %v853_v25 = vadd.f32 %v2146_v34, %v852_v23  ;;  %v933_v26 = vadd.f32 %v2146_v34, %v932_v24 }
  0xaa   : > { %v1231_v27 = vmax.f32 %v1011_v21, 0.0  ;;  %v1263_v28 = vmax.f32 %v1091_v22, 0.0 }
  0xab   : > { %v1168_v29 = vmax.f32 %v853_v25, 0.0  ;;  %v1200_v30 = vmax.f32 %v933_v26, 0.0 }
  0xac   : > { %v1359_v31 = vpack.c.bf16 %v1231_v27, %v1231_v27  ;;  %v1391_v32 = vpack.c.bf16 %v1263_v28, %v1263_v28 }
  0xad   : > { %v1296_v33 = vpack.c.bf16 %v1168_v29, %v1168_v29  ;;  %v1328_v35 = vpack.c.bf16 %v1200_v30, %v1200_v30 }
  0xae   : > { %1488 = vst.msk [vmem:[%s2161_s27 + $0x108] sm:$0xf] %vm1421_vm1, %v1359_v31 }
  0xaf   : > { %1520 = vst.msk [vmem:[%s2161_s27 + $0x188] sm:$0xf] %vm1421_vm1, %v1391_v32  ;;  %v1012_v36 = vpop.f32.mrf.mxu2  ;;  %v1092_v37 = vpop.f32.mrf.mxu3 }
  0xb0   : > { %1425 = vst.msk [vmem:[%s2161_s27 + $0xc] sm:$0xf] %vm1421_vm1, %v1296_v33  ;;  %v1013_v40 = vadd.f32 %v2146_v34, %v1012_v36  ;;  %v1093_v41 = vadd.f32 %v2146_v34, %v1092_v37  ;;  %v855_v42 = vpop.f32.mrf.mxu0  ;;  %v935_v43 = vpop.f32.mrf.mxu1 }
  0xb1   : > { %1457 = vst.msk [vmem:[%s2161_s27 + $0x8c] sm:$0xf] %vm1421_vm1, %v1328_v35  ;;  %v856_v46 = vadd.f32 %v2146_v34, %v855_v42  ;;  %v936_v47 = vadd.f32 %v2146_v34, %v935_v43 }
  0xb2   : > { %v1232_v48 = vmax.f32 %v1013_v40, 0.0  ;;  %v1264_v49 = vmax.f32 %v1093_v41, 0.0 }
  0xb3   : > { %v1169_v50 = vmax.f32 %v856_v46, 0.0  ;;  %v1201_v51 = vmax.f32 %v936_v47, 0.0  ;;  %1889 = vmatmul.msk.bf16.gmra.mxu0 %vm643_vm0, %v1955_v38  ;;  %1905 = vmatmul.msk.bf16.gmra.mxu1 %vm643_vm0, %v1971_v39  ;;  %v1957_v47 = vld [vmem:[%s2077_s22 + $0x60] sm:$0xff] }
  0xb4   : > { %v1360_v52 = vpack.c.bf16 %v1232_v48, %v1232_v48  ;;  %v1392_v53 = vpack.c.bf16 %v1264_v49, %v1264_v49  ;;  %1921 = vmatmul.msk.bf16.gmra.mxu2 %vm643_vm0, %v1987_v44  ;;  %1937 = vmatmul.msk.bf16.gmra.mxu3 %vm643_vm0, %v2003_v45  ;;  %v1973_v48 = vld [vmem:[%s2077_s22 + $0xe0] sm:$0xff] }
  0xb5   : > { %v1297_v54 = vpack.c.bf16 %v1169_v50, %v1169_v50  ;;  %v1329_v55 = vpack.c.bf16 %v1201_v51, %v1201_v51 }
  0xb6   : > { %1489 = vst.msk [vmem:[%s2161_s27 + $0x10c] sm:$0xf] %vm1421_vm1, %v1360_v52 }
  0xb7   : > { %1521 = vst.msk [vmem:[%s2161_s27 + $0x18c] sm:$0xf] %vm1421_vm1, %v1392_v53  ;;  %v1015_v56 = vpop.f32.mrf.mxu2  ;;  %v1095_v57 = vpop.f32.mrf.mxu3  ;;  %v1989_v53 = vld [vmem:[%s2077_s22 + $0x160] sm:$0xff] }
  0xb8   : > { %1426 = vst.msk [vmem:[%s2161_s27 + $0x10] sm:$0xf] %vm1421_vm1, %v1297_v54  ;;  %v1016_v58 = vadd.f32 %v2146_v34, %v1015_v56  ;;  %v1096_v59 = vadd.f32 %v2146_v34, %v1095_v57  ;;  %v857_v60 = vpop.f32.mrf.mxu0  ;;  %v937_v61 = vpop.f32.mrf.mxu1  ;;  %v2005_v54 = vld [vmem:[%s2077_s22 + $0x1e0] sm:$0xff] }
  0xb9   : > { %1458 = vst.msk [vmem:[%s2161_s27 + $0x90] sm:$0xf] %vm1421_vm1, %v1329_v55  ;;  %v858_v62 = vadd.f32 %v2146_v34, %v857_v60  ;;  %v938_v63 = vadd.f32 %v2146_v34, %v937_v61 }
  0xba   : > { %v1233_v0 = vmax.f32 %v1016_v58, 0.0  ;;  %v1265_v1 = vmax.f32 %v1096_v59, 0.0 }
  0xbb   : > { %v1170_v2 = vmax.f32 %v858_v62, 0.0  ;;  %v1202_v3 = vmax.f32 %v938_v63, 0.0 }
  0xbc   : > { %v1361_v4 = vpack.c.bf16 %v1233_v0, %v1233_v0  ;;  %v1393_v5 = vpack.c.bf16 %v1265_v1, %v1265_v1 }
  0xbd   : > { %v1298_v6 = vpack.c.bf16 %v1170_v2, %v1170_v2  ;;  %v1330_v7 = vpack.c.bf16 %v1202_v3, %v1202_v3 }
  0xbe   : > { %1490 = vst.msk [vmem:[%s2161_s27 + $0x110] sm:$0xf] %vm1421_vm1, %v1361_v4 }
  0xbf   : > { %1522 = vst.msk [vmem:[%s2161_s27 + $0x190] sm:$0xf] %vm1421_vm1, %v1393_v5  ;;  %v1017_v8 = vpop.f32.mrf.mxu2  ;;  %v1097_v9 = vpop.f32.mrf.mxu3 }
  0xc0   : > { %1427 = vst.msk [vmem:[%s2161_s27 + $0x14] sm:$0xf] %vm1421_vm1, %v1298_v6  ;;  %v1018_v12 = vadd.f32 %v2146_v34, %v1017_v8  ;;  %v1098_v13 = vadd.f32 %v2146_v34, %v1097_v9  ;;  %v860_v14 = vpop.f32.mrf.mxu0  ;;  %v940_v15 = vpop.f32.mrf.mxu1 }
  0xc1   : > { %1459 = vst.msk [vmem:[%s2161_s27 + $0x94] sm:$0xf] %vm1421_vm1, %v1330_v7  ;;  %v861_v18 = vadd.f32 %v2146_v34, %v860_v14  ;;  %v941_v19 = vadd.f32 %v2146_v34, %v940_v15 }
  0xc2   : > { %v1234_v20 = vmax.f32 %v1018_v12, 0.0  ;;  %v1266_v21 = vmax.f32 %v1098_v13, 0.0 }
  0xc3   : > { %v1171_v22 = vmax.f32 %v861_v18, 0.0  ;;  %v1203_v23 = vmax.f32 %v941_v19, 0.0  ;;  %1890 = vmatmul.msk.bf16.gmra.mxu0 %vm643_vm0, %v1956_v10  ;;  %1906 = vmatmul.msk.bf16.gmra.mxu1 %vm643_vm0, %v1972_v11  ;;  %v1958_v19 = vld [vmem:[%s2077_s22 + $0x68] sm:$0xff] }
  0xc4   : > { %v1362_v24 = vpack.c.bf16 %v1234_v20, %v1234_v20  ;;  %v1394_v25 = vpack.c.bf16 %v1266_v21, %v1266_v21  ;;  %1922 = vmatmul.msk.bf16.gmra.mxu2 %vm643_vm0, %v1988_v16  ;;  %1938 = vmatmul.msk.bf16.gmra.mxu3 %vm643_vm0, %v2004_v17  ;;  %v1974_v20 = vld [vmem:[%s2077_s22 + $0xe8] sm:$0xff] }
  0xc5   : > { %v1299_v26 = vpack.c.bf16 %v1171_v22, %v1171_v22  ;;  %v1331_v27 = vpack.c.bf16 %v1203_v23, %v1203_v23 }
  0xc6   : > { %1491 = vst.msk [vmem:[%s2161_s27 + $0x114] sm:$0xf] %vm1421_vm1, %v1362_v24 }
  0xc7   : > { %1523 = vst.msk [vmem:[%s2161_s27 + $0x194] sm:$0xf] %vm1421_vm1, %v1394_v25  ;;  %v1020_v28 = vpop.f32.mrf.mxu2  ;;  %v1100_v29 = vpop.f32.mrf.mxu3  ;;  %v1990_v25 = vld [vmem:[%s2077_s22 + $0x168] sm:$0xff] }
  0xc8   : > { %1428 = vst.msk [vmem:[%s2161_s27 + $0x18] sm:$0xf] %vm1421_vm1, %v1299_v26  ;;  %v1021_v30 = vadd.f32 %v2146_v34, %v1020_v28  ;;  %v1101_v31 = vadd.f32 %v2146_v34, %v1100_v29  ;;  %v862_v32 = vpop.f32.mrf.mxu0  ;;  %v942_v33 = vpop.f32.mrf.mxu1  ;;  %v2006_v26 = vld [vmem:[%s2077_s22 + $0x1e8] sm:$0xff] }
  0xc9   : > { %1460 = vst.msk [vmem:[%s2161_s27 + $0x98] sm:$0xf] %vm1421_vm1, %v1331_v27  ;;  %v863_v35 = vadd.f32 %v2146_v34, %v862_v32  ;;  %v943_v36 = vadd.f32 %v2146_v34, %v942_v33 }
  0xca   : > { %v1235_v37 = vmax.f32 %v1021_v30, 0.0  ;;  %v1267_v38 = vmax.f32 %v1101_v31, 0.0 }
  0xcb   : > { %v1172_v39 = vmax.f32 %v863_v35, 0.0  ;;  %v1204_v40 = vmax.f32 %v943_v36, 0.0 }
  0xcc   : > { %v1363_v41 = vpack.c.bf16 %v1235_v37, %v1235_v37  ;;  %v1395_v42 = vpack.c.bf16 %v1267_v38, %v1267_v38 }
  0xcd   : > { %v1300_v43 = vpack.c.bf16 %v1172_v39, %v1172_v39  ;;  %v1332_v44 = vpack.c.bf16 %v1204_v40, %v1204_v40 }
  0xce   : > { %1492 = vst.msk [vmem:[%s2161_s27 + $0x118] sm:$0xf] %vm1421_vm1, %v1363_v41 }
  0xcf   : > { %1524 = vst.msk [vmem:[%s2161_s27 + $0x198] sm:$0xf] %vm1421_vm1, %v1395_v42  ;;  %v1022_v45 = vpop.f32.mrf.mxu2  ;;  %v1102_v46 = vpop.f32.mrf.mxu3 }
  0xd0   : > { %1429 = vst.msk [vmem:[%s2161_s27 + $0x1c] sm:$0xf] %vm1421_vm1, %v1300_v43  ;;  %v1023_v49 = vadd.f32 %v2146_v34, %v1022_v45  ;;  %v1103_v50 = vadd.f32 %v2146_v34, %v1102_v46  ;;  %v865_v51 = vpop.f32.mrf.mxu0  ;;  %v945_v52 = vpop.f32.mrf.mxu1 }
  0xd1   : > { %1461 = vst.msk [vmem:[%s2161_s27 + $0x9c] sm:$0xf] %vm1421_vm1, %v1332_v44  ;;  %v866_v55 = vadd.f32 %v2146_v34, %v865_v51  ;;  %v946_v56 = vadd.f32 %v2146_v34, %v945_v52 }
  0xd2   : > { %v1236_v57 = vmax.f32 %v1023_v49, 0.0  ;;  %v1268_v58 = vmax.f32 %v1103_v50, 0.0 }
  0xd3   : > { %v1173_v59 = vmax.f32 %v866_v55, 0.0  ;;  %v1205_v60 = vmax.f32 %v946_v56, 0.0  ;;  %1891 = vmatmul.msk.bf16.gmra.mxu0 %vm643_vm0, %v1957_v47  ;;  %1907 = vmatmul.msk.bf16.gmra.mxu1 %vm643_vm0, %v1973_v48  ;;  %v1959_v56 = vld [vmem:[%s2077_s22 + $0x70] sm:$0xff] }
  0xd4   : > { %v1364_v61 = vpack.c.bf16 %v1236_v57, %v1236_v57  ;;  %v1396_v62 = vpack.c.bf16 %v1268_v58, %v1268_v58  ;;  %1923 = vmatmul.msk.bf16.gmra.mxu2 %vm643_vm0, %v1989_v53  ;;  %1939 = vmatmul.msk.bf16.gmra.mxu3 %vm643_vm0, %v2005_v54  ;;  %v1975_v57 = vld [vmem:[%s2077_s22 + $0xf0] sm:$0xff] }
  0xd5   : > { %v1301_v63 = vpack.c.bf16 %v1173_v59, %v1173_v59  ;;  %v1333_v0 = vpack.c.bf16 %v1205_v60, %v1205_v60 }
  0xd6   : > { %1493 = vst.msk [vmem:[%s2161_s27 + $0x11c] sm:$0xf] %vm1421_vm1, %v1364_v61 }
  0xd7   : > { %1525 = vst.msk [vmem:[%s2161_s27 + $0x19c] sm:$0xf] %vm1421_vm1, %v1396_v62  ;;  %v1025_v1 = vpop.f32.mrf.mxu2  ;;  %v1105_v2 = vpop.f32.mrf.mxu3  ;;  %v1991_v62 = vld [vmem:[%s2077_s22 + $0x170] sm:$0xff] }
  0xd8   : > { %1430 = vst.msk [vmem:[%s2161_s27 + $0x20] sm:$0xf] %vm1421_vm1, %v1301_v63  ;;  %v1026_v3 = vadd.f32 %v2146_v34, %v1025_v1  ;;  %v1106_v4 = vadd.f32 %v2146_v34, %v1105_v2  ;;  %v867_v5 = vpop.f32.mrf.mxu0  ;;  %v947_v6 = vpop.f32.mrf.mxu1  ;;  %v2007_v63 = vld [vmem:[%s2077_s22 + $0x1f0] sm:$0xff] }
  0xd9   : > { %1462 = vst.msk [vmem:[%s2161_s27 + $0xa0] sm:$0xf] %vm1421_vm1, %v1333_v0  ;;  %v868_v7 = vadd.f32 %v2146_v34, %v867_v5  ;;  %v948_v8 = vadd.f32 %v2146_v34, %v947_v6 }
  0xda   : > { %v1237_v9 = vmax.f32 %v1026_v3, 0.0  ;;  %v1269_v10 = vmax.f32 %v1106_v4, 0.0 }
  0xdb   : > { %v1174_v11 = vmax.f32 %v868_v7, 0.0  ;;  %v1206_v12 = vmax.f32 %v948_v8, 0.0 }
  0xdc   : > { %v1365_v13 = vpack.c.bf16 %v1237_v9, %v1237_v9  ;;  %v1397_v14 = vpack.c.bf16 %v1269_v10, %v1269_v10 }
  0xdd   : > { %v1302_v15 = vpack.c.bf16 %v1174_v11, %v1174_v11  ;;  %v1334_v16 = vpack.c.bf16 %v1206_v12, %v1206_v12 }
  0xde   : > { %1494 = vst.msk [vmem:[%s2161_s27 + $0x120] sm:$0xf] %vm1421_vm1, %v1365_v13 }
  0xdf   : > { %1526 = vst.msk [vmem:[%s2161_s27 + $0x1a0] sm:$0xf] %vm1421_vm1, %v1397_v14  ;;  %v1027_v17 = vpop.f32.mrf.mxu2  ;;  %v1107_v18 = vpop.f32.mrf.mxu3 }
  0xe0   : > { %1431 = vst.msk [vmem:[%s2161_s27 + $0x24] sm:$0xf] %vm1421_vm1, %v1302_v15  ;;  %v1028_v21 = vadd.f32 %v2146_v34, %v1027_v17  ;;  %v1108_v22 = vadd.f32 %v2146_v34, %v1107_v18  ;;  %v870_v23 = vpop.f32.mrf.mxu0  ;;  %v950_v24 = vpop.f32.mrf.mxu1 }
  0xe1   : > { %1463 = vst.msk [vmem:[%s2161_s27 + $0xa4] sm:$0xf] %vm1421_vm1, %v1334_v16  ;;  %v871_v27 = vadd.f32 %v2146_v34, %v870_v23  ;;  %v951_v28 = vadd.f32 %v2146_v34, %v950_v24 }
  0xe2   : > { %v1238_v29 = vmax.f32 %v1028_v21, 0.0  ;;  %v1270_v30 = vmax.f32 %v1108_v22, 0.0 }
  0xe3   : > { %v1175_v31 = vmax.f32 %v871_v27, 0.0  ;;  %v1207_v32 = vmax.f32 %v951_v28, 0.0  ;;  %1892 = vmatmul.msk.bf16.gmra.mxu0 %vm643_vm0, %v1958_v19  ;;  %1908 = vmatmul.msk.bf16.gmra.mxu1 %vm643_vm0, %v1974_v20  ;;  %v1960_v28 = vld [vmem:[%s2077_s22 + $0x78] sm:$0xff] }
  0xe4   : > { %v1366_v33 = vpack.c.bf16 %v1238_v29, %v1238_v29  ;;  %v1398_v35 = vpack.c.bf16 %v1270_v30, %v1270_v30  ;;  %1924 = vmatmul.msk.bf16.gmra.mxu2 %vm643_vm0, %v1990_v25  ;;  %1940 = vmatmul.msk.bf16.gmra.mxu3 %vm643_vm0, %v2006_v26  ;;  %v1976_v29 = vld [vmem:[%s2077_s22 + $0xf8] sm:$0xff] }
  0xe5   : > { %v1303_v36 = vpack.c.bf16 %v1175_v31, %v1175_v31  ;;  %v1335_v37 = vpack.c.bf16 %v1207_v32, %v1207_v32 }
  0xe6   : > { %1495 = vst.msk [vmem:[%s2161_s27 + $0x124] sm:$0xf] %vm1421_vm1, %v1366_v33 }
  0xe7   : > { %1527 = vst.msk [vmem:[%s2161_s27 + $0x1a4] sm:$0xf] %vm1421_vm1, %v1398_v35  ;;  %v1030_v38 = vpop.f32.mrf.mxu2  ;;  %v1110_v39 = vpop.f32.mrf.mxu3  ;;  %v1992_v35 = vld [vmem:[%s2077_s22 + $0x178] sm:$0xff] }
  0xe8   : > { %1432 = vst.msk [vmem:[%s2161_s27 + $0x28] sm:$0xf] %vm1421_vm1, %v1303_v36  ;;  %v1031_v40 = vadd.f32 %v2146_v34, %v1030_v38  ;;  %v1111_v41 = vadd.f32 %v2146_v34, %v1110_v39  ;;  %v872_v42 = vpop.f32.mrf.mxu0  ;;  %v952_v43 = vpop.f32.mrf.mxu1  ;;  %v2008_v36 = vld [vmem:[%s2077_s22 + $0x1f8] sm:$0xff] }
  0xe9   : > { %1464 = vst.msk [vmem:[%s2161_s27 + $0xa8] sm:$0xf] %vm1421_vm1, %v1335_v37  ;;  %v873_v44 = vadd.f32 %v2146_v34, %v872_v42  ;;  %v953_v45 = vadd.f32 %v2146_v34, %v952_v43 }
  0xea   : > { %v1239_v46 = vmax.f32 %v1031_v40, 0.0  ;;  %v1271_v47 = vmax.f32 %v1111_v41, 0.0 }
  0xeb   : > { %v1176_v48 = vmax.f32 %v873_v44, 0.0  ;;  %v1208_v49 = vmax.f32 %v953_v45, 0.0 }
  0xec   : > { %v1367_v50 = vpack.c.bf16 %v1239_v46, %v1239_v46  ;;  %v1399_v51 = vpack.c.bf16 %v1271_v47, %v1271_v47 }
  0xed   : > { %v1304_v52 = vpack.c.bf16 %v1176_v48, %v1176_v48  ;;  %v1336_v53 = vpack.c.bf16 %v1208_v49, %v1208_v49 }
  0xee   : > { %1496 = vst.msk [vmem:[%s2161_s27 + $0x128] sm:$0xf] %vm1421_vm1, %v1367_v50 }
  0xef   : > { %1528 = vst.msk [vmem:[%s2161_s27 + $0x1a8] sm:$0xf] %vm1421_vm1, %v1399_v51  ;;  %v1032_v54 = vpop.f32.mrf.mxu2  ;;  %v1112_v55 = vpop.f32.mrf.mxu3 }
  0xf0   : > { %1433 = vst.msk [vmem:[%s2161_s27 + $0x2c] sm:$0xf] %vm1421_vm1, %v1304_v52  ;;  %v1033_v58 = vadd.f32 %v2146_v34, %v1032_v54  ;;  %v1113_v59 = vadd.f32 %v2146_v34, %v1112_v55  ;;  %v875_v60 = vpop.f32.mrf.mxu0  ;;  %v955_v61 = vpop.f32.mrf.mxu1 }
  0xf1   : > { %1465 = vst.msk [vmem:[%s2161_s27 + $0xac] sm:$0xf] %vm1421_vm1, %v1336_v53  ;;  %v876_v0 = vadd.f32 %v2146_v34, %v875_v60  ;;  %v956_v1 = vadd.f32 %v2146_v34, %v955_v61 }
  0xf2   : > { %v1240_v2 = vmax.f32 %v1033_v58, 0.0  ;;  %v1272_v3 = vmax.f32 %v1113_v59, 0.0 }
  0xf3   : > { %v1177_v4 = vmax.f32 %v876_v0, 0.0  ;;  %v1209_v5 = vmax.f32 %v956_v1, 0.0  ;;  %1893 = vmatmul.msk.bf16.gmra.mxu0 %vm643_vm0, %v1959_v56  ;;  %1909 = vmatmul.msk.bf16.gmra.mxu1 %vm643_vm0, %v1975_v57 }
  0xf4   : > { %v1368_v6 = vpack.c.bf16 %v1240_v2, %v1240_v2  ;;  %v1400_v7 = vpack.c.bf16 %v1272_v3, %v1272_v3  ;;  %1925 = vmatmul.msk.bf16.gmra.mxu2 %vm643_vm0, %v1991_v62  ;;  %1941 = vmatmul.msk.bf16.gmra.mxu3 %vm643_vm0, %v2007_v63 }
  0xf5   : > { %v1305_v8 = vpack.c.bf16 %v1177_v4, %v1177_v4  ;;  %v1337_v9 = vpack.c.bf16 %v1209_v5, %v1209_v5 }
  0xf6   : > { %1497 = vst.msk [vmem:[%s2161_s27 + $0x12c] sm:$0xf] %vm1421_vm1, %v1368_v6 }
  0xf7   : > { %1529 = vst.msk [vmem:[%s2161_s27 + $0x1ac] sm:$0xf] %vm1421_vm1, %v1400_v7  ;;  %v1035_v10 = vpop.f32.mrf.mxu2  ;;  %v1115_v11 = vpop.f32.mrf.mxu3 }
  0xf8   : > { %1434 = vst.msk [vmem:[%s2161_s27 + $0x30] sm:$0xf] %vm1421_vm1, %v1305_v8  ;;  %v1036_v12 = vadd.f32 %v2146_v34, %v1035_v10  ;;  %v1116_v13 = vadd.f32 %v2146_v34, %v1115_v11  ;;  %v877_v14 = vpop.f32.mrf.mxu0  ;;  %v957_v15 = vpop.f32.mrf.mxu1 }
  0xf9   : > { %1466 = vst.msk [vmem:[%s2161_s27 + $0xb0] sm:$0xf] %vm1421_vm1, %v1337_v9  ;;  %v878_v16 = vadd.f32 %v2146_v34, %v877_v14  ;;  %v958_v17 = vadd.f32 %v2146_v34, %v957_v15 }
  0xfa   : > { %v1241_v18 = vmax.f32 %v1036_v12, 0.0  ;;  %v1273_v19 = vmax.f32 %v1116_v13, 0.0 }
  0xfb   : > { %v1178_v20 = vmax.f32 %v878_v16, 0.0  ;;  %v1210_v21 = vmax.f32 %v958_v17, 0.0 }
  0xfc   : > { %v1369_v22 = vpack.c.bf16 %v1241_v18, %v1241_v18  ;;  %v1401_v23 = vpack.c.bf16 %v1273_v19, %v1273_v19 }
  0xfd   : > { %v1306_v24 = vpack.c.bf16 %v1178_v20, %v1178_v20  ;;  %v1338_v25 = vpack.c.bf16 %v1210_v21, %v1210_v21 }
  0xfe   : > { %1498 = vst.msk [vmem:[%s2161_s27 + $0x130] sm:$0xf] %vm1421_vm1, %v1369_v22 }
  0xff   : > { %1530 = vst.msk [vmem:[%s2161_s27 + $0x1b0] sm:$0xf] %vm1421_vm1, %v1401_v23  ;;  %v1037_v26 = vpop.f32.mrf.mxu2  ;;  %v1117_v27 = vpop.f32.mrf.mxu3 }
 0x100   : > { %1435 = vst.msk [vmem:[%s2161_s27 + $0x34] sm:$0xf] %vm1421_vm1, %v1306_v24  ;;  %v1038_v30 = vadd.f32 %v2146_v34, %v1037_v26  ;;  %v1118_v31 = vadd.f32 %v2146_v34, %v1117_v27  ;;  %v880_v32 = vpop.f32.mrf.mxu0  ;;  %v960_v33 = vpop.f32.mrf.mxu1 }
 0x101   : > { %1467 = vst.msk [vmem:[%s2161_s27 + $0xb4] sm:$0xf] %vm1421_vm1, %v1338_v25  ;;  %v881_v37 = vadd.f32 %v2146_v34, %v880_v32  ;;  %v961_v38 = vadd.f32 %v2146_v34, %v960_v33 }
 0x102   : > { %v1242_v39 = vmax.f32 %v1038_v30, 0.0  ;;  %v1274_v40 = vmax.f32 %v1118_v31, 0.0 }
 0x103   : > { %v1179_v41 = vmax.f32 %v881_v37, 0.0  ;;  %v1211_v42 = vmax.f32 %v961_v38, 0.0  ;;  %1894 = vmatmul.msk.bf16.gmra.mxu0 %vm643_vm0, %v1960_v28  ;;  %1910 = vmatmul.msk.bf16.gmra.mxu1 %vm643_vm0, %v1976_v29 }
 0x104   : > { %v1370_v43 = vpack.c.bf16 %v1242_v39, %v1242_v39  ;;  %v1402_v44 = vpack.c.bf16 %v1274_v40, %v1274_v40  ;;  %1926 = vmatmul.msk.bf16.gmra.mxu2 %vm643_vm0, %v1992_v35  ;;  %1942 = vmatmul.msk.bf16.gmra.mxu3 %vm643_vm0, %v2008_v36 }
 0x105   : > { %v1307_v45 = vpack.c.bf16 %v1179_v41, %v1179_v41  ;;  %v1339_v46 = vpack.c.bf16 %v1211_v42, %v1211_v42 }
 0x106   : > { %1499 = vst.msk [vmem:[%s2161_s27 + $0x134] sm:$0xf] %vm1421_vm1, %v1370_v43 }
 0x107   : > { %1531 = vst.msk [vmem:[%s2161_s27 + $0x1b4] sm:$0xf] %vm1421_vm1, %v1402_v44  ;;  %v1040_v47 = vpop.f32.mrf.mxu2  ;;  %v1120_v48 = vpop.f32.mrf.mxu3 }
 0x108   : > { %1436 = vst.msk [vmem:[%s2161_s27 + $0x38] sm:$0xf] %vm1421_vm1, %v1307_v45  ;;  %v1041_v49 = vadd.f32 %v2146_v34, %v1040_v47  ;;  %v1121_v50 = vadd.f32 %v2146_v34, %v1120_v48  ;;  %v882_v51 = vpop.f32.mrf.mxu0  ;;  %v962_v52 = vpop.f32.mrf.mxu1 }
 0x109   : > { %1468 = vst.msk [vmem:[%s2161_s27 + $0xb8] sm:$0xf] %vm1421_vm1, %v1339_v46  ;;  %v883_v53 = vadd.f32 %v2146_v34, %v882_v51  ;;  %v963_v54 = vadd.f32 %v2146_v34, %v962_v52 }
 0x10a   : > { %v1243_v55 = vmax.f32 %v1041_v49, 0.0  ;;  %v1275_v56 = vmax.f32 %v1121_v50, 0.0 }
 0x10b   : > { %v1180_v57 = vmax.f32 %v883_v53, 0.0  ;;  %v1212_v58 = vmax.f32 %v963_v54, 0.0 }
 0x10c   : > { %v1371_v59 = vpack.c.bf16 %v1243_v55, %v1243_v55  ;;  %v1403_v60 = vpack.c.bf16 %v1275_v56, %v1275_v56 }
 0x10d   : > { %v1308_v61 = vpack.c.bf16 %v1180_v57, %v1180_v57  ;;  %v1340_v62 = vpack.c.bf16 %v1212_v58, %v1212_v58 }
 0x10e   : > { %1500 = vst.msk [vmem:[%s2161_s27 + $0x138] sm:$0xf] %vm1421_vm1, %v1371_v59 }
 0x10f   : > { %1532 = vst.msk [vmem:[%s2161_s27 + $0x1b8] sm:$0xf] %vm1421_vm1, %v1403_v60  ;;  %v1042_v63 = vpop.f32.mrf.mxu2  ;;  %v1122_v0 = vpop.f32.mrf.mxu3 }
 0x110   : > { %1437 = vst.msk [vmem:[%s2161_s27 + $0x3c] sm:$0xf] %vm1421_vm1, %v1308_v61  ;;  %v1043_v1 = vadd.f32 %v2146_v34, %v1042_v63  ;;  %v1123_v2 = vadd.f32 %v2146_v34, %v1122_v0  ;;  %v885_v3 = vpop.f32.mrf.mxu0  ;;  %v965_v4 = vpop.f32.mrf.mxu1 }
 0x111   : > { %1469 = vst.msk [vmem:[%s2161_s27 + $0xbc] sm:$0xf] %vm1421_vm1, %v1340_v62  ;;  %v886_v5 = vadd.f32 %v2146_v34, %v885_v3  ;;  %v966_v6 = vadd.f32 %v2146_v34, %v965_v4 }
 0x112   : > { %v1244_v7 = vmax.f32 %v1043_v1, 0.0  ;;  %v1276_v8 = vmax.f32 %v1123_v2, 0.0 }
 0x113   : > { %v1181_v9 = vmax.f32 %v886_v5, 0.0  ;;  %v1213_v10 = vmax.f32 %v966_v6, 0.0 }
 0x114   : > { %v1372_v11 = vpack.c.bf16 %v1244_v7, %v1244_v7  ;;  %v1404_v12 = vpack.c.bf16 %v1276_v8, %v1276_v8 }
 0x115   : > { %v1309_v13 = vpack.c.bf16 %v1181_v9, %v1181_v9  ;;  %v1341_v14 = vpack.c.bf16 %v1213_v10, %v1213_v10 }
 0x116   : > { %1501 = vst.msk [vmem:[%s2161_s27 + $0x13c] sm:$0xf] %vm1421_vm1, %v1372_v11 }
 0x117   : > { %1533 = vst.msk [vmem:[%s2161_s27 + $0x1bc] sm:$0xf] %vm1421_vm1, %v1404_v12  ;;  %v1045_v15 = vpop.f32.mrf.mxu2  ;;  %v1125_v16 = vpop.f32.mrf.mxu3 }
 0x118   : > { %1438 = vst.msk [vmem:[%s2161_s27 + $0x40] sm:$0xf] %vm1421_vm1, %v1309_v13  ;;  %v1046_v17 = vadd.f32 %v2146_v34, %v1045_v15  ;;  %v1126_v18 = vadd.f32 %v2146_v34, %v1125_v16  ;;  %v887_v19 = vpop.f32.mrf.mxu0  ;;  %v967_v20 = vpop.f32.mrf.mxu1 }
 0x119   : > { %1470 = vst.msk [vmem:[%s2161_s27 + $0xc0] sm:$0xf] %vm1421_vm1, %v1341_v14  ;;  %v888_v21 = vadd.f32 %v2146_v34, %v887_v19  ;;  %v968_v22 = vadd.f32 %v2146_v34, %v967_v20 }
 0x11a   : > { %v1245_v23 = vmax.f32 %v1046_v17, 0.0  ;;  %v1277_v24 = vmax.f32 %v1126_v18, 0.0 }
 0x11b   : > { %v1182_v25 = vmax.f32 %v888_v21, 0.0  ;;  %v1214_v26 = vmax.f32 %v968_v22, 0.0 }
 0x11c   : > { %v1373_v27 = vpack.c.bf16 %v1245_v23, %v1245_v23  ;;  %v1405_v28 = vpack.c.bf16 %v1277_v24, %v1277_v24 }
 0x11d   : > { %v1310_v29 = vpack.c.bf16 %v1182_v25, %v1182_v25  ;;  %v1342_v30 = vpack.c.bf16 %v1214_v26, %v1214_v26 }
 0x11e   : > { %1502 = vst.msk [vmem:[%s2161_s27 + $0x140] sm:$0xf] %vm1421_vm1, %v1373_v27 }
 0x11f   : > { %1534 = vst.msk [vmem:[%s2161_s27 + $0x1c0] sm:$0xf] %vm1421_vm1, %v1405_v28  ;;  %v1047_v31 = vpop.f32.mrf.mxu2  ;;  %v1127_v32 = vpop.f32.mrf.mxu3 }
 0x120   : > { %1439 = vst.msk [vmem:[%s2161_s27 + $0x44] sm:$0xf] %vm1421_vm1, %v1310_v29  ;;  %v1048_v33 = vadd.f32 %v2146_v34, %v1047_v31  ;;  %v1128_v35 = vadd.f32 %v2146_v34, %v1127_v32  ;;  %v890_v36 = vpop.f32.mrf.mxu0  ;;  %v970_v37 = vpop.f32.mrf.mxu1 }
 0x121   : > { %1471 = vst.msk [vmem:[%s2161_s27 + $0xc4] sm:$0xf] %vm1421_vm1, %v1342_v30  ;;  %v891_v38 = vadd.f32 %v2146_v34, %v890_v36  ;;  %v971_v39 = vadd.f32 %v2146_v34, %v970_v37 }
 0x122   : > { %v1246_v40 = vmax.f32 %v1048_v33, 0.0  ;;  %v1278_v41 = vmax.f32 %v1128_v35, 0.0 }
 0x123   : > { %v1183_v42 = vmax.f32 %v891_v38, 0.0  ;;  %v1215_v43 = vmax.f32 %v971_v39, 0.0 }
 0x124   : > { %v1374_v44 = vpack.c.bf16 %v1246_v40, %v1246_v40  ;;  %v1406_v45 = vpack.c.bf16 %v1278_v41, %v1278_v41 }
 0x125   : > { %v1311_v46 = vpack.c.bf16 %v1183_v42, %v1183_v42  ;;  %v1343_v47 = vpack.c.bf16 %v1215_v43, %v1215_v43 }
 0x126   : > { %1503 = vst.msk [vmem:[%s2161_s27 + $0x144] sm:$0xf] %vm1421_vm1, %v1374_v44 }
 0x127   : > { %1535 = vst.msk [vmem:[%s2161_s27 + $0x1c4] sm:$0xf] %vm1421_vm1, %v1406_v45  ;;  %v1050_v48 = vpop.f32.mrf.mxu2  ;;  %v1130_v49 = vpop.f32.mrf.mxu3 }
 0x128   : > { %1440 = vst.msk [vmem:[%s2161_s27 + $0x48] sm:$0xf] %vm1421_vm1, %v1311_v46  ;;  %v1051_v50 = vadd.f32 %v2146_v34, %v1050_v48  ;;  %v1131_v51 = vadd.f32 %v2146_v34, %v1130_v49  ;;  %v892_v52 = vpop.f32.mrf.mxu0  ;;  %v972_v53 = vpop.f32.mrf.mxu1 }
 0x129   : > { %1472 = vst.msk [vmem:[%s2161_s27 + $0xc8] sm:$0xf] %vm1421_vm1, %v1343_v47  ;;  %v893_v54 = vadd.f32 %v2146_v34, %v892_v52  ;;  %v973_v55 = vadd.f32 %v2146_v34, %v972_v53 }
 0x12a   : > { %v1247_v56 = vmax.f32 %v1051_v50, 0.0  ;;  %v1279_v57 = vmax.f32 %v1131_v51, 0.0 }
 0x12b   : > { %v1184_v58 = vmax.f32 %v893_v54, 0.0  ;;  %v1216_v59 = vmax.f32 %v973_v55, 0.0 }
 0x12c   : > { %v1375_v60 = vpack.c.bf16 %v1247_v56, %v1247_v56  ;;  %v1407_v61 = vpack.c.bf16 %v1279_v57, %v1279_v57 }
 0x12d   : > { %v1312_v62 = vpack.c.bf16 %v1184_v58, %v1184_v58  ;;  %v1344_v63 = vpack.c.bf16 %v1216_v59, %v1216_v59 }
 0x12e   : > { %1504 = vst.msk [vmem:[%s2161_s27 + $0x148] sm:$0xf] %vm1421_vm1, %v1375_v60 }
 0x12f   : > { %1536 = vst.msk [vmem:[%s2161_s27 + $0x1c8] sm:$0xf] %vm1421_vm1, %v1407_v61  ;;  %v1052_v0 = vpop.f32.mrf.mxu2  ;;  %v1132_v1 = vpop.f32.mrf.mxu3 }
 0x130   : > { %1441 = vst.msk [vmem:[%s2161_s27 + $0x4c] sm:$0xf] %vm1421_vm1, %v1312_v62  ;;  %v1053_v2 = vadd.f32 %v2146_v34, %v1052_v0  ;;  %v1133_v3 = vadd.f32 %v2146_v34, %v1132_v1  ;;  %v895_v4 = vpop.f32.mrf.mxu0  ;;  %v975_v5 = vpop.f32.mrf.mxu1 }
 0x131   : > { %1473 = vst.msk [vmem:[%s2161_s27 + $0xcc] sm:$0xf] %vm1421_vm1, %v1344_v63  ;;  %v896_v6 = vadd.f32 %v2146_v34, %v895_v4  ;;  %v976_v7 = vadd.f32 %v2146_v34, %v975_v5 }
 0x132   : > { %v1248_v8 = vmax.f32 %v1053_v2, 0.0  ;;  %v1280_v9 = vmax.f32 %v1133_v3, 0.0 }
 0x133   : > { %v1185_v10 = vmax.f32 %v896_v6, 0.0  ;;  %v1217_v11 = vmax.f32 %v976_v7, 0.0 }
 0x134   : > { %v1376_v12 = vpack.c.bf16 %v1248_v8, %v1248_v8  ;;  %v1408_v13 = vpack.c.bf16 %v1280_v9, %v1280_v9 }
 0x135   : > { %v1313_v14 = vpack.c.bf16 %v1185_v10, %v1185_v10  ;;  %v1345_v15 = vpack.c.bf16 %v1217_v11, %v1217_v11 }
 0x136   : > { %1505 = vst.msk [vmem:[%s2161_s27 + $0x14c] sm:$0xf] %vm1421_vm1, %v1376_v12 }
 0x137   : > { %1537 = vst.msk [vmem:[%s2161_s27 + $0x1cc] sm:$0xf] %vm1421_vm1, %v1408_v13  ;;  %v1055_v16 = vpop.f32.mrf.mxu2  ;;  %v1135_v17 = vpop.f32.mrf.mxu3 }
 0x138   : > { %1442 = vst.msk [vmem:[%s2161_s27 + $0x50] sm:$0xf] %vm1421_vm1, %v1313_v14  ;;  %v1056_v18 = vadd.f32 %v2146_v34, %v1055_v16  ;;  %v1136_v19 = vadd.f32 %v2146_v34, %v1135_v17  ;;  %v897_v20 = vpop.f32.mrf.mxu0  ;;  %v977_v21 = vpop.f32.mrf.mxu1 }
 0x139   : > { %1474 = vst.msk [vmem:[%s2161_s27 + $0xd0] sm:$0xf] %vm1421_vm1, %v1345_v15  ;;  %v898_v22 = vadd.f32 %v2146_v34, %v897_v20  ;;  %v978_v23 = vadd.f32 %v2146_v34, %v977_v21 }
 0x13a   : > { %v1249_v24 = vmax.f32 %v1056_v18, 0.0  ;;  %v1281_v25 = vmax.f32 %v1136_v19, 0.0 }
 0x13b   : > { %v1186_v26 = vmax.f32 %v898_v22, 0.0  ;;  %v1218_v27 = vmax.f32 %v978_v23, 0.0 }
 0x13c   : > { %v1377_v28 = vpack.c.bf16 %v1249_v24, %v1249_v24  ;;  %v1409_v29 = vpack.c.bf16 %v1281_v25, %v1281_v25 }
 0x13d   : > { %v1314_v30 = vpack.c.bf16 %v1186_v26, %v1186_v26  ;;  %v1346_v31 = vpack.c.bf16 %v1218_v27, %v1218_v27 }
 0x13e   : > { %1506 = vst.msk [vmem:[%s2161_s27 + $0x150] sm:$0xf] %vm1421_vm1, %v1377_v28 }
 0x13f   : > { %1538 = vst.msk [vmem:[%s2161_s27 + $0x1d0] sm:$0xf] %vm1421_vm1, %v1409_v29  ;;  %v1057_v32 = vpop.f32.mrf.mxu2  ;;  %v1137_v33 = vpop.f32.mrf.mxu3 }
 0x140   : > { %1443 = vst.msk [vmem:[%s2161_s27 + $0x54] sm:$0xf] %vm1421_vm1, %v1314_v30  ;;  %v1058_v35 = vadd.f32 %v2146_v34, %v1057_v32  ;;  %v1138_v36 = vadd.f32 %v2146_v34, %v1137_v33  ;;  %v900_v37 = vpop.f32.mrf.mxu0  ;;  %v980_v38 = vpop.f32.mrf.mxu1 }
 0x141   : > { %1475 = vst.msk [vmem:[%s2161_s27 + $0xd4] sm:$0xf] %vm1421_vm1, %v1346_v31  ;;  %v901_v39 = vadd.f32 %v2146_v34, %v900_v37  ;;  %v981_v40 = vadd.f32 %v2146_v34, %v980_v38  ;;  %v2490_v34 = vld [vmem:[%s2613_s2] ss:$0 sm:$0xff] }
 0x142   : > { %v1250_v41 = vmax.f32 %v1058_v35, 0.0  ;;  %v1282_v42 = vmax.f32 %v1138_v36, 0.0 }
 0x143   : > { %v1187_v43 = vmax.f32 %v901_v39, 0.0  ;;  %v1219_v44 = vmax.f32 %v981_v40, 0.0 }
 0x144   : > { %v1378_v45 = vpack.c.bf16 %v1250_v41, %v1250_v41  ;;  %v1410_v46 = vpack.c.bf16 %v1282_v42, %v1282_v42 }
 0x145   : > { %v1315_v47 = vpack.c.bf16 %v1187_v43, %v1187_v43  ;;  %v1347_v48 = vpack.c.bf16 %v1219_v44, %v1219_v44 }
 0x146   : > { %1507 = vst.msk [vmem:[%s2161_s27 + $0x154] sm:$0xf] %vm1421_vm1, %v1378_v45 }
 0x147   : > { %1539 = vst.msk [vmem:[%s2161_s27 + $0x1d4] sm:$0xf] %vm1421_vm1, %v1410_v46  ;;  %v1060_v49 = vpop.f32.mrf.mxu2  ;;  %v1140_v50 = vpop.f32.mrf.mxu3 }
 0x148   : > { %1444 = vst.msk [vmem:[%s2161_s27 + $0x58] sm:$0xf] %vm1421_vm1, %v1315_v47  ;;  %v1061_v51 = vadd.f32 %v2490_v34, %v1060_v49  ;;  %v1141_v52 = vadd.f32 %v2490_v34, %v1140_v50  ;;  %v902_v53 = vpop.f32.mrf.mxu0  ;;  %v982_v54 = vpop.f32.mrf.mxu1 }
 0x149   : > { %1476 = vst.msk [vmem:[%s2161_s27 + $0xd8] sm:$0xf] %vm1421_vm1, %v1347_v48  ;;  %v903_v55 = vadd.f32 %v2490_v34, %v902_v53  ;;  %v983_v56 = vadd.f32 %v2490_v34, %v982_v54 }
 0x14a   : > { %v1251_v57 = vmax.f32 %v1061_v51, 0.0  ;;  %v1283_v58 = vmax.f32 %v1141_v52, 0.0 }
 0x14b   : > { %v1188_v59 = vmax.f32 %v903_v55, 0.0  ;;  %v1220_v60 = vmax.f32 %v983_v56, 0.0 }
 0x14c   : > { %v1379_v61 = vpack.c.bf16 %v1251_v57, %v1251_v57  ;;  %v1411_v62 = vpack.c.bf16 %v1283_v58, %v1283_v58 }
 0x14d   : > { %v1316_v63 = vpack.c.bf16 %v1188_v59, %v1188_v59  ;;  %v1348_v0 = vpack.c.bf16 %v1220_v60, %v1220_v60 }
 0x14e   : > { %1508 = vst.msk [vmem:[%s2161_s27 + $0x158] sm:$0xf] %vm1421_vm1, %v1379_v61 }
 0x14f   : > { %1540 = vst.msk [vmem:[%s2161_s27 + $0x1d8] sm:$0xf] %vm1421_vm1, %v1411_v62  ;;  %v1062_v1 = vpop.f32.mrf.mxu2  ;;  %v1142_v2 = vpop.f32.mrf.mxu3 }
 0x150   : > { %1445 = vst.msk [vmem:[%s2161_s27 + $0x5c] sm:$0xf] %vm1421_vm1, %v1316_v63  ;;  %v1063_v3 = vadd.f32 %v2490_v34, %v1062_v1  ;;  %v1143_v4 = vadd.f32 %v2490_v34, %v1142_v2  ;;  %v905_v5 = vpop.f32.mrf.mxu0  ;;  %v985_v6 = vpop.f32.mrf.mxu1 }
 0x151   : > { %1477 = vst.msk [vmem:[%s2161_s27 + $0xdc] sm:$0xf] %vm1421_vm1, %v1348_v0  ;;  %v906_v7 = vadd.f32 %v2490_v34, %v905_v5  ;;  %v986_v8 = vadd.f32 %v2490_v34, %v985_v6 }
 0x152   : > { %v1252_v9 = vmax.f32 %v1063_v3, 0.0  ;;  %v1284_v10 = vmax.f32 %v1143_v4, 0.0 }
 0x153   : > { %v1189_v11 = vmax.f32 %v906_v7, 0.0  ;;  %v1221_v12 = vmax.f32 %v986_v8, 0.0 }
 0x154   : > { %v1380_v13 = vpack.c.bf16 %v1252_v9, %v1252_v9  ;;  %v1412_v14 = vpack.c.bf16 %v1284_v10, %v1284_v10 }
 0x155   : > { %v1317_v15 = vpack.c.bf16 %v1189_v11, %v1189_v11  ;;  %v1349_v16 = vpack.c.bf16 %v1221_v12, %v1221_v12 }
 0x156   : > { %1509 = vst.msk [vmem:[%s2161_s27 + $0x15c] sm:$0xf] %vm1421_vm1, %v1380_v13 }
 0x157   : > { %1541 = vst.msk [vmem:[%s2161_s27 + $0x1dc] sm:$0xf] %vm1421_vm1, %v1412_v14  ;;  %v1065_v17 = vpop.f32.mrf.mxu2  ;;  %v1145_v18 = vpop.f32.mrf.mxu3 }
 0x158   : > { %1446 = vst.msk [vmem:[%s2161_s27 + $0x60] sm:$0xf] %vm1421_vm1, %v1317_v15  ;;  %v1066_v19 = vadd.f32 %v2490_v34, %v1065_v17  ;;  %v1146_v20 = vadd.f32 %v2490_v34, %v1145_v18  ;;  %v907_v21 = vpop.f32.mrf.mxu0  ;;  %v987_v22 = vpop.f32.mrf.mxu1 }
 0x159   : > { %1478 = vst.msk [vmem:[%s2161_s27 + $0xe0] sm:$0xf] %vm1421_vm1, %v1349_v16  ;;  %v908_v23 = vadd.f32 %v2490_v34, %v907_v21  ;;  %v988_v24 = vadd.f32 %v2490_v34, %v987_v22 }
 0x15a   : > { %v1253_v25 = vmax.f32 %v1066_v19, 0.0  ;;  %v1285_v26 = vmax.f32 %v1146_v20, 0.0 }
 0x15b   : > { %v1190_v27 = vmax.f32 %v908_v23, 0.0  ;;  %v1222_v28 = vmax.f32 %v988_v24, 0.0 }
 0x15c   : > { %v1381_v29 = vpack.c.bf16 %v1253_v25, %v1253_v25  ;;  %v1413_v30 = vpack.c.bf16 %v1285_v26, %v1285_v26 }
 0x15d   : > { %v1318_v31 = vpack.c.bf16 %v1190_v27, %v1190_v27  ;;  %v1350_v32 = vpack.c.bf16 %v1222_v28, %v1222_v28 }
 0x15e   : > { %1510 = vst.msk [vmem:[%s2161_s27 + $0x160] sm:$0xf] %vm1421_vm1, %v1381_v29 }
 0x15f   : > { %1542 = vst.msk [vmem:[%s2161_s27 + $0x1e0] sm:$0xf] %vm1421_vm1, %v1413_v30  ;;  %v1067_v33 = vpop.f32.mrf.mxu2  ;;  %v1147_v35 = vpop.f32.mrf.mxu3 }
 0x160   : > { %1447 = vst.msk [vmem:[%s2161_s27 + $0x64] sm:$0xf] %vm1421_vm1, %v1318_v31  ;;  %v1068_v36 = vadd.f32 %v2490_v34, %v1067_v33  ;;  %v1148_v37 = vadd.f32 %v2490_v34, %v1147_v35  ;;  %v910_v38 = vpop.f32.mrf.mxu0  ;;  %v990_v39 = vpop.f32.mrf.mxu1 }
 0x161   : > { %1479 = vst.msk [vmem:[%s2161_s27 + $0xe4] sm:$0xf] %vm1421_vm1, %v1350_v32  ;;  %v911_v40 = vadd.f32 %v2490_v34, %v910_v38  ;;  %v991_v41 = vadd.f32 %v2490_v34, %v990_v39 }
 0x162   : > { %v1254_v42 = vmax.f32 %v1068_v36, 0.0  ;;  %v1286_v43 = vmax.f32 %v1148_v37, 0.0 }
 0x163   : > { %v1191_v44 = vmax.f32 %v911_v40, 0.0  ;;  %v1223_v45 = vmax.f32 %v991_v41, 0.0 }
 0x164   : > { %v1382_v46 = vpack.c.bf16 %v1254_v42, %v1254_v42  ;;  %v1414_v47 = vpack.c.bf16 %v1286_v43, %v1286_v43 }
 0x165   : > { %v1319_v48 = vpack.c.bf16 %v1191_v44, %v1191_v44  ;;  %v1351_v49 = vpack.c.bf16 %v1223_v45, %v1223_v45 }
 0x166   : > { %1511 = vst.msk [vmem:[%s2161_s27 + $0x164] sm:$0xf] %vm1421_vm1, %v1382_v46 }
 0x167   : > { %1543 = vst.msk [vmem:[%s2161_s27 + $0x1e4] sm:$0xf] %vm1421_vm1, %v1414_v47  ;;  %v1070_v50 = vpop.f32.mrf.mxu2  ;;  %v1150_v51 = vpop.f32.mrf.mxu3 }
 0x168   : > { %1448 = vst.msk [vmem:[%s2161_s27 + $0x68] sm:$0xf] %vm1421_vm1, %v1319_v48  ;;  %v1071_v52 = vadd.f32 %v2490_v34, %v1070_v50  ;;  %v1151_v53 = vadd.f32 %v2490_v34, %v1150_v51  ;;  %v912_v54 = vpop.f32.mrf.mxu0  ;;  %v992_v55 = vpop.f32.mrf.mxu1 }
 0x169   : > { %1480 = vst.msk [vmem:[%s2161_s27 + $0xe8] sm:$0xf] %vm1421_vm1, %v1351_v49  ;;  %v913_v56 = vadd.f32 %v2490_v34, %v912_v54  ;;  %v993_v57 = vadd.f32 %v2490_v34, %v992_v55 }
 0x16a   : > { %v1255_v58 = vmax.f32 %v1071_v52, 0.0  ;;  %v1287_v59 = vmax.f32 %v1151_v53, 0.0 }
 0x16b   : > { %v1192_v60 = vmax.f32 %v913_v56, 0.0  ;;  %v1224_v61 = vmax.f32 %v993_v57, 0.0 }
 0x16c   : > { %v1383_v62 = vpack.c.bf16 %v1255_v58, %v1255_v58  ;;  %v1415_v63 = vpack.c.bf16 %v1287_v59, %v1287_v59 }
 0x16d   : > { %v1320_v0 = vpack.c.bf16 %v1192_v60, %v1192_v60  ;;  %v1352_v1 = vpack.c.bf16 %v1224_v61, %v1224_v61 }
 0x16e   : > { %1512 = vst.msk [vmem:[%s2161_s27 + $0x168] sm:$0xf] %vm1421_vm1, %v1383_v62 }
 0x16f   : > { %1544 = vst.msk [vmem:[%s2161_s27 + $0x1e8] sm:$0xf] %vm1421_vm1, %v1415_v63  ;;  %v1072_v2 = vpop.f32.mrf.mxu2  ;;  %v1152_v3 = vpop.f32.mrf.mxu3 }
 0x170   : > { %1449 = vst.msk [vmem:[%s2161_s27 + $0x6c] sm:$0xf] %vm1421_vm1, %v1320_v0  ;;  %v1073_v4 = vadd.f32 %v2490_v34, %v1072_v2  ;;  %v1153_v5 = vadd.f32 %v2490_v34, %v1152_v3  ;;  %v915_v6 = vpop.f32.mrf.mxu0  ;;  %v995_v7 = vpop.f32.mrf.mxu1 }
 0x171   : > { %1481 = vst.msk [vmem:[%s2161_s27 + $0xec] sm:$0xf] %vm1421_vm1, %v1352_v1  ;;  %v916_v8 = vadd.f32 %v2490_v34, %v915_v6  ;;  %v996_v9 = vadd.f32 %v2490_v34, %v995_v7 }
 0x172   : > { %v1256_v10 = vmax.f32 %v1073_v4, 0.0  ;;  %v1288_v11 = vmax.f32 %v1153_v5, 0.0 }
 0x173   : > { %v1193_v12 = vmax.f32 %v916_v8, 0.0  ;;  %v1225_v13 = vmax.f32 %v996_v9, 0.0 }
 0x174   : > { %v1384_v14 = vpack.c.bf16 %v1256_v10, %v1256_v10  ;;  %v1416_v15 = vpack.c.bf16 %v1288_v11, %v1288_v11 }
 0x175   : > { %v1321_v16 = vpack.c.bf16 %v1193_v12, %v1193_v12  ;;  %v1353_v17 = vpack.c.bf16 %v1225_v13, %v1225_v13 }
 0x176   : > { %1513 = vst.msk [vmem:[%s2161_s27 + $0x16c] sm:$0xf] %vm1421_vm1, %v1384_v14 }
 0x177   : > { %1545 = vst.msk [vmem:[%s2161_s27 + $0x1ec] sm:$0xf] %vm1421_vm1, %v1416_v15  ;;  %v1075_v18 = vpop.f32.mrf.mxu2  ;;  %v1155_v19 = vpop.f32.mrf.mxu3 }
 0x178   : > { %1450 = vst.msk [vmem:[%s2161_s27 + $0x70] sm:$0xf] %vm1421_vm1, %v1321_v16  ;;  %v1076_v20 = vadd.f32 %v2490_v34, %v1075_v18  ;;  %v1156_v21 = vadd.f32 %v2490_v34, %v1155_v19  ;;  %v917_v22 = vpop.f32.mrf.mxu0  ;;  %v997_v23 = vpop.f32.mrf.mxu1 }
 0x179   : > { %1482 = vst.msk [vmem:[%s2161_s27 + $0xf0] sm:$0xf] %vm1421_vm1, %v1353_v17  ;;  %v918_v24 = vadd.f32 %v2490_v34, %v917_v22  ;;  %v998_v25 = vadd.f32 %v2490_v34, %v997_v23 }
 0x17a   : > { %v1257_v26 = vmax.f32 %v1076_v20, 0.0  ;;  %v1289_v27 = vmax.f32 %v1156_v21, 0.0 }
 0x17b   : > { %v1194_v28 = vmax.f32 %v918_v24, 0.0  ;;  %v1226_v29 = vmax.f32 %v998_v25, 0.0 }
 0x17c   : > { %v1385_v30 = vpack.c.bf16 %v1257_v26, %v1257_v26  ;;  %v1417_v31 = vpack.c.bf16 %v1289_v27, %v1289_v27 }
 0x17d   : > { %v1322_v32 = vpack.c.bf16 %v1194_v28, %v1194_v28  ;;  %v1354_v33 = vpack.c.bf16 %v1226_v29, %v1226_v29 }
 0x17e   : > { %1514 = vst.msk [vmem:[%s2161_s27 + $0x170] sm:$0xf] %vm1421_vm1, %v1385_v30 }
 0x17f   : > { %1546 = vst.msk [vmem:[%s2161_s27 + $0x1f0] sm:$0xf] %vm1421_vm1, %v1417_v31  ;;  %v1077_v35 = vpop.f32.mrf.mxu2  ;;  %v1157_v36 = vpop.f32.mrf.mxu3 }
 0x180   : > { %1451 = vst.msk [vmem:[%s2161_s27 + $0x74] sm:$0xf] %vm1421_vm1, %v1322_v32  ;;  %v1078_v37 = vadd.f32 %v2490_v34, %v1077_v35  ;;  %v1158_v38 = vadd.f32 %v2490_v34, %v1157_v36  ;;  %v920_v39 = vpop.f32.mrf.mxu0  ;;  %v1000_v40 = vpop.f32.mrf.mxu1 }
 0x181   : > { %1483 = vst.msk [vmem:[%s2161_s27 + $0xf4] sm:$0xf] %vm1421_vm1, %v1354_v33  ;;  %v921_v41 = vadd.f32 %v2490_v34, %v920_v39  ;;  %v1001_v42 = vadd.f32 %v2490_v34, %v1000_v40 }
 0x182   : > { %v1258_v43 = vmax.f32 %v1078_v37, 0.0  ;;  %v1290_v44 = vmax.f32 %v1158_v38, 0.0 }
 0x183   : > { %v1195_v45 = vmax.f32 %v921_v41, 0.0  ;;  %v1227_v46 = vmax.f32 %v1001_v42, 0.0 }
 0x184   : > { %v1386_v47 = vpack.c.bf16 %v1258_v43, %v1258_v43  ;;  %v1418_v48 = vpack.c.bf16 %v1290_v44, %v1290_v44 }
 0x185   : > { %v1323_v49 = vpack.c.bf16 %v1195_v45, %v1195_v45  ;;  %v1355_v50 = vpack.c.bf16 %v1227_v46, %v1227_v46 }
 0x186   : > { %1515 = vst.msk [vmem:[%s2161_s27 + $0x174] sm:$0xf] %vm1421_vm1, %v1386_v47 }
 0x187   : > { %1547 = vst.msk [vmem:[%s2161_s27 + $0x1f4] sm:$0xf] %vm1421_vm1, %v1418_v48  ;;  %v1080_v51 = vpop.f32.mrf.mxu2  ;;  %v1160_v52 = vpop.f32.mrf.mxu3 }
 0x188   : > { %1452 = vst.msk [vmem:[%s2161_s27 + $0x78] sm:$0xf] %vm1421_vm1, %v1323_v49  ;;  %v1081_v53 = vadd.f32 %v2490_v34, %v1080_v51  ;;  %v1161_v54 = vadd.f32 %v2490_v34, %v1160_v52  ;;  %v922_v55 = vpop.f32.mrf.mxu0  ;;  %v1002_v56 = vpop.f32.mrf.mxu1 }
 0x189   : > { %1484 = vst.msk [vmem:[%s2161_s27 + $0xf8] sm:$0xf] %vm1421_vm1, %v1355_v50  ;;  %v923_v57 = vadd.f32 %v2490_v34, %v922_v55  ;;  %v1003_v58 = vadd.f32 %v2490_v34, %v1002_v56 }
 0x18a   : > { %v1259_v59 = vmax.f32 %v1081_v53, 0.0  ;;  %v1291_v60 = vmax.f32 %v1161_v54, 0.0 }
 0x18b   : > { %v1196_v61 = vmax.f32 %v923_v57, 0.0  ;;  %v1228_v62 = vmax.f32 %v1003_v58, 0.0 }
 0x18c   : > { %v1387_v63 = vpack.c.bf16 %v1259_v59, %v1259_v59  ;;  %v1419_v0 = vpack.c.bf16 %v1291_v60, %v1291_v60 }
 0x18d   : > { %v1324_v1 = vpack.c.bf16 %v1196_v61, %v1196_v61  ;;  %v1356_v2 = vpack.c.bf16 %v1228_v62, %v1228_v62 }
 0x18e   : > { %1516 = vst.msk [vmem:[%s2161_s27 + $0x178] sm:$0xf] %vm1421_vm1, %v1387_v63 }
 0x18f   : > { %1548 = vst.msk [vmem:[%s2161_s27 + $0x1f8] sm:$0xf] %vm1421_vm1, %v1419_v0  ;;  %v1082_v3 = vpop.f32.mrf.mxu2  ;;  %v1162_v4 = vpop.f32.mrf.mxu3 }
 0x190   : > { %1453 = vst.msk [vmem:[%s2161_s27 + $0x7c] sm:$0xf] %vm1421_vm1, %v1324_v1  ;;  %v1083_v5 = vadd.f32 %v2490_v34, %v1082_v3  ;;  %v1163_v6 = vadd.f32 %v2490_v34, %v1162_v4 }
 0x191   : > { %1485 = vst.msk [vmem:[%s2161_s27 + $0xfc] sm:$0xf] %vm1421_vm1, %v1356_v2 }
 0x192   : > { %v1260_v7 = vmax.f32 %v1083_v5, 0.0  ;;  %v1292_v8 = vmax.f32 %v1163_v6, 0.0 }
 0x194   : > { %v1388_v9 = vpack.c.bf16 %v1260_v7, %v1260_v7  ;;  %v1420_v10 = vpack.c.bf16 %v1292_v8, %v1292_v8 }
 0x196   : > { %1517 = vst.msk [vmem:[%s2161_s27 + $0x17c] sm:$0xf] %vm1421_vm1, %v1388_v9 }
 0x197   : > { %1549 = vst.msk [vmem:[%s2161_s27 + $0x1fc] sm:$0xf] %vm1421_vm1, %v1420_v10 }
 0x198 PF: > { %s13_s12 = sadd.s32 1, %s2033_s12  }
 0x199   : > { %p10_p4 = scmp.ge.s32.totalorder %s13_s12, 4  }
 0x19b   :  { %12 = sbr.rel (!%p10_p4) target bundleno = 1 (0x1), region = 62 }

// kernel: two_heads_cityscapes_forward.9
= control target key start
LH: loop header
LB: loop body
LE: loop exit
PB: predicated region body
PF: predicated region fallthrough
CT: control target
= control target key end

     0   :  { %s1090_s12 = smov 0   ;;  %s1329_s0 = inlined_call_operand.vmem [shape: bf16[512,144], index: 0, kind: input, shape index: {}]   ;;  %s1330_s1 = inlined_call_operand.vmem [shape: bf16[144,24], index: 1, kind: input, shape index: {}]   ;;  %s1331_s2 = inlined_call_operand.vmem [shape: f32[1,24], index: 2, kind: input, shape index: {}]   ;;  %s1332_s3 = inlined_call_operand.vmem [shape: bf16[512,24], index: 3, kind: output, shape index: {}]  }
   0x1 LB: > { %s810_s13 = sadd.s32 4294967295, %s1068_s12   ;;  %p814_p0 = scmp.ge.s32.totalorder %s1068_s12, 1  ;;  %s1068_s12 = sphi %s1090_s12, %s13_s12  }
   0x2   : > { %p139_p1 = scmp.lt.s32.totalorder %s1068_s12, 3 }
   0x4   : > { %p140_p2 = pnand %p814_p0, %p139_p1 }
   0x5   : > { %s815_s18 = sshll.u32 (!%p140_p2), %s810_s13, 5 }
   0x6   : > { %143 = sbr.rel (%p140_p2) target bundleno = 304 (0x130), region = 32  ;;  %p165_p3 = scmp.lt.s32.totalorder (!%p140_p2), %s815_s18, 63 }
   0xb   : > { %v1042_v0 = vld [vmem:[%s1330_s1 + $0x38] sm:$0xff]  ;;  %v1043_v1 = vld [vmem:[%s1330_s1 + $0x40] sm:$0xff]  ;;  %v1041_v2 = vld [vmem:[%s1330_s1 + $0x30] sm:$0xff]  ;;  %s1334_s18 = smov (!%p165_p3, %s815_s18), 63  ;;  %vm430_vm0 = vcmask 130048   ;;  %vm721_vm1 = vcmask 191488  }
   0xc   : > { %479 = vmatpush.bf16.msra.mxu0 %v1042_v0  ;;  %1044 = vmatpush.bf16.msra.mxu2 %v1042_v0  ;;  %s1002_s21 = sshll.u32 %s1334_s18, 3  ;;  %v1040_v3 = vld [vmem:[%s1330_s1 + $0x28] sm:$0xff]  ;;  %v1039_v7 = vld [vmem:[%s1330_s1 + $0x20] sm:$0xff]  ;;  %v1038_v11 = vld [vmem:[%s1330_s1 + $0x18] sm:$0xff]  ;;  %s819_s13 = sshll.u32 %s1334_s18, 2 }
   0xd   : > { %575 = vmatpush.bf16.msra.mxu1 %v1043_v1  ;;  %1052 = vmatpush.bf16.msra.mxu3 %v1043_v1  ;;  %s1113_s24 = scalar_lea.vmem %s1329_s0, %s1002_s21  ;;  %v1037_v12 = vld [vmem:[%s1330_s1 + $0x10] sm:$0xff]  ;;  %v1036_v16 = vld [vmem:[%s1330_s1 + $0x8] sm:$0xff]  ;;  %v1035_v19 = vld [vmem:[%s1330_s1] sm:$0xff]  ;;  %s1223_s16 = scalar_lea.vmem %s1332_s3, %s819_s13 }
   0xe   : > { %v1003_v4 = vld [vmem:[%s1113_s24 + $0x4] sm:$0xf]  ;;  %v824_v5 = vld [vmem:[%s1113_s24 + $0x8] sm:$0xf0]  ;;  %v1021_v8 = vld [vmem:[%s1113_s24 + $0x94] sm:$0xf] }
   0xf   : > { %v827_v6 = vor.u32 %v1003_v4, %v824_v5  ;;  %v896_v9 = vld [vmem:[%s1113_s24 + $0x98] sm:$0xf0]  ;;  %v1005_v13 = vld [vmem:[%s1113_s24 + $0x14] sm:$0xf]  ;;  %v1023_v17 = vld [vmem:[%s1113_s24 + $0xa4] sm:$0xf] }
  0x10   : > { %480 = vmatpush.bf16.msra.mxu0 %v1041_v2  ;;  %1045 = vmatpush.bf16.msra.mxu2 %v1041_v2  ;;  %v899_v10 = vor.u32 %v1021_v8, %v896_v9  ;;  %v832_v14 = vld [vmem:[%s1113_s24 + $0x18] sm:$0xf0]  ;;  %v904_v18 = vld [vmem:[%s1113_s24 + $0xa8] sm:$0xf0]  ;;  %v822_v20 = vld [vmem:[%s1113_s24] sm:$0xf] }
  0x11   : > { %984 = vmatmul.msk.bf16.vlgmr.msra.gmra.mxu1 %vm430_vm0, %v827_v6  ;;  %v835_v15 = vor.u32 %v1005_v13, %v832_v14  ;;  %v1004_v21 = vld [vmem:[%s1113_s24 + $0x4] sm:$0xf0]  ;;  %v907_v22 = vor.u32 %v1023_v17, %v904_v18  ;;  %v886_v23 = vld [vmem:[%s1113_s24 + $0x80] sm:$0xf]  ;;  %v1007_v27 = vld [vmem:[%s1113_s24 + $0x24] sm:$0xf] }
  0x12   : > { %993 = vmatmul.msk.bf16.vlgmr.msra.gmra.mxu3 %vm430_vm0, %v899_v10  ;;  %v1020_v24 = vld [vmem:[%s1113_s24 + $0x84] sm:$0xf0]  ;;  %v823_v25 = vor.u32 %v1004_v21, %v822_v20  ;;  %v840_v28 = vld [vmem:[%s1113_s24 + $0x28] sm:$0xf0]  ;;  %v1025_v30 = vld [vmem:[%s1113_s24 + $0xb4] sm:$0xf] }
  0x13   : > { %v887_v26 = vor.u32 %v1020_v24, %v886_v23  ;;  %v843_v29 = vor.u32 %v1007_v27, %v840_v28  ;;  %v912_v31 = vld [vmem:[%s1113_s24 + $0xb8] sm:$0xf0]  ;;  %v830_v32 = vld [vmem:[%s1113_s24 + $0x10] sm:$0xf]  ;;  %v1006_v33 = vld [vmem:[%s1113_s24 + $0x14] sm:$0xf0] }
  0x14   : > { %481 = vmatpush.bf16.msra.mxu0 %v1040_v3  ;;  %1046 = vmatpush.bf16.msra.mxu2 %v1040_v3  ;;  %v915_v34 = vor.u32 %v1025_v30, %v912_v31  ;;  %v894_v35 = vld [vmem:[%s1113_s24 + $0x90] sm:$0xf]  ;;  %v1022_v36 = vld [vmem:[%s1113_s24 + $0x94] sm:$0xf0]  ;;  %v831_v37 = vor.u32 %v1006_v33, %v830_v32  ;;  %v1009_v39 = vld [vmem:[%s1113_s24 + $0x34] sm:$0xf] }
  0x15   : > { %v895_v38 = vor.u32 %v1022_v36, %v894_v35  ;;  %v848_v40 = vld [vmem:[%s1113_s24 + $0x38] sm:$0xf0]  ;;  %v1027_v42 = vld [vmem:[%s1113_s24 + $0xc4] sm:$0xf]  ;;  %v920_v43 = vld [vmem:[%s1113_s24 + $0xc8] sm:$0xf0] }
  0x16   : > { %v851_v41 = vor.u32 %v1009_v39, %v848_v40  ;;  %v838_v44 = vld [vmem:[%s1113_s24 + $0x20] sm:$0xf]  ;;  %v1008_v45 = vld [vmem:[%s1113_s24 + $0x24] sm:$0xf0]  ;;  %v923_v46 = vor.u32 %v1027_v42, %v920_v43  ;;  %v1011_v51 = vld [vmem:[%s1113_s24 + $0x44] sm:$0xf] }
  0x17   : > { %v902_v47 = vld [vmem:[%s1113_s24 + $0xa0] sm:$0xf]  ;;  %v1024_v48 = vld [vmem:[%s1113_s24 + $0xa4] sm:$0xf0]  ;;  %v839_v49 = vor.u32 %v1008_v45, %v838_v44  ;;  %v856_v52 = vld [vmem:[%s1113_s24 + $0x48] sm:$0xf0] }
  0x18   : > { %482 = vmatpush.bf16.msra.mxu0 %v1039_v7  ;;  %1047 = vmatpush.bf16.msra.mxu2 %v1039_v7  ;;  %v903_v50 = vor.u32 %v1024_v48, %v902_v47  ;;  %v859_v53 = vor.u32 %v1011_v51, %v856_v52  ;;  %v1029_v54 = vld [vmem:[%s1113_s24 + $0xd4] sm:$0xf]  ;;  %v928_v55 = vld [vmem:[%s1113_s24 + $0xd8] sm:$0xf0]  ;;  %v846_v56 = vld [vmem:[%s1113_s24 + $0x30] sm:$0xf] }
  0x19   : > { %v1010_v57 = vld [vmem:[%s1113_s24 + $0x34] sm:$0xf0]  ;;  %v931_v58 = vor.u32 %v1029_v54, %v928_v55  ;;  %v910_v59 = vld [vmem:[%s1113_s24 + $0xb0] sm:$0xf]  ;;  %v1013_v63 = vld [vmem:[%s1113_s24 + $0x54] sm:$0xf] }
  0x1a   : > { %v1026_v60 = vld [vmem:[%s1113_s24 + $0xb4] sm:$0xf0]  ;;  %v847_v61 = vor.u32 %v1010_v57, %v846_v56  ;;  %v864_v0 = vld [vmem:[%s1113_s24 + $0x58] sm:$0xf0]  ;;  %v1031_v2 = vld [vmem:[%s1113_s24 + $0xe4] sm:$0xf] }
  0x1b   : > { %v911_v62 = vor.u32 %v1026_v60, %v910_v59  ;;  %v867_v1 = vor.u32 %v1013_v63, %v864_v0  ;;  %v936_v3 = vld [vmem:[%s1113_s24 + $0xe8] sm:$0xf0]  ;;  %v854_v4 = vld [vmem:[%s1113_s24 + $0x40] sm:$0xf]  ;;  %v1012_v5 = vld [vmem:[%s1113_s24 + $0x44] sm:$0xf0] }
  0x1c   : > { %483 = vmatpush.bf16.msra.mxu0 %v1038_v11  ;;  %1048 = vmatpush.bf16.msra.mxu2 %v1038_v11  ;;  %v939_v6 = vor.u32 %v1031_v2, %v936_v3  ;;  %v918_v7 = vld [vmem:[%s1113_s24 + $0xc0] sm:$0xf]  ;;  %v1028_v8 = vld [vmem:[%s1113_s24 + $0xc4] sm:$0xf0]  ;;  %v855_v9 = vor.u32 %v1012_v5, %v854_v4  ;;  %v1015_v11 = vld [vmem:[%s1113_s24 + $0x64] sm:$0xf] }
  0x1d   : > { %v919_v10 = vor.u32 %v1028_v8, %v918_v7  ;;  %v1033_v14 = vld [vmem:[%s1113_s24 + $0xf4] sm:$0xf]  ;;  %v1014_v17 = vld [vmem:[%s1113_s24 + $0x54] sm:$0xf0]  ;;  %v880_v24 = vld [vmem:[%s1113_s24 + $0x78] sm:$0xf0] }
  0x1e   : > { %v1030_v20 = vld [vmem:[%s1113_s24 + $0xd4] sm:$0xf0]  ;;  %v1017_v23 = vld [vmem:[%s1113_s24 + $0x74] sm:$0xf]  ;;  %v1016_v27 = vld [vmem:[%s1113_s24 + $0x64] sm:$0xf0] }
  0x1f   : > { %v934_v28 = vld [vmem:[%s1113_s24 + $0xe0] sm:$0xf]  ;;  %v1019_v32 = vld [vmem:[%s1113_s24 + $0x84] sm:$0xf]  ;;  %v888_v33 = vld [vmem:[%s1113_s24 + $0x88] sm:$0xf0] }
  0x20   : > { %484 = vmatpush.bf16.msra.mxu0 %v1037_v12  ;;  %1049 = vmatpush.bf16.msra.mxu2 %v1037_v12  ;;  %v872_v12 = vld [vmem:[%s1113_s24 + $0x68] sm:$0xf0]  ;;  %v878_v36 = vld [vmem:[%s1113_s24 + $0x70] sm:$0xf]  ;;  %v1034_v39 = vld [vmem:[%s1113_s24 + $0xf4] sm:$0xf0] }
  0x21   : > { %985 = vmatmul.msk.bf16.gmra.mxu1 %vm430_vm0, %v835_v15  ;;  %v875_v13 = vor.u32 %v1015_v11, %v872_v12  ;;  %v944_v15 = vld [vmem:[%s1113_s24 + $0xf8] sm:$0xf0]  ;;  %v1216_v44 = vld [vmem:[%s1331_s2] ss:$0 sm:$0xff] }
  0x22   : > { %994 = vmatmul.msk.bf16.gmra.mxu3 %vm430_vm0, %v907_v22  ;;  %v947_v18 = vor.u32 %v1033_v14, %v944_v15 }
  0x24   : > { %485 = vmatpush.bf16.msra.mxu0 %v1036_v16  ;;  %1050 = vmatpush.bf16.msra.mxu2 %v1036_v16  ;;  %v862_v16 = vld [vmem:[%s1113_s24 + $0x50] sm:$0xf] }
  0x25   : > { %v863_v21 = vor.u32 %v1014_v17, %v862_v16 }
  0x28   : > { %486 = vmatpush.bf16.msra.mxu0 %v1035_v19  ;;  %1051 = vmatpush.bf16.msra.mxu2 %v1035_v19  ;;  %v926_v19 = vld [vmem:[%s1113_s24 + $0xd0] sm:$0xf] }
  0x29   : > { %v927_v22 = vor.u32 %v1030_v20, %v926_v19 }
  0x2b   : > { %487 = vmatmul.bf16.vlgmr.msra.gmra.mxu0 %v823_v25  ;;  %527 = vmatmul.bf16.vlgmr.msra.gmra.mxu2 %v887_v26  ;;  %v883_v25 = vor.u32 %v1017_v23, %v880_v24  ;;  %v870_v26 = vld [vmem:[%s1113_s24 + $0x60] sm:$0xf] }
  0x2c   : > { %v871_v30 = vor.u32 %v1016_v27, %v870_v26 }
  0x31   : > { %986 = vmatmul.msk.bf16.gmra.mxu1 %vm430_vm0, %v843_v29  ;;  %v1032_v29 = vld [vmem:[%s1113_s24 + $0xe4] sm:$0xf0] }
  0x32   : > { %995 = vmatmul.msk.bf16.gmra.mxu3 %vm430_vm0, %v915_v34  ;;  %v935_v31 = vor.u32 %v1032_v29, %v934_v28  ;;  %v891_v34 = vor.u32 %v1019_v32, %v888_v33 }
  0x3b   : > { %492 = vmatmul.bf16.gmra.mxu0 %v831_v37  ;;  %532 = vmatmul.bf16.gmra.mxu2 %v895_v38  ;;  %v1018_v37 = vld [vmem:[%s1113_s24 + $0x74] sm:$0xf0]  ;;  %v942_v38 = vld [vmem:[%s1113_s24 + $0xf0] sm:$0xf] }
  0x3c   : > { %v879_v40 = vor.u32 %v1018_v37, %v878_v36 }
  0x41   : > { %987 = vmatmul.msk.bf16.gmra.mxu1 %vm430_vm0, %v851_v41  ;;  %v943_v41 = vor.u32 %v1034_v39, %v942_v38 }
  0x42   : > { %996 = vmatmul.msk.bf16.gmra.mxu3 %vm430_vm0, %v923_v46 }
  0x4b   : > { %497 = vmatmul.bf16.gmra.mxu0 %v839_v49  ;;  %537 = vmatmul.bf16.gmra.mxu2 %v903_v50 }
  0x51   : > { %988 = vmatmul.msk.bf16.gmra.mxu1 %vm430_vm0, %v859_v53 }
  0x52   : > { %997 = vmatmul.msk.bf16.gmra.mxu3 %vm430_vm0, %v931_v58 }
  0x5b   : > { %502 = vmatmul.bf16.gmra.mxu0 %v847_v61  ;;  %542 = vmatmul.bf16.gmra.mxu2 %v911_v62 }
  0x61   : > { %989 = vmatmul.msk.bf16.gmra.mxu1 %vm430_vm0, %v867_v1 }
  0x62   : > { %998 = vmatmul.msk.bf16.gmra.mxu3 %vm430_vm0, %v939_v6 }
  0x6b   : > { %507 = vmatmul.bf16.gmra.mxu0 %v855_v9  ;;  %547 = vmatmul.bf16.gmra.mxu2 %v919_v10 }
  0x71   : > { %990 = vmatmul.msk.bf16.gmra.mxu1 %vm430_vm0, %v875_v13 }
  0x72   : > { %999 = vmatmul.msk.bf16.gmra.mxu3 %vm430_vm0, %v947_v18 }
  0x7b   : > { %512 = vmatmul.bf16.gmra.mxu0 %v863_v21  ;;  %552 = vmatmul.bf16.gmra.mxu2 %v927_v22 }
  0x81   : > { %991 = vmatmul.msk.bf16.gmra.mxu1 %vm430_vm0, %v883_v25 }
  0x8b   : > { %517 = vmatmul.bf16.gmra.mxu0 %v871_v30  ;;  %557 = vmatmul.bf16.gmra.mxu2 %v935_v31 }
  0x8e   : > { %v577_v35 = vpop.f32.mrf.mxu1 }
  0x91   : > { %992 = vmatmul.msk.bf16.gmra.mxu1 %vm430_vm0, %v891_v34 }
  0x95   : > { %v622_v45 = vpop.f32.mrf.mxu3 }
  0x96   : > { %v579_v42 = vpop.f32.mrf.mxu1 }
  0x9b   : > { %522 = vmatmul.bf16.gmra.mxu0 %v879_v40  ;;  %562 = vmatmul.bf16.gmra.mxu2 %v943_v41 }
  0x9d   : > { %v624_v56 = vpop.f32.mrf.mxu3 }
  0x9e   : > { %v582_v43 = vpop.f32.mrf.mxu1 }
  0xa5   : > { %v627_v1 = vpop.f32.mrf.mxu3 }
  0xa6   : > { %v584_v48 = vpop.f32.mrf.mxu1 }
  0xa8   : > { %v488_v46 = vpop.f32.mrf.mxu0 }
  0xa9   : > { %v489_v47 = vadd.f32 %v1216_v44, %v488_v46 }
  0xab   : > { %v578_v49 = vadd.f32 %v577_v35, %v489_v47 }
  0xad   : > { %v657_v50 = vmax.f32 %v578_v49, 0.0  ;;  %v629_v13 = vpop.f32.mrf.mxu3 }
  0xae   : > { %v1225_v52 = vpop.f32.mrf.mxu2  ;;  %v587_v55 = vpop.f32.mrf.mxu1 }
  0xaf   : > { %v689_v51 = vpack.c.bf16 %v657_v50, %v657_v50 }
  0xb0   : > { %v490_v53 = vpop.f32.mrf.mxu0 }
  0xb1   : > { %722 = vst.msk [vmem:[%s1223_s16] sm:$0xf] %vm721_vm1, %v689_v51  ;;  %v491_v54 = vadd.f32 %v1216_v44, %v490_v53 }
  0xb3   : > { %v580_v57 = vadd.f32 %v579_v42, %v491_v54 }
  0xb5   : > { %v658_v58 = vmax.f32 %v580_v57, 0.0  ;;  %v632_v28 = vpop.f32.mrf.mxu3 }
  0xb6   : > { %v1230_v60 = vpop.f32.mrf.mxu2  ;;  %v589_v63 = vpop.f32.mrf.mxu1 }
  0xb7   : > { %v690_v59 = vpack.c.bf16 %v658_v58, %v658_v58 }
  0xb8   : > { %v493_v61 = vpop.f32.mrf.mxu0 }
  0xb9   : > { %723 = vst.msk [vmem:[%s1223_s16 + $0x4] sm:$0xf] %vm721_vm1, %v690_v59  ;;  %v494_v62 = vadd.f32 %v1216_v44, %v493_v61 }
  0xbb   : > { %v583_v0 = vadd.f32 %v582_v43, %v494_v62 }
  0xbd   : > { %v659_v2 = vmax.f32 %v583_v0, 0.0 }
  0xbe   : > { %v533_v4 = vpop.f32.mrf.mxu2  ;;  %v592_v8 = vpop.f32.mrf.mxu1 }
  0xbf   : > { %v691_v3 = vpack.c.bf16 %v659_v2, %v659_v2  ;;  %v534_v5 = vadd.f32 %v1216_v44, %v533_v4 }
  0xc0   : > { %v495_v6 = vpop.f32.mrf.mxu0 }
  0xc1   : > { %724 = vst.msk [vmem:[%s1223_s16 + $0x8] sm:$0xf] %vm721_vm1, %v691_v3  ;;  %v496_v7 = vadd.f32 %v1216_v44, %v495_v6  ;;  %v623_v9 = vadd.f32 %v622_v45, %v534_v5  ;;  %v634_v45 = vpop.f32.mrf.mxu3 }
  0xc3   : > { %v585_v10 = vadd.f32 %v584_v48, %v496_v7  ;;  %v675_v11 = vmax.f32 %v623_v9, 0.0 }
  0xc5   : > { %v660_v12 = vmax.f32 %v585_v10, 0.0  ;;  %v707_v14 = vpack.c.bf16 %v675_v11, %v675_v11 }
  0xc6   : > { %v535_v16 = vpop.f32.mrf.mxu2  ;;  %v594_v20 = vpop.f32.mrf.mxu1 }
  0xc7   : > { %v692_v15 = vpack.c.bf16 %v660_v12, %v660_v12  ;;  %740 = vst.msk [vmem:[%s1223_s16 + $0x48] sm:$0xf] %vm721_vm1, %v707_v14  ;;  %v536_v17 = vadd.f32 %v1216_v44, %v535_v16 }
  0xc8   : > { %v498_v18 = vpop.f32.mrf.mxu0 }
  0xc9   : > { %725 = vst.msk [vmem:[%s1223_s16 + $0xc] sm:$0xf] %vm721_vm1, %v692_v15  ;;  %v499_v19 = vadd.f32 %v1216_v44, %v498_v18  ;;  %v625_v21 = vadd.f32 %v624_v56, %v536_v17  ;;  %v637_v61 = vpop.f32.mrf.mxu3 }
  0xcb   : > { %v588_v22 = vadd.f32 %v587_v55, %v499_v19  ;;  %v676_v23 = vmax.f32 %v625_v21, 0.0 }
  0xcd   : > { %v661_v24 = vmax.f32 %v588_v22, 0.0  ;;  %v708_v25 = vpack.c.bf16 %v676_v23, %v676_v23 }
  0xce   : > { %v538_v27 = vpop.f32.mrf.mxu2  ;;  %v597_v32 = vpop.f32.mrf.mxu1 }
  0xcf   : > { %v693_v26 = vpack.c.bf16 %v661_v24, %v661_v24  ;;  %741 = vst.msk [vmem:[%s1223_s16 + $0x4c] sm:$0xf] %vm721_vm1, %v708_v25  ;;  %v539_v29 = vadd.f32 %v1216_v44, %v538_v27 }
  0xd0   : > { %v500_v30 = vpop.f32.mrf.mxu0 }
  0xd1   : > { %726 = vst.msk [vmem:[%s1223_s16 + $0x10] sm:$0xf] %vm721_vm1, %v693_v26  ;;  %v501_v31 = vadd.f32 %v1216_v44, %v500_v30  ;;  %v628_v33 = vadd.f32 %v627_v1, %v539_v29  ;;  %v639_v11 = vpop.f32.mrf.mxu3 }
  0xd3   : > { %v590_v34 = vadd.f32 %v589_v63, %v501_v31  ;;  %v677_v35 = vmax.f32 %v628_v33, 0.0 }
  0xd5   : > { %v662_v36 = vmax.f32 %v590_v34, 0.0  ;;  %v709_v37 = vpack.c.bf16 %v677_v35, %v677_v35 }
  0xd6   : > { %v540_v39 = vpop.f32.mrf.mxu2  ;;  %v599_v43 = vpop.f32.mrf.mxu1 }
  0xd7   : > { %v694_v38 = vpack.c.bf16 %v662_v36, %v662_v36  ;;  %742 = vst.msk [vmem:[%s1223_s16 + $0x50] sm:$0xf] %vm721_vm1, %v709_v37  ;;  %v541_v40 = vadd.f32 %v1216_v44, %v540_v39 }
  0xd8   : > { %v503_v41 = vpop.f32.mrf.mxu0 }
  0xd9   : > { %727 = vst.msk [vmem:[%s1223_s16 + $0x14] sm:$0xf] %vm721_vm1, %v694_v38  ;;  %v504_v42 = vadd.f32 %v1216_v44, %v503_v41  ;;  %v630_v46 = vadd.f32 %v629_v13, %v541_v40  ;;  %v642_v26 = vpop.f32.mrf.mxu3 }
  0xdb   : > { %v593_v47 = vadd.f32 %v592_v8, %v504_v42  ;;  %v678_v48 = vmax.f32 %v630_v46, 0.0 }
  0xdd   : > { %v663_v49 = vmax.f32 %v593_v47, 0.0  ;;  %v710_v50 = vpack.c.bf16 %v678_v48, %v678_v48 }
  0xde   : > { %v543_v53 = vpop.f32.mrf.mxu2  ;;  %v602_v57 = vpop.f32.mrf.mxu1 }
  0xdf   : > { %v695_v51 = vpack.c.bf16 %v663_v49, %v663_v49  ;;  %743 = vst.msk [vmem:[%s1223_s16 + $0x54] sm:$0xf] %vm721_vm1, %v710_v50  ;;  %v544_v54 = vadd.f32 %v1216_v44, %v543_v53 }
  0xe0   : > { %v505_v55 = vpop.f32.mrf.mxu0 }
  0xe1   : > { %728 = vst.msk [vmem:[%s1223_s16 + $0x18] sm:$0xf] %vm721_vm1, %v695_v51  ;;  %v506_v56 = vadd.f32 %v1216_v44, %v505_v55  ;;  %v633_v58 = vadd.f32 %v632_v28, %v544_v54  ;;  %v644_v42 = vpop.f32.mrf.mxu3 }
  0xe3   : > { %v595_v59 = vadd.f32 %v594_v20, %v506_v56  ;;  %v679_v62 = vmax.f32 %v633_v58, 0.0 }
  0xe5   : > { %v664_v63 = vmax.f32 %v595_v59, 0.0  ;;  %v711_v0 = vpack.c.bf16 %v679_v62, %v679_v62 }
  0xe6   : > { %v545_v2 = vpop.f32.mrf.mxu2  ;;  %v604_v6 = vpop.f32.mrf.mxu1 }
  0xe7   : > { %v696_v1 = vpack.c.bf16 %v664_v63, %v664_v63  ;;  %744 = vst.msk [vmem:[%s1223_s16 + $0x58] sm:$0xf] %vm721_vm1, %v711_v0  ;;  %v546_v3 = vadd.f32 %v1216_v44, %v545_v2 }
  0xe8   : > { %v508_v4 = vpop.f32.mrf.mxu0 }
  0xe9   : > { %729 = vst.msk [vmem:[%s1223_s16 + $0x1c] sm:$0xf] %vm721_vm1, %v696_v1  ;;  %v509_v5 = vadd.f32 %v1216_v44, %v508_v4  ;;  %v635_v7 = vadd.f32 %v634_v45, %v546_v3  ;;  %v647_v58 = vpop.f32.mrf.mxu3  ;;  %v529_v1 = vadd.f32 %v1216_v44, %v1225_v52 }
  0xeb   : > { %v598_v8 = vadd.f32 %v597_v32, %v509_v5  ;;  %v680_v9 = vmax.f32 %v635_v7, 0.0 }
  0xed   : > { %v665_v10 = vmax.f32 %v598_v8, 0.0  ;;  %v712_v12 = vpack.c.bf16 %v680_v9, %v680_v9 }
  0xee   : > { %v548_v14 = vpop.f32.mrf.mxu2  ;;  %v607_v18 = vpop.f32.mrf.mxu1 }
  0xef   : > { %v697_v13 = vpack.c.bf16 %v665_v10, %v665_v10  ;;  %745 = vst.msk [vmem:[%s1223_s16 + $0x5c] sm:$0xf] %vm721_vm1, %v712_v12  ;;  %v549_v15 = vadd.f32 %v1216_v44, %v548_v14 }
  0xf0   : > { %v510_v16 = vpop.f32.mrf.mxu0 }
  0xf1   : > { %730 = vst.msk [vmem:[%s1223_s16 + $0x20] sm:$0xf] %vm721_vm1, %v697_v13  ;;  %v511_v17 = vadd.f32 %v1216_v44, %v510_v16  ;;  %v638_v19 = vadd.f32 %v637_v61, %v549_v15  ;;  %v649_v52 = vpop.f32.mrf.mxu3  ;;  %v531_v16 = vadd.f32 %v1216_v44, %v1230_v60 }
  0xf3   : > { %v600_v20 = vadd.f32 %v599_v43, %v511_v17  ;;  %v681_v21 = vmax.f32 %v638_v19, 0.0 }
  0xf5   : > { %v666_v22 = vmax.f32 %v600_v20, 0.0  ;;  %v713_v23 = vpack.c.bf16 %v681_v21, %v681_v21 }
  0xf6   : > { %v550_v25 = vpop.f32.mrf.mxu2  ;;  %v609_v30 = vpop.f32.mrf.mxu1 }
  0xf7   : > { %v698_v24 = vpack.c.bf16 %v666_v22, %v666_v22  ;;  %746 = vst.msk [vmem:[%s1223_s16 + $0x60] sm:$0xf] %vm721_vm1, %v713_v23  ;;  %v551_v27 = vadd.f32 %v1216_v44, %v550_v25 }
  0xf8   : > { %v513_v28 = vpop.f32.mrf.mxu0 }
  0xf9   : > { %731 = vst.msk [vmem:[%s1223_s16 + $0x24] sm:$0xf] %vm721_vm1, %v698_v24  ;;  %v514_v29 = vadd.f32 %v1216_v44, %v513_v28  ;;  %v640_v31 = vadd.f32 %v639_v11, %v551_v27 }
  0xfb   : > { %v603_v32 = vadd.f32 %v602_v57, %v514_v29  ;;  %v682_v33 = vmax.f32 %v640_v31, 0.0  ;;  %v652_v29 = vpop.f32.mrf.mxu3 }
  0xfd   : > { %v667_v34 = vmax.f32 %v603_v32, 0.0  ;;  %v714_v35 = vpack.c.bf16 %v682_v33, %v682_v33 }
  0xfe   : > { %v553_v37 = vpop.f32.mrf.mxu2  ;;  %v612_v41 = vpop.f32.mrf.mxu1 }
  0xff   : > { %v699_v36 = vpack.c.bf16 %v667_v34, %v667_v34  ;;  %747 = vst.msk [vmem:[%s1223_s16 + $0x64] sm:$0xf] %vm721_vm1, %v714_v35  ;;  %v554_v38 = vadd.f32 %v1216_v44, %v553_v37 }
 0x100   : > { %v515_v39 = vpop.f32.mrf.mxu0 }
 0x101   : > { %732 = vst.msk [vmem:[%s1223_s16 + $0x28] sm:$0xf] %vm721_vm1, %v699_v36  ;;  %v516_v40 = vadd.f32 %v1216_v44, %v515_v39  ;;  %v643_v43 = vadd.f32 %v642_v26, %v554_v38 }
 0x103   : > { %v605_v45 = vadd.f32 %v604_v6, %v516_v40  ;;  %v683_v46 = vmax.f32 %v643_v43, 0.0 }
 0x105   : > { %v668_v47 = vmax.f32 %v605_v45, 0.0  ;;  %v715_v48 = vpack.c.bf16 %v683_v46, %v683_v46 }
 0x106   : > { %v555_v50 = vpop.f32.mrf.mxu2  ;;  %v614_v55 = vpop.f32.mrf.mxu1 }
 0x107   : > { %v700_v49 = vpack.c.bf16 %v668_v47, %v668_v47  ;;  %748 = vst.msk [vmem:[%s1223_s16 + $0x68] sm:$0xf] %vm721_vm1, %v715_v48  ;;  %v556_v51 = vadd.f32 %v1216_v44, %v555_v50 }
 0x108   : > { %v518_v53 = vpop.f32.mrf.mxu0 }
 0x109   : > { %733 = vst.msk [vmem:[%s1223_s16 + $0x2c] sm:$0xf] %vm721_vm1, %v700_v49  ;;  %v519_v54 = vadd.f32 %v1216_v44, %v518_v53  ;;  %v645_v56 = vadd.f32 %v644_v42, %v556_v51  ;;  %v654_v42 = vpop.f32.mrf.mxu3 }
 0x10b   : > { %v608_v57 = vadd.f32 %v607_v18, %v519_v54  ;;  %v684_v59 = vmax.f32 %v645_v56, 0.0 }
 0x10d   : > { %v669_v61 = vmax.f32 %v608_v57, 0.0  ;;  %v716_v62 = vpack.c.bf16 %v684_v59, %v684_v59 }
 0x10e   : > { %v558_v0 = vpop.f32.mrf.mxu2  ;;  %v617_v5 = vpop.f32.mrf.mxu1 }
 0x10f   : > { %v701_v63 = vpack.c.bf16 %v669_v61, %v669_v61  ;;  %749 = vst.msk [vmem:[%s1223_s16 + $0x6c] sm:$0xf] %vm721_vm1, %v716_v62  ;;  %v559_v2 = vadd.f32 %v1216_v44, %v558_v0  ;;  %v618_v7 = vadd.f32 %v617_v5, %v529_v1 }
 0x110   : > { %v520_v3 = vpop.f32.mrf.mxu0 }
 0x111   : > { %734 = vst.msk [vmem:[%s1223_s16 + $0x30] sm:$0xf] %vm721_vm1, %v701_v63  ;;  %v521_v4 = vadd.f32 %v1216_v44, %v520_v3  ;;  %v648_v6 = vadd.f32 %v647_v58, %v559_v2  ;;  %v673_v10 = vmax.f32 %v618_v7, 0.0 }
 0x113   : > { %v610_v8 = vadd.f32 %v609_v30, %v521_v4  ;;  %v685_v9 = vmax.f32 %v648_v6, 0.0  ;;  %v705_v13 = vpack.c.bf16 %v673_v10, %v673_v10 }
 0x115   : > { %v670_v11 = vmax.f32 %v610_v8, 0.0  ;;  %v717_v12 = vpack.c.bf16 %v685_v9, %v685_v9  ;;  %738 = vst.msk [vmem:[%s1223_s16 + $0x40] sm:$0xf] %vm721_vm1, %v705_v13 }
 0x116   : > { %v560_v15 = vpop.f32.mrf.mxu2  ;;  %v619_v20 = vpop.f32.mrf.mxu1 }
 0x117   : > { %v702_v14 = vpack.c.bf16 %v670_v11, %v670_v11  ;;  %750 = vst.msk [vmem:[%s1223_s16 + $0x70] sm:$0xf] %vm721_vm1, %v717_v12  ;;  %v561_v17 = vadd.f32 %v1216_v44, %v560_v15  ;;  %v620_v22 = vadd.f32 %v619_v20, %v531_v16 }
 0x118   : > { %v523_v18 = vpop.f32.mrf.mxu0 }
 0x119   : > { %735 = vst.msk [vmem:[%s1223_s16 + $0x34] sm:$0xf] %vm721_vm1, %v702_v14  ;;  %v524_v19 = vadd.f32 %v1216_v44, %v523_v18  ;;  %v650_v21 = vadd.f32 %v649_v52, %v561_v17  ;;  %v674_v60 = vmax.f32 %v620_v22, 0.0 }
 0x11b   : > { %v613_v23 = vadd.f32 %v612_v41, %v524_v19  ;;  %v686_v24 = vmax.f32 %v650_v21, 0.0  ;;  %v706_v27 = vpack.c.bf16 %v674_v60, %v674_v60 }
 0x11d   : > { %v671_v25 = vmax.f32 %v613_v23, 0.0  ;;  %v718_v26 = vpack.c.bf16 %v686_v24, %v686_v24  ;;  %739 = vst.msk [vmem:[%s1223_s16 + $0x44] sm:$0xf] %vm721_vm1, %v706_v27 }
 0x11e   : > { %v563_v30 = vpop.f32.mrf.mxu2 }
 0x11f   : > { %v703_v28 = vpack.c.bf16 %v671_v25, %v671_v25  ;;  %751 = vst.msk [vmem:[%s1223_s16 + $0x74] sm:$0xf] %vm721_vm1, %v718_v26  ;;  %v564_v31 = vadd.f32 %v1216_v44, %v563_v30 }
 0x120   : > { %v525_v32 = vpop.f32.mrf.mxu0 }
 0x121   : > { %736 = vst.msk [vmem:[%s1223_s16 + $0x38] sm:$0xf] %vm721_vm1, %v703_v28  ;;  %v526_v33 = vadd.f32 %v1216_v44, %v525_v32  ;;  %v653_v34 = vadd.f32 %v652_v29, %v564_v31 }
 0x123   : > { %v615_v35 = vadd.f32 %v614_v55, %v526_v33  ;;  %v687_v36 = vmax.f32 %v653_v34, 0.0 }
 0x125   : > { %v672_v37 = vmax.f32 %v615_v35, 0.0  ;;  %v719_v38 = vpack.c.bf16 %v687_v36, %v687_v36 }
 0x126   : > { %v565_v40 = vpop.f32.mrf.mxu2 }
 0x127   : > { %v704_v39 = vpack.c.bf16 %v672_v37, %v672_v37  ;;  %752 = vst.msk [vmem:[%s1223_s16 + $0x78] sm:$0xf] %vm721_vm1, %v719_v38  ;;  %v566_v41 = vadd.f32 %v1216_v44, %v565_v40 }
 0x129   : > { %737 = vst.msk [vmem:[%s1223_s16 + $0x3c] sm:$0xf] %vm721_vm1, %v704_v39  ;;  %v655_v43 = vadd.f32 %v654_v42, %v566_v41 }
 0x12b   : > { %v688_v45 = vmax.f32 %v655_v43, 0.0 }
 0x12d   : > { %v720_v46 = vpack.c.bf16 %v688_v45, %v688_v45 }
 0x12f   : > { %753 = vst.msk [vmem:[%s1223_s16 + $0x7c] sm:$0xf] %vm721_vm1, %v720_v46 }
 0x130 PF: > { %s13_s12 = sadd.s32 1, %s1068_s12  }
 0x131   : > { %p10_p4 = scmp.ge.s32.totalorder %s13_s12, 4  }
 0x133   :  { %12 = sbr.rel (!%p10_p4) target bundleno = 1 (0x1), region = 62 }

// kernel: two_heads_cityscapes_forward.10
= control target key start
LH: loop header
LB: loop body
LE: loop exit
PB: predicated region body
PF: predicated region fallthrough
CT: control target
= control target key end

     0   :  { %s663_s12 = smov 0   ;;  %s769_s0 = inlined_call_operand.vmem [shape: bf16[128,216], index: 0, kind: input, shape index: {}]   ;;  %s770_s1 = inlined_call_operand.vmem [shape: bf16[216,32], index: 1, kind: input, shape index: {}]   ;;  %s771_s2 = inlined_call_operand.vmem [shape: f32[1,32], index: 2, kind: input, shape index: {}]   ;;  %s772_s3 = inlined_call_operand.vmem [shape: bf16[128,32], index: 3, kind: output, shape index: {}]  }
   0x1 LB: > { %s490_s13 = sadd.s32 4294967295, %s641_s12   ;;  %p494_p0 = scmp.ge.s32.totalorder %s641_s12, 1  ;;  %s641_s12 = sphi %s663_s12, %s13_s12  }
   0x2   : > { %p139_p1 = scmp.lt.s32.totalorder %s641_s12, 3 }
   0x4   : > { %p140_p2 = pnand %p494_p0, %p139_p1 }
   0x5   : > { %s495_s20 = sshll.u32 (!%p140_p2), %s490_s13, 3 }
   0x6   : > { %143 = sbr.rel (%p140_p2) target bundleno = 219 (0xdb), region = 32  ;;  %p165_p3 = scmp.lt.s32.totalorder (!%p140_p2), %s495_s20, 15 }
   0xb   : > { %v606_v0 = vld [vmem:[%s770_s1 + $0x38] sm:$0xff]  ;;  %v212_v1 = vld [vmem:[%s770_s1 + $0x68] sm:$0xf]  ;;  %vm347_vm0 = vcmask 1043456   ;;  %v605_v3 = vld [vmem:[%s770_s1 + $0x30] sm:$0xff]  ;;  %s774_s20 = smov (!%p165_p3, %s495_s20), 15 }
   0xc   : > { %v306_v2 = vunpack.c.l.b16 %v212_v1  ;;  %351 = vmatpush.bf16.msra.mxu0 %v606_v0  ;;  %612 = vmatpush.bf16.msra.mxu2 %v606_v0  ;;  %v611_v6 = vld [vmem:[%s770_s1 + $0x60] sm:$0xff]  ;;  %v604_v7 = vld [vmem:[%s770_s1 + $0x28] sm:$0xff]  ;;  %v610_v8 = vld [vmem:[%s770_s1 + $0x58] sm:$0xff]  ;;  %s590_s6 = sshll.u32 %s774_s20, 3  ;;  %vm334_vm1 = vcmask 719872   ;;  %s499_s24 = sshll.u32 %s774_s20, 2 }
   0xd   : > { %v603_v9 = vld [vmem:[%s770_s1 + $0x20] sm:$0xff]  ;;  %v609_v10 = vld [vmem:[%s770_s1 + $0x50] sm:$0xff]  ;;  %v602_v11 = vld [vmem:[%s770_s1 + $0x18] sm:$0xff]  ;;  %s710_s14 = scalar_lea.vmem %s769_s0, %s590_s6  ;;  %s748_s27 = scalar_lea.vmem %s772_s3, %s499_s24  ;;  %vm425_vm2 = vcmask 257024  }
   0xe   : > { %v320_v4 = vpack.c.b16 %v306_v2, %v306_v2  ;;  %v608_v12 = vld [vmem:[%s770_s1 + $0x48] sm:$0xff]  ;;  %v601_v13 = vld [vmem:[%s770_s1 + $0x10] sm:$0xff]  ;;  %v607_v14 = vld [vmem:[%s770_s1 + $0x40] sm:$0xff] }
   0xf   : > { %v600_v15 = vld [vmem:[%s770_s1 + $0x8] sm:$0xff]  ;;  %v593_v16 = vld [vmem:[%s710_s14 + $0x14] sm:$0xf]  ;;  %v512_v17 = vld [vmem:[%s710_s14 + $0x18] sm:$0xf0] }
  0x10   : > { %v349_v5 = vsel %vm347_vm0, %v320_v4, 0  ;;  %352 = vmatpush.bf16.msra.mxu0 %v605_v3  ;;  %613 = vmatpush.bf16.msra.mxu2 %v605_v3  ;;  %v591_v18 = vld [vmem:[%s710_s14 + $0x4] sm:$0xf]  ;;  %v504_v19 = vld [vmem:[%s710_s14 + $0x8] sm:$0xf0]  ;;  %v515_v20 = vor.u32 %v593_v16, %v512_v17 }
  0x11   : > { %620 = vmatpush.bf16.msra.mxu3 %v349_v5  ;;  %382 = vmatpush.bf16.msra.mxu1 %v349_v5  ;;  %v599_v21 = vld [vmem:[%s770_s1] sm:$0xff]  ;;  %v592_v23 = vld [vmem:[%s710_s14 + $0x4] sm:$0xf0]  ;;  %v507_v24 = vor.u32 %v591_v18, %v504_v19  ;;  %v520_v30 = vld [vmem:[%s710_s14 + $0x28] sm:$0xf0] }
  0x12   : > { %v502_v22 = vld [vmem:[%s710_s14] sm:$0xf]  ;;  %v596_v26 = vld [vmem:[%s710_s14 + $0x24] sm:$0xf0]  ;;  %v595_v29 = vld [vmem:[%s710_s14 + $0x24] sm:$0xf] }
  0x13   : > { %v518_v25 = vld [vmem:[%s710_s14 + $0x20] sm:$0xf]  ;;  %v503_v27 = vor.u32 %v592_v23, %v502_v22  ;;  %v523_v31 = vor.u32 %v595_v29, %v520_v30  ;;  %v510_v32 = vld [vmem:[%s710_s14 + $0x10] sm:$0xf]  ;;  %v594_v33 = vld [vmem:[%s710_s14 + $0x14] sm:$0xf0] }
  0x14   : > { %353 = vmatpush.bf16.msra.mxu0 %v604_v7  ;;  %614 = vmatpush.bf16.msra.mxu2 %v604_v7  ;;  %v519_v28 = vor.u32 %v596_v26, %v518_v25  ;;  %v526_v34 = vld [vmem:[%s710_s14 + $0x30] sm:$0xf]  ;;  %v598_v35 = vld [vmem:[%s710_s14 + $0x34] sm:$0xf0]  ;;  %v511_v36 = vor.u32 %v594_v33, %v510_v32  ;;  %v597_v38 = vld [vmem:[%s710_s14 + $0x34] sm:$0xf] }
  0x15   : > { %621 = vmatpush.bf16.msra.mxu3 %v611_v6  ;;  %383 = vmatpush.bf16.msra.mxu1 %v611_v6  ;;  %v527_v37 = vor.u32 %v598_v35, %v526_v34  ;;  %v528_v39 = vld [vmem:[%s710_s14 + $0x38] sm:$0xf0]  ;;  %v634_v41 = vld [vmem:[%s771_s2] ss:$0 sm:$0xff] }
  0x16   : > { %v531_v40 = vor.u32 %v597_v38, %v528_v39 }
  0x18   : > { %354 = vmatpush.bf16.msra.mxu0 %v603_v9  ;;  %615 = vmatpush.bf16.msra.mxu2 %v603_v9 }
  0x19   : > { %622 = vmatpush.bf16.msra.mxu3 %v610_v8  ;;  %384 = vmatpush.bf16.msra.mxu1 %v610_v8 }
  0x1c   : > { %355 = vmatpush.bf16.msra.mxu0 %v602_v11  ;;  %616 = vmatpush.bf16.msra.mxu2 %v602_v11 }
  0x1d   : > { %623 = vmatpush.bf16.msra.mxu3 %v609_v10  ;;  %385 = vmatpush.bf16.msra.mxu1 %v609_v10 }
  0x20   : > { %356 = vmatpush.bf16.msra.mxu0 %v601_v13  ;;  %617 = vmatpush.bf16.msra.mxu2 %v601_v13 }
  0x21   : > { %624 = vmatpush.bf16.msra.mxu3 %v608_v12  ;;  %386 = vmatpush.bf16.msra.mxu1 %v608_v12 }
  0x24   : > { %357 = vmatpush.bf16.msra.mxu0 %v600_v15  ;;  %618 = vmatpush.bf16.msra.mxu2 %v600_v15 }
  0x25   : > { %625 = vmatpush.bf16.msra.mxu3 %v607_v14  ;;  %387 = vmatpush.bf16.msra.mxu1 %v607_v14 }
  0x28   : > { %585 = vmatmul.msk.bf16.vlgmr.msra.gmra.mxu3 %vm334_vm1, %v515_v20  ;;  %358 = vmatpush.bf16.msra.mxu0 %v599_v21 }
  0x29   : > { %584 = vmatmul.msk.bf16.vlgmr.msra.gmra.mxu1 %vm334_vm1, %v507_v24  ;;  %619 = vmatpush.bf16.msra.mxu2 %v599_v21 }
  0x2b   : > { %359 = vmatmul.bf16.vlgmr.msra.gmra.mxu0 %v503_v27 }
  0x2c   : > { %369 = vmatmul.bf16.vlgmr.msra.gmra.mxu2 %v519_v28 }
  0x38   : > { %586 = vmatmul.msk.bf16.gmra.mxu3 %vm334_vm1, %v523_v31 }
  0x3b   : > { %364 = vmatmul.bf16.gmra.mxu0 %v511_v36 }
  0x3c   : > { %374 = vmatmul.bf16.gmra.mxu2 %v527_v37 }
  0x48   : > { %587 = vmatmul.msk.bf16.gmra.mxu3 %vm334_vm1, %v531_v40 }
  0xa6   : > { %v389_v42 = vpop.f32.mrf.mxu1 }
  0xa8   : > { %v360_v43 = vpop.f32.mrf.mxu0 }
  0xa9   : > { %v361_v44 = vadd.f32 %v634_v41, %v360_v43 }
  0xab   : > { %v394_v45 = vpop.f32.mrf.mxu3  ;;  %v390_v46 = vadd.f32 %v389_v42, %v361_v44 }
  0xad   : > { %v409_v47 = vmax.f32 %v390_v46, 0.0 }
  0xae   : > { %v391_v49 = vpop.f32.mrf.mxu1 }
  0xaf   : > { %v417_v48 = vpack.c.bf16 %v409_v47, %v409_v47  ;;  %v370_v50 = vpop.f32.mrf.mxu2 }
  0xb0   : > { %v362_v51 = vpop.f32.mrf.mxu0  ;;  %v371_v56 = vadd.f32 %v634_v41, %v370_v50 }
  0xb1   : > { %v363_v52 = vadd.f32 %v634_v41, %v362_v51  ;;  %426 = vst.msk [vmem:[%s748_s27] sm:$0xf] %vm425_vm2, %v417_v48 }
  0xb3   : > { %v396_v53 = vpop.f32.mrf.mxu3  ;;  %v392_v54 = vadd.f32 %v391_v49, %v363_v52 }
  0xb5   : > { %v410_v55 = vmax.f32 %v392_v54, 0.0 }
  0xb7   : > { %v418_v57 = vpack.c.bf16 %v410_v55, %v410_v55  ;;  %v372_v60 = vpop.f32.mrf.mxu2 }
  0xb8   : > { %v365_v58 = vpop.f32.mrf.mxu0  ;;  %v373_v5 = vadd.f32 %v634_v41, %v372_v60 }
  0xb9   : > { %v366_v59 = vadd.f32 %v634_v41, %v365_v58  ;;  %427 = vst.msk [vmem:[%s748_s27 + $0x4] sm:$0xf] %vm425_vm2, %v418_v57 }
  0xbb   : > { %v399_v61 = vpop.f32.mrf.mxu3  ;;  %v395_v62 = vadd.f32 %v394_v45, %v366_v59 }
  0xbc   : > { %v400_v63 = vadd.f32 %v399_v61, %v371_v56 }
  0xbd   : > { %v411_v0 = vmax.f32 %v395_v62, 0.0 }
  0xbe   : > { %v413_v1 = vmax.f32 %v400_v63, 0.0 }
  0xbf   : > { %v419_v2 = vpack.c.bf16 %v411_v0, %v411_v0  ;;  %v375_v10 = vpop.f32.mrf.mxu2 }
  0xc0   : > { %v421_v3 = vpack.c.bf16 %v413_v1, %v413_v1  ;;  %v367_v4 = vpop.f32.mrf.mxu0  ;;  %v376_v13 = vadd.f32 %v634_v41, %v375_v10 }
  0xc1   : > { %428 = vst.msk [vmem:[%s748_s27 + $0x8] sm:$0xf] %vm425_vm2, %v419_v2  ;;  %v368_v6 = vadd.f32 %v634_v41, %v367_v4 }
  0xc2   : > { %430 = vst.msk [vmem:[%s748_s27 + $0x10] sm:$0xf] %vm425_vm2, %v421_v3 }
  0xc3   : > { %v401_v7 = vpop.f32.mrf.mxu3  ;;  %v397_v8 = vadd.f32 %v396_v53, %v368_v6 }
  0xc4   : > { %v402_v9 = vadd.f32 %v401_v7, %v373_v5 }
  0xc5   : > { %v412_v11 = vmax.f32 %v397_v8, 0.0 }
  0xc6   : > { %v414_v12 = vmax.f32 %v402_v9, 0.0 }
  0xc7   : > { %v420_v14 = vpack.c.bf16 %v412_v11, %v412_v11  ;;  %v377_v19 = vpop.f32.mrf.mxu2 }
  0xc8   : > { %v422_v15 = vpack.c.bf16 %v414_v12, %v414_v12  ;;  %v378_v21 = vadd.f32 %v634_v41, %v377_v19 }
  0xc9   : > { %429 = vst.msk [vmem:[%s748_s27 + $0xc] sm:$0xf] %vm425_vm2, %v420_v14 }
  0xca   : > { %431 = vst.msk [vmem:[%s748_s27 + $0x14] sm:$0xf] %vm425_vm2, %v422_v15 }
  0xcb   : > { %v404_v16 = vpop.f32.mrf.mxu3 }
  0xcc   : > { %v405_v17 = vadd.f32 %v404_v16, %v376_v13 }
  0xce   : > { %v415_v18 = vmax.f32 %v405_v17, 0.0 }
  0xd0   : > { %v423_v20 = vpack.c.bf16 %v415_v18, %v415_v18 }
  0xd2   : > { %432 = vst.msk [vmem:[%s748_s27 + $0x18] sm:$0xf] %vm425_vm2, %v423_v20 }
  0xd3   : > { %v406_v22 = vpop.f32.mrf.mxu3 }
  0xd4   : > { %v407_v23 = vadd.f32 %v406_v22, %v378_v21 }
  0xd6   : > { %v416_v24 = vmax.f32 %v407_v23, 0.0 }
  0xd8   : > { %v424_v25 = vpack.c.bf16 %v416_v24, %v416_v24 }
  0xda   : > { %433 = vst.msk [vmem:[%s748_s27 + $0x1c] sm:$0xf] %vm425_vm2, %v424_v25 }
  0xdb PF: > { %s13_s12 = sadd.s32 1, %s641_s12  }
  0xdc   : > { %p10_p4 = scmp.ge.s32.totalorder %s13_s12, 4  }
  0xde   :  { %12 = sbr.rel (!%p10_p4) target bundleno = 1 (0x1), region = 62 }

// kernel: two_heads_cityscapes_forward.15
= control target key start
LH: loop header
LB: loop body
LE: loop exit
PB: predicated region body
PF: predicated region fallthrough
CT: control target
= control target key end

     0   :  { %s418_s12 = smov 0   ;;  %s452_s0 = inlined_call_operand.vmem [shape: bf16[128,32], index: 0, kind: input, shape index: {}]   ;;  %s453_s1 = inlined_call_operand.vmem [shape: bf16[32,64], index: 1, kind: input, shape index: {}]   ;;  %s454_s2 = inlined_call_operand.vmem [shape: f32[1,64], index: 2, kind: input, shape index: {}]   ;;  %s455_s3 = inlined_call_operand.vmem [shape: f32[128,64], index: 3, kind: output, shape index: {}]  }
   0x1 LB: > { %s330_s13 = sadd.s32 4294967295, %s396_s12   ;;  %p334_p0 = scmp.ge.s32.totalorder %s396_s12, 1  ;;  %s396_s12 = sphi %s418_s12, %s13_s12  }
   0x2   : > { %p138_p1 = scmp.lt.s32.totalorder %s396_s12, 3 }
   0x4   : > { %p139_p2 = pnand %p334_p0, %p138_p1 }
   0x5   : > { %s335_s16 = sshll.u32 (!%p139_p2), %s330_s13, 3 }
   0x6   : > { %142 = sbr.rel (%p139_p2) target bundleno = 164 (0xa4), region = 32  ;;  %p163_p3 = scmp.lt.s32.totalorder (!%p139_p2), %s335_s16, 15 }
   0xb   : > { %v374_v0 = vld [vmem:[%s453_s1 + $0x8] sm:$0xff]  ;;  %v373_v1 = vld [vmem:[%s453_s1] sm:$0xff]  ;;  %s457_s16 = smov (!%p163_p3, %s335_s16), 15  ;;  %vm223_vm0 = vcmask 261120   ;;  %vm265_vm1 = vcmask 523264  }
   0xc   : > { %242 = vmatpush.bf16.msra.mxu0 %v374_v0  ;;  %375 = vmatpush.bf16.msra.mxu1 %v374_v0  ;;  %s336_s19 = sshll.u32 %s457_s16, 2  ;;  %s338_s23 = sshll.u32 %s457_s16, 3  ;;  %v389_v6 = vld [vmem:[%s454_s2] ss:$0 sm:$0xff] }
   0xd   : > { %376 = vmatpush.bf16.msra.mxu2 %v374_v0  ;;  %377 = vmatpush.bf16.msra.mxu3 %v374_v0  ;;  %s166_s22 = scalar_lea.vmem %s452_s0, %s336_s19  ;;  %s172_s28 = scalar_lea.vmem %s455_s3, %s338_s23 }
   0xe   : > { %v369_v2 = vld [vmem:[%s166_s22] sm:$0xff]  ;;  %v370_v3 = vld [vmem:[%s166_s22 + $0x8] sm:$0xff]  ;;  %v371_v4 = vld [vmem:[%s166_s22 + $0x10] sm:$0xff] }
   0xf   : > { %v372_v5 = vld [vmem:[%s166_s22 + $0x18] sm:$0xff] }
  0x10   : > { %243 = vmatpush.bf16.msra.mxu0 %v373_v1  ;;  %378 = vmatpush.bf16.msra.mxu1 %v373_v1 }
  0x11   : > { %379 = vmatpush.bf16.msra.mxu2 %v373_v1  ;;  %380 = vmatpush.bf16.msra.mxu3 %v373_v1 }
  0x13   : > { %363 = vmatmul.msk.bf16.vlgmr.msra.gmra.mxu0 %vm223_vm0, %v369_v2  ;;  %364 = vmatmul.msk.bf16.vlgmr.msra.gmra.mxu1 %vm223_vm0, %v370_v3 }
  0x14   : > { %365 = vmatmul.msk.bf16.vlgmr.msra.gmra.mxu2 %vm223_vm0, %v371_v4  ;;  %366 = vmatmul.msk.bf16.vlgmr.msra.gmra.mxu3 %vm223_vm0, %v372_v5 }
  0x90   : > { %v245_v7 = vpop.f32.mrf.mxu0  ;;  %v250_v8 = vpop.f32.mrf.mxu1 }
  0x91   : > { %v246_v9 = vadd.f32 %v389_v6, %v245_v7  ;;  %v251_v10 = vadd.f32 %v389_v6, %v250_v8 }
  0x93   : > { %266 = vst.msk [vmem:[%s172_s28] sm:$0xff] %vm265_vm1, %v246_v9 }
  0x94   : > { %268 = vst.msk [vmem:[%s172_s28 + $0x10] sm:$0xff] %vm265_vm1, %v251_v10 }
  0x97   : > { %v255_v11 = vpop.f32.mrf.mxu2  ;;  %v260_v12 = vpop.f32.mrf.mxu3 }
  0x98   : > { %v256_v13 = vadd.f32 %v389_v6, %v255_v11  ;;  %v261_v14 = vadd.f32 %v389_v6, %v260_v12  ;;  %v247_v15 = vpop.f32.mrf.mxu0  ;;  %v252_v16 = vpop.f32.mrf.mxu1 }
  0x99   : > { %v248_v17 = vadd.f32 %v389_v6, %v247_v15  ;;  %v253_v18 = vadd.f32 %v389_v6, %v252_v16 }
  0x9a   : > { %270 = vst.msk [vmem:[%s172_s28 + $0x20] sm:$0xff] %vm265_vm1, %v256_v13 }
  0x9b   : > { %272 = vst.msk [vmem:[%s172_s28 + $0x30] sm:$0xff] %vm265_vm1, %v261_v14 }
  0x9c   : > { %267 = vst.msk [vmem:[%s172_s28 + $0x8] sm:$0xff] %vm265_vm1, %v248_v17 }
  0x9d   : > { %269 = vst.msk [vmem:[%s172_s28 + $0x18] sm:$0xff] %vm265_vm1, %v253_v18 }
  0x9f   : > { %v257_v19 = vpop.f32.mrf.mxu2  ;;  %v262_v20 = vpop.f32.mrf.mxu3 }
  0xa0   : > { %v258_v21 = vadd.f32 %v389_v6, %v257_v19  ;;  %v263_v22 = vadd.f32 %v389_v6, %v262_v20 }
  0xa2   : > { %271 = vst.msk [vmem:[%s172_s28 + $0x28] sm:$0xff] %vm265_vm1, %v258_v21 }
  0xa3   : > { %273 = vst.msk [vmem:[%s172_s28 + $0x38] sm:$0xff] %vm265_vm1, %v263_v22 }
  0xa4 PF: > { %s13_s12 = sadd.s32 1, %s396_s12  }
  0xa5   : > { %p10_p4 = scmp.ge.s32.totalorder %s13_s12, 4  }
  0xa7   :  { %12 = sbr.rel (!%p10_p4) target bundleno = 1 (0x1), region = 62 }

// kernel: two_heads_cityscapes_forward.14
= control target key start
LH: loop header
LB: loop body
LE: loop exit
PB: predicated region body
PF: predicated region fallthrough
CT: control target
= control target key end

     0   :  { %s356_s12 = smov 0   ;;  %s385_s0 = inlined_call_operand.vmem [shape: bf16[32,48], index: 0, kind: input, shape index: {}]   ;;  %s386_s1 = inlined_call_operand.vmem [shape: bf16[48,64], index: 1, kind: input, shape index: {}]   ;;  %s387_s2 = inlined_call_operand.vmem [shape: f32[1,64], index: 2, kind: input, shape index: {}]   ;;  %s388_s3 = inlined_call_operand.vmem [shape: f32[32,64], index: 3, kind: output, shape index: {}]  }
   0x1 LB: > { %s287_s13 = sadd.s32 4294967295, %s334_s12   ;;  %p291_p0 = scmp.ge.s32.totalorder %s334_s12, 1  ;;  %s334_s12 = sphi %s356_s12, %s13_s12  }
   0x2   : > { %p138_p1 = scmp.lt.s32.totalorder %s334_s12, 3 }
   0x4   : > { %p139_p2 = pnand %p291_p0, %p138_p1 }
   0x5   : > { %s292_s16 = sshll.u32 (!%p139_p2), %s287_s13, 1 }
   0x6   : > { %142 = sbr.rel (%p139_p2) target bundleno = 160 (0xa0), region = 32  ;;  %p163_p3 = scmp.lt.s32.totalorder (!%p139_p2), %s292_s16, 3 }
   0xb   : > { %v318_v0 = vld [vmem:[%s386_s1 + $0x10] sm:$0xff]  ;;  %v317_v1 = vld [vmem:[%s386_s1 + $0x8] sm:$0xff]  ;;  %s390_s16 = smov (!%p163_p3, %s292_s16), 3  ;;  %v316_v2 = vld [vmem:[%s386_s1] sm:$0xff]  ;;  %vm210_vm0 = vcmask 392192   ;;  %vm228_vm1 = vcmask 523264  }
   0xc   : > { %219 = vmatpush.bf16.msra.mxu0 %v318_v0  ;;  %s293_s19 = sshll.u32 %s390_s16, 2  ;;  %s295_s25 = sshll.u32 %s390_s16, 3  ;;  %v327_v4 = vld [vmem:[%s387_s2] ss:$0 sm:$0xff] }
   0xd   : > { %s166_s24 = scalar_lea.vmem %s385_s0, %s293_s19  ;;  %s172_s30 = scalar_lea.vmem %s388_s3, %s295_s25 }
   0xe   : > { %v315_v3 = vld [vmem:[%s166_s24] sm:$0xff] }
  0x10   : > { %220 = vmatpush.bf16.msra.mxu0 %v317_v1 }
  0x14   : > { %221 = vmatpush.bf16.msra.mxu0 %v316_v2 }
  0x17   : > { %312 = vmatmul.msk.bf16.vlgmr.msra.gmra.mxu0 %vm210_vm0, %v315_v3 }
  0x94   : > { %v223_v5 = vpop.f32.mrf.mxu0 }
  0x95   : > { %v224_v6 = vadd.f32 %v327_v4, %v223_v5 }
  0x97   : > { %229 = vst.msk [vmem:[%s172_s30] sm:$0xff] %vm228_vm1, %v224_v6 }
  0x9c   : > { %v225_v7 = vpop.f32.mrf.mxu0 }
  0x9d   : > { %v226_v8 = vadd.f32 %v327_v4, %v225_v7 }
  0x9f   : > { %230 = vst.msk [vmem:[%s172_s30 + $0x8] sm:$0xff] %vm228_vm1, %v226_v8 }
  0xa0 PF: > { %s13_s12 = sadd.s32 1, %s334_s12  }
  0xa1   : > { %p10_p4 = scmp.ge.s32.totalorder %s13_s12, 4  }
  0xa3   :  { %12 = sbr.rel (!%p10_p4) target bundleno = 1 (0x1), region = 62 }

// kernel: two_heads_cityscapes_forward.11
= control target key start
LH: loop header
LB: loop body
LE: loop exit
PB: predicated region body
PF: predicated region fallthrough
CT: control target
= control target key end

     0   :  { %s609_s12 = smov 0   ;;  %s687_s0 = inlined_call_operand.vmem [shape: bf16[32,288], index: 0, kind: input, shape index: {}]   ;;  %s688_s1 = inlined_call_operand.vmem [shape: bf16[288,48], index: 1, kind: input, shape index: {}]   ;;  %s689_s2 = inlined_call_operand.vmem [shape: f32[1,48], index: 2, kind: input, shape index: {}]   ;;  %s690_s3 = inlined_call_operand.vmem [shape: bf16[32,48], index: 3, kind: output, shape index: {}]  }
   0x1 LB: > { %s454_s13 = sadd.s32 4294967295, %s587_s12   ;;  %p458_p0 = scmp.ge.s32.totalorder %s587_s12, 1  ;;  %s587_s12 = sphi %s609_s12, %s13_s12  }
   0x2   : > { %p139_p1 = scmp.lt.s32.totalorder %s587_s12, 3 }
   0x4   : > { %p140_p2 = pnand %p458_p0, %p139_p1 }
   0x5   : > { %s459_s18 = sshll.u32 (!%p140_p2), %s454_s13, 1 }
   0x6   : > { %143 = sbr.rel (%p140_p2) target bundleno = 188 (0xbc), region = 32  ;;  %p165_p3 = scmp.lt.s32.totalorder (!%p140_p2), %s459_s18, 3 }
   0xb   : > { %v560_v0 = vld [vmem:[%s688_s1 + $0x38] sm:$0xff]  ;;  %v559_v2 = vld [vmem:[%s688_s1 + $0x30] sm:$0xff]  ;;  %v570_v4 = vld [vmem:[%s688_s1 + $0x88] sm:$0xff]  ;;  %s692_s18 = smov (!%p165_p3, %s459_s18), 3  ;;  %vm345_vm0 = vcmask 261120   ;;  %vm395_vm1 = vcmask 388096  }
   0xc   : > { %v568_v1 = vld [vmem:[%s688_s1 + $0x78] sm:$0xff]  ;;  %349 = vmatpush.bf16.msra.mxu0 %v560_v0  ;;  %v567_v3 = vld [vmem:[%s688_s1 + $0x70] sm:$0xff]  ;;  %383 = vmatpush.bf16.msra.mxu2 %v570_v4  ;;  %v569_v5 = vld [vmem:[%s688_s1 + $0x80] sm:$0xff]  ;;  %s571_s27 = smul.u32 12, %s692_s18  ;;  %s462_s5 = sshll.u32 %s692_s18, 2 }
   0xd   : > { %363 = vmatpush.bf16.msra.mxu1 %v568_v1  ;;  %v558_v6 = vld [vmem:[%s688_s1 + $0x28] sm:$0xff]  ;;  %v557_v11 = vld [vmem:[%s688_s1 + $0x20] sm:$0xff]  ;;  %v556_v13 = vld [vmem:[%s688_s1 + $0x18] sm:$0xff]  ;;  %s175_s8 = scalar_lea.vmem %s690_s3, %s462_s5 }
   0xe   : > { %v566_v7 = vld [vmem:[%s688_s1 + $0x68] sm:$0xff]  ;;  %s169_s7 = scalar_lea.vmem %s687_s0, %s571_s27  ;;  %v565_v12 = vld [vmem:[%s688_s1 + $0x60] sm:$0xff]  ;;  %v564_v14 = vld [vmem:[%s688_s1 + $0x58] sm:$0xff] }
   0xf   : > { %v473_v8 = vld [vmem:[%s169_s7 + $0x8] sm:$0xf]  ;;  %v552_v9 = vld [vmem:[%s169_s7 + $0x10] sm:$0xf0]  ;;  %v553_v19 = vld [vmem:[%s688_s1] sm:$0xff] }
  0x10   : > { %350 = vmatpush.bf16.msra.mxu0 %v559_v2  ;;  %384 = vmatpush.bf16.msra.mxu2 %v569_v5  ;;  %v474_v10 = vor.u32 %v552_v9, %v473_v8  ;;  %v555_v15 = vld [vmem:[%s688_s1 + $0x10] sm:$0xff]  ;;  %v554_v17 = vld [vmem:[%s688_s1 + $0x8] sm:$0xff]  ;;  %v561_v20 = vld [vmem:[%s688_s1 + $0x40] sm:$0xff] }
  0x11   : > { %364 = vmatpush.bf16.msra.mxu1 %v567_v3  ;;  %v563_v16 = vld [vmem:[%s688_s1 + $0x50] sm:$0xff]  ;;  %v562_v18 = vld [vmem:[%s688_s1 + $0x48] sm:$0xff]  ;;  %v465_v21 = vld [vmem:[%s169_s7] sm:$0xf] }
  0x12   : > { %v551_v22 = vld [vmem:[%s169_s7 + $0x8] sm:$0xf0]  ;;  %v550_v23 = vld [vmem:[%s169_s7 + $0x4] sm:$0xf]  ;;  %v467_v24 = vld [vmem:[%s169_s7 + $0xc] sm:$0xf0] }
  0x13   : > { %547 = vmatmul.msk.bf16.vlgmr.msra.gmra.mxu2 %vm345_vm0, %v474_v10  ;;  %v466_v25 = vor.u32 %v551_v22, %v465_v21  ;;  %v470_v26 = vor.u32 %v550_v23, %v467_v24  ;;  %v580_v27 = vld [vmem:[%s689_s2] ss:$0 sm:$0xff] }
  0x14   : > { %351 = vmatpush.bf16.msra.mxu0 %v558_v6 }
  0x15   : > { %365 = vmatpush.bf16.msra.mxu1 %v566_v7 }
  0x18   : > { %352 = vmatpush.bf16.msra.mxu0 %v557_v11 }
  0x19   : > { %366 = vmatpush.bf16.msra.mxu1 %v565_v12 }
  0x1c   : > { %353 = vmatpush.bf16.msra.mxu0 %v556_v13 }
  0x1d   : > { %367 = vmatpush.bf16.msra.mxu1 %v564_v14 }
  0x20   : > { %354 = vmatpush.bf16.msra.mxu0 %v555_v15 }
  0x21   : > { %368 = vmatpush.bf16.msra.mxu1 %v563_v16 }
  0x24   : > { %355 = vmatpush.bf16.msra.mxu0 %v554_v17 }
  0x25   : > { %369 = vmatpush.bf16.msra.mxu1 %v562_v18 }
  0x28   : > { %356 = vmatpush.bf16.msra.mxu0 %v553_v19 }
  0x29   : > { %370 = vmatpush.bf16.msra.mxu1 %v561_v20 }
  0x2b   : > { %357 = vmatmul.bf16.vlgmr.msra.gmra.mxu0 %v466_v25 }
  0x2c   : > { %371 = vmatmul.bf16.vlgmr.msra.gmra.mxu1 %v470_v26 }
  0x96   : > { %v386_v31 = vpop.f32.mrf.mxu2 }
  0x9e   : > { %v388_v40 = vpop.f32.mrf.mxu2 }
  0xa8   : > { %v358_v28 = vpop.f32.mrf.mxu0 }
  0xa9   : > { %v372_v29 = vpop.f32.mrf.mxu1  ;;  %v359_v30 = vadd.f32 %v580_v27, %v358_v28 }
  0xab   : > { %v373_v32 = vadd.f32 %v372_v29, %v359_v30 }
  0xad   : > { %v387_v33 = vadd.f32 %v386_v31, %v373_v32 }
  0xaf   : > { %v391_v34 = vmax.f32 %v387_v33, 0.0 }
  0xb0   : > { %v360_v35 = vpop.f32.mrf.mxu0 }
  0xb1   : > { %v393_v36 = vpack.c.bf16 %v391_v34, %v391_v34  ;;  %v361_v37 = vadd.f32 %v580_v27, %v360_v35  ;;  %v374_v38 = vpop.f32.mrf.mxu1 }
  0xb3   : > { %396 = vst.msk [vmem:[%s175_s8] sm:$0xf] %vm395_vm1, %v393_v36  ;;  %v375_v39 = vadd.f32 %v374_v38, %v361_v37 }
  0xb5   : > { %v389_v41 = vadd.f32 %v388_v40, %v375_v39 }
  0xb7   : > { %v392_v42 = vmax.f32 %v389_v41, 0.0 }
  0xb9   : > { %v394_v43 = vpack.c.bf16 %v392_v42, %v392_v42 }
  0xbb   : > { %397 = vst.msk [vmem:[%s175_s8 + $0x4] sm:$0xf] %vm395_vm1, %v394_v43 }
  0xbc PF: > { %s13_s12 = sadd.s32 1, %s587_s12  }
  0xbd   : > { %p10_p4 = scmp.ge.s32.totalorder %s13_s12, 4  }
  0xbf   :  { %12 = sbr.rel (!%p10_p4) target bundleno = 1 (0x1), region = 62 }

// kernel: two_heads_cityscapes_forward.12
= control target key start
LH: loop header
LB: loop body
LE: loop exit
PB: predicated region body
PF: predicated region fallthrough
CT: control target
= control target key end

     0   :  { %vm250_vm0 = vcmask 392192   ;;  %vm308_vm1 = vcmask 519168   ;;  %s564_s1 = inlined_call_operand.vmem [shape: bf16[432,64], index: 1, kind: input, shape index: {}]   ;;  %s565_s0 = inlined_call_operand.vmem [shape: bf16[8,432], index: 0, kind: input, shape index: {}]   ;;  %s566_s2 = inlined_call_operand.vmem [shape: f32[1,64], index: 2, kind: input, shape index: {}]   ;;  %s567_s3 = inlined_call_operand.vmem [shape: bf16[8,64], index: 3, kind: output, shape index: {}]  }
   0x1   :  { %v430_v0 = vld [vmem:[%s564_s1 + $0x38] sm:$0xff]  ;;  %v429_v3 = vld [vmem:[%s564_s1 + $0x30] sm:$0xff]  ;;  %v428_v7 = vld [vmem:[%s564_s1 + $0x28] sm:$0xff] }
   0x2   :  { %v438_v1 = vld [vmem:[%s564_s1 + $0x78] sm:$0xff]  ;;  %254 = vmatpush.bf16.msra.mxu0 %v430_v0  ;;  %v437_v4 = vld [vmem:[%s564_s1 + $0x70] sm:$0xff]  ;;  %v436_v8 = vld [vmem:[%s564_s1 + $0x68] sm:$0xff] }
   0x3   :  { %v446_v2 = vld [vmem:[%s564_s1 + $0xb8] sm:$0xff]  ;;  %267 = vmatpush.bf16.msra.mxu1 %v438_v1  ;;  %v445_v5 = vld [vmem:[%s564_s1 + $0xb0] sm:$0xff]  ;;  %v444_v9 = vld [vmem:[%s564_s1 + $0xa8] sm:$0xff] }
   0x4   :  { %280 = vmatpush.bf16.msra.mxu2 %v446_v2  ;;  %v449_v6 = vld [vmem:[%s564_s1 + $0xd0] sm:$0xff]  ;;  %v448_v10 = vld [vmem:[%s564_s1 + $0xc8] sm:$0xff]  ;;  %v427_v12 = vld [vmem:[%s564_s1 + $0x20] sm:$0xff] }
   0x5   :  { %298 = vmatpush.bf16.msra.mxu3 %v449_v6  ;;  %v16_v11 = vld [vmem:[%s565_s0 + $0x8] sm:$0xff]  ;;  %v435_v13 = vld [vmem:[%s564_s1 + $0x60] sm:$0xff]  ;;  %v426_v17 = vld [vmem:[%s564_s1 + $0x18] sm:$0xff] }
   0x6   :  { %255 = vmatpush.bf16.msra.mxu0 %v429_v3  ;;  %v443_v14 = vld [vmem:[%s564_s1 + $0xa0] sm:$0xff]  ;;  %v80_v16 = vunpack.c.h.b16 %v16_v11  ;;  %v434_v18 = vld [vmem:[%s564_s1 + $0x58] sm:$0xff]  ;;  %v425_v21 = vld [vmem:[%s564_s1 + $0x10] sm:$0xff]  ;;  %v79_v32 = vunpack.c.l.b16 %v16_v11 }
   0x7   :  { %268 = vmatpush.bf16.msra.mxu1 %v437_v4  ;;  %v447_v15 = vld [vmem:[%s564_s1 + $0xc0] sm:$0xff]  ;;  %v442_v19 = vld [vmem:[%s564_s1 + $0x98] sm:$0xff]  ;;  %v433_v22 = vld [vmem:[%s564_s1 + $0x50] sm:$0xff] }
   0x8   :  { %281 = vmatpush.bf16.msra.mxu2 %v445_v5  ;;  %v84_v20 = vpack.c.b16 %v80_v16, %v80_v16  ;;  %v441_v23 = vld [vmem:[%s564_s1 + $0x90] sm:$0xff]  ;;  %v424_v24 = vld [vmem:[%s564_s1 + $0x8] sm:$0xff]  ;;  %v15_v26 = vld [vmem:[%s565_s0] sm:$0xff]  ;;  %v83_v36 = vpack.c.b16 %v79_v32, %v79_v32 }
   0x9   :  { %299 = vmatpush.bf16.msra.mxu3 %v448_v10  ;;  %v432_v25 = vld [vmem:[%s564_s1 + $0x48] sm:$0xff]  ;;  %v77_v28 = vunpack.c.l.b16 %v15_v26  ;;  %v78_v29 = vunpack.c.h.b16 %v15_v26  ;;  %v423_v30 = vld [vmem:[%s564_s1] sm:$0xff] }
   0xa   :  { %256 = vmatpush.bf16.msra.mxu0 %v428_v7  ;;  %v440_v27 = vld [vmem:[%s564_s1 + $0x88] sm:$0xff]  ;;  %v431_v31 = vld [vmem:[%s564_s1 + $0x40] sm:$0xff] }
   0xb   :  { %269 = vmatpush.bf16.msra.mxu1 %v436_v8  ;;  %v439_v33 = vld [vmem:[%s564_s1 + $0x80] sm:$0xff]  ;;  %v81_v34 = vpack.c.b16 %v77_v28, %v77_v28  ;;  %v82_v35 = vpack.c.b16 %v78_v29, %v78_v29 }
   0xc   :  { %282 = vmatpush.bf16.msra.mxu2 %v444_v9  ;;  %v450_v38 = vld [vmem:[%s566_s2] ss:$0 sm:$0xff] }
   0xd   :  { %300 = vmatpush.bf16.msra.mxu3 %v447_v15 }
   0xe   :  { %257 = vmatpush.bf16.msra.mxu0 %v427_v12 }
   0xf   :  { %270 = vmatpush.bf16.msra.mxu1 %v435_v13 }
  0x10   :  { %283 = vmatpush.bf16.msra.mxu2 %v443_v14  ;;  %422 = vmatmul.msk.bf16.vlgmr.msra.gmra.mxu3 %vm250_vm0, %v84_v20 }
  0x12   :  { %258 = vmatpush.bf16.msra.mxu0 %v426_v17 }
  0x13   :  { %271 = vmatpush.bf16.msra.mxu1 %v434_v18 }
  0x14   :  { %284 = vmatpush.bf16.msra.mxu2 %v442_v19 }
  0x16   :  { %259 = vmatpush.bf16.msra.mxu0 %v425_v21 }
  0x17   :  { %272 = vmatpush.bf16.msra.mxu1 %v433_v22 }
  0x18   :  { %285 = vmatpush.bf16.msra.mxu2 %v441_v23 }
  0x1a   :  { %260 = vmatpush.bf16.msra.mxu0 %v424_v24 }
  0x1b   :  { %273 = vmatpush.bf16.msra.mxu1 %v432_v25 }
  0x1c   :  { %286 = vmatpush.bf16.msra.mxu2 %v440_v27 }
  0x1e   :  { %261 = vmatpush.bf16.msra.mxu0 %v423_v30 }
  0x1f   :  { %274 = vmatpush.bf16.msra.mxu1 %v431_v31 }
  0x20   :  { %287 = vmatpush.bf16.msra.mxu2 %v439_v33 }
  0x21   :  { %262 = vmatmul.bf16.vlgmr.msra.gmra.mxu0 %v81_v34 }
  0x22   :  { %275 = vmatmul.bf16.vlgmr.msra.gmra.mxu1 %v82_v35 }
  0x23   :  { %288 = vmatmul.bf16.vlgmr.msra.gmra.mxu2 %v83_v36 }
  0x93   :  { %v302_v37 = vpop.f32.mrf.mxu3 }
  0x9b   :  { %v304_v42 = vpop.f32.mrf.mxu3 }
  0x9e   :  { %v263_v39 = vpop.f32.mrf.mxu0 }
  0x9f   :  { %v276_v40 = vpop.f32.mrf.mxu1  ;;  %v264_v41 = vadd.f32 %v450_v38, %v263_v39 }
  0xa1   :  { %v277_v43 = vadd.f32 %v276_v40, %v264_v41 }
  0xa6   :  { %v289_v44 = vpop.f32.mrf.mxu2  ;;  %v265_v46 = vpop.f32.mrf.mxu0 }
  0xa7   :  { %v290_v45 = vadd.f32 %v289_v44, %v277_v43  ;;  %v278_v47 = vpop.f32.mrf.mxu1 }
  0xa9   :  { %v303_v48 = vadd.f32 %v302_v37, %v290_v45 }
  0xab   :  { %v306_v49 = vmax.f32 %v303_v48, 0.0 }
  0xad   :  { %v307_v50 = vpack.c.bf16 %v306_v49, %v306_v49 }
  0xae   :  { %v291_v51 = vpop.f32.mrf.mxu2 }
  0xaf   :  { %309 = vst.msk [vmem:[%s567_s3] sm:$0xf] %vm308_vm1, %v307_v50 }

// kernel: two_heads_cityscapes_forward.13
= control target key start
LH: loop header
LB: loop body
LE: loop exit
PB: predicated region body
PF: predicated region fallthrough
CT: control target
= control target key end

     0   :  { %vm52_vm0 = vcmask 523264   ;;  %s137_s1 = inlined_call_operand.vmem [shape: bf16[64,64], index: 1, kind: input, shape index: {}]   ;;  %s138_s2 = inlined_call_operand.vmem [shape: f32[1,64], index: 2, kind: input, shape index: {}]   ;;  %s139_s0 = inlined_call_operand.vmem [shape: bf16[8,64], index: 0, kind: input, shape index: {}]   ;;  %s140_s3 = inlined_call_operand.vmem [shape: f32[8,64], index: 3, kind: output, shape index: {}]  }
   0x1   :  { %v94_v0 = vld [vmem:[%s137_s1 + $0x18] sm:$0xff]  ;;  %v93_v1 = vld [vmem:[%s137_s1 + $0x10] sm:$0xff]  ;;  %v92_v2 = vld [vmem:[%s137_s1 + $0x8] sm:$0xff] }
   0x2   :  { %60 = vmatpush.bf16.msra.mxu0 %v94_v0  ;;  %v91_v3 = vld [vmem:[%s137_s1] sm:$0xff] }
   0x3   :  { %v15_v4 = vld [vmem:[%s139_s0] sm:$0xf] }
   0x4   :  { %v95_v5 = vld [vmem:[%s138_s2] ss:$0 sm:$0xff] }
   0x6   :  { %61 = vmatpush.bf16.msra.mxu0 %v93_v1 }
   0xa   :  { %62 = vmatpush.bf16.msra.mxu0 %v92_v2 }
   0xe   :  { %63 = vmatpush.bf16.msra.mxu0 %v91_v3 }
  0x11   :  { %90 = vmatmul.msk.bf16.vlgmr.msra.gmra.mxu0 %vm52_vm0, %v15_v4 }
  0x8e   :  { %v65_v6 = vpop.f32.mrf.mxu0 }
  0x8f   :  { %v66_v7 = vadd.f32 %v95_v5, %v65_v6 }
  0x91   :  { %69 = vst.msk [vmem:[%s140_s3] sm:$0xff] %vm52_vm0, %v66_v7 }
  0x96   :  { %v67_v8 = vpop.f32.mrf.mxu0 }

</bundles_post_ra>
